<compile_context>
chip_gen: v7x
topology: tpu7x:2x2x1
jax: 0.10.0
libtpu: 0.0.40
codegen_flags: <defaults>
</compile_context>

<pallas_src>
import functools

import jax
import jax.numpy as jnp
from jax.experimental import pallas as pl
from jax.experimental.pallas import tpu as pltpu

_VMEM = pl.BlockSpec(memory_space=pltpu.MemorySpace.VMEM)
_BN_EPS = 1e-5
_L2_EPS = 1e-12


# ----------------------------------------------------------------------------
# Shared in-kernel helpers (traced inside kernel bodies)
# ----------------------------------------------------------------------------
def _l2_normalize(x):
    # x / max(||x||, eps)  ==  x * rsqrt(max(sum(x^2), eps^2))   (EUP rsqrt)
    ss = jnp.sum(x * x, axis=-1, keepdims=True)
    return x * jax.lax.rsqrt(jnp.maximum(ss, _L2_EPS * _L2_EPS))


def _bn_affine(v, g, b):
    # BatchNorm1d in training mode: biased batch statistics over rows.
    mu = jnp.mean(v, axis=0, keepdims=True)
    var = jnp.mean(jnp.square(v - mu), axis=0, keepdims=True)
    return (v - mu) * jax.lax.rsqrt(var + _BN_EPS) * g + b


def _projector_body(x, w1, g1, b1, w2, g2, b2):
    # Linear(no bias) -> BN -> ReLU -> Linear(no bias) -> BN
    h = jnp.dot(x, w1, preferred_element_type=jnp.float32)
    h = _bn_affine(h, g1, b1)
    h = jnp.maximum(h, 0.0)
    z = jnp.dot(h, w2, preferred_element_type=jnp.float32)
    return _bn_affine(z, g2, b2)


# ----------------------------------------------------------------------------
# Pallas kernels
# ----------------------------------------------------------------------------
def _encode_pool_kernel(p_ref, x_ref, w_ref, o_ref):
    """Per batch item: y = x @ w (stand-in encoder), pooled = P @ y.

    x_ref: (H*W, C)   channels-last pixels of one batch item
    w_ref: (C, N)     encoder projection (both heads concatenated for x_i)
    p_ref: (PP, H*W)  pooling matrix: ph*pw patch-average rows + 1 global row
    o_ref: (PP, N)    lane-dense pooled features
    """
    y = jnp.dot(x_ref[...], w_ref[...], preferred_element_type=jnp.float32)
    o_ref[...] = jnp.dot(p_ref[...], y, preferred_element_type=jnp.float32)


def _projector_kernel(x_ref, w1_ref, g1_ref, b1_ref, w2_ref, g2_ref, b2_ref,
                      z_ref, xn_ref, *, normalize):
    """One projector instance per grid step (own BN batch statistics)."""
    x = x_ref[...]                       # (N, d_in)
    if normalize:
        x = _l2_normalize(x)
    xn_ref[...] = x                      # the (possibly normalized) features
    z_ref[...] = _projector_body(x, w1_ref[...], g1_ref[...], b1_ref[...],
                                 w2_ref[...], g2_ref[...], b2_ref[...])


def _t_branch_kernel(ht_ref, wp_ref, bp_ref, w1_ref, g1_ref, b1_ref,
                     w2_ref, g2_ref, b2_ref, zt_ref, zp_ref, *, normalize):
    """Prediction head + projector2 on both the normalized and predicted feats."""
    x = ht_ref[...]                      # (B, 192), un-normalized pooled h_i_T
    # prediction head acts on the UN-normalized features (as in the reference)
    hp = jnp.dot(x, wp_ref[...], preferred_element_type=jnp.float32) + bp_ref[...]
    if normalize:
        x = _l2_normalize(x)
    zt_ref[...] = _projector_body(x, w1_ref[...], g1_ref[...], b1_ref[...],
                                  w2_ref[...], g2_ref[...], b2_ref[...])
    zp_ref[...] = _projector_body(hp, w1_ref[...], g1_ref[...], b1_ref[...],
                                  w2_ref[...], g2_ref[...], b2_ref[...])


# ----------------------------------------------------------------------------
# Wrappers (pallas_call plumbing)
# ----------------------------------------------------------------------------
def encode_and_pool(x_nchw, w, pool_mat):
    """NCHW input -> (B, ph*pw+1, N) pooled encoder features, grid over B."""
    B, C, H, W = x_nchw.shape
    HW = H * W
    PP = pool_mat.shape[0]
    N = w.shape[1]
    xf = jnp.transpose(x_nchw, (0, 2, 3, 1)).reshape(B, HW, C)  # channels-last
    return pl.pallas_call(
        _encode_pool_kernel,
        out_shape=jax.ShapeDtypeStruct((B, PP, N), jnp.float32),
        grid=(B,),
        in_specs=[
            pl.BlockSpec((PP, HW), lambda b: (0, 0)),          # pooling matrix
            pl.BlockSpec((None, HW, C), lambda b: (b, 0, 0)),  # one batch item
            pl.BlockSpec((C, N), lambda b: (0, 0)),            # weights resident
        ],
        out_specs=pl.BlockSpec((None, PP, N), lambda b: (b, 0, 0)),
        compiler_params=pltpu.CompilerParams(dimension_semantics=("parallel",)),
    )(pool_mat, xf, w)


def pallas_projector_batched(x_stack, p, normalize):
    """Apply the projector to a stack of instances: (n_inst, N, d_in).

    One grid step per instance -> BN stats are per-instance (per PyTorch call);
    projector weights stay VMEM-resident across grid steps.  Also returns the
    (possibly L2-normalized) input features for each instance.
    """
    n_inst, N, d_in = x_stack.shape
    d_mid = p["w1"].shape[1]
    d_out = p["w2"].shape[1]
    kern = functools.partial(_projector_kernel, normalize=normalize)
    z, xn = pl.pallas_call(
        kern,
        out_shape=(
            jax.ShapeDtypeStruct((n_inst, N, d_out), jnp.float32),
            jax.ShapeDtypeStruct((n_inst, N, d_in), jnp.float32),
        ),
        grid=(n_inst,),
        in_specs=[
            pl.BlockSpec((None, N, d_in), lambda i: (i, 0, 0)),
            pl.BlockSpec((d_in, d_mid), lambda i: (0, 0)),
            pl.BlockSpec((1, d_mid), lambda i: (0, 0)),
            pl.BlockSpec((1, d_mid), lambda i: (0, 0)),
            pl.BlockSpec((d_mid, d_out), lambda i: (0, 0)),
            pl.BlockSpec((1, d_out), lambda i: (0, 0)),
            pl.BlockSpec((1, d_out), lambda i: (0, 0)),
        ],
        out_specs=(
            pl.BlockSpec((None, N, d_out), lambda i: (i, 0, 0)),
            pl.BlockSpec((None, N, d_in), lambda i: (i, 0, 0)),
        ),
        compiler_params=pltpu.CompilerParams(dimension_semantics=("parallel",)),
    )(x_stack, p["w1"], p["g1"], p["b1"], p["w2"], p["g2"], p["b2"])
    return z, xn


def pallas_t_branch(h_t, params, normalize):
    """Fused prediction head + projector2 for z_i_T and z_i_predict (tiny block)."""
    B = h_t.shape[0]
    p2 = params["proj2"]
    d_out = p2["w2"].shape[1]
    kern = functools.partial(_t_branch_kernel, normalize=normalize)
    return pl.pallas_call(
        kern,
        out_shape=(
            jax.ShapeDtypeStruct((B, d_out), jnp.float32),
            jax.ShapeDtypeStruct((B, d_out), jnp.float32),
        ),
        in_specs=[_VMEM] * 9,
        out_specs=(_VMEM, _VMEM),
    )(h_t, params["w_pred"], params["b_pred"],
      p2["w1"], p2["g1"], p2["b1"], p2["w2"], p2["g2"], p2["b2"])


# ----------------------------------------------------------------------------
# Pooling matrix (plain JAX, built once)
# ----------------------------------------------------------------------------
def make_pool_matrix(H, W, ph, pw):
    """(ph*pw + 1, H*W): rows 0..ph*pw-1 = patch averages, last row = global avg."""
    assert H % ph == 0 and W % pw == 0, "adaptive pool requires divisible shapes"
    kh, kw = H // ph, W // pw
    py = jnp.arange(H) // kh
    px = jnp.arange(W) // kw
    patch_id = (py[:, None] * pw + px[None, :]).reshape(H * W)          # (HW,)
    onehot = (patch_id[None, :] == jnp.arange(ph * pw)[:, None])
    patch_rows = onehot.astype(jnp.float32) / float(kh * kw)            # (ph*pw, HW)
    global_row = jnp.full((1, H * W), 1.0 / float(H * W), jnp.float32)  # (1, HW)
    return jnp.concatenate([patch_rows, global_row], axis=0)


# ----------------------------------------------------------------------------
# Forward pass
# ----------------------------------------------------------------------------
def rmvit_forward(params, x_i, x_j, *, normalize=True, patch_dim=(4, 4)):
    # TODO(synk): RecurrentWrapperWithViT / avgpool_feature / avgpool_patch /
    # avgpool / prediction_head / projector2 / patch_dim are not defined in the
    # provided source; stand-ins: per-pixel linear encoder, global average pool,
    # AdaptiveAvgPool2d(patch_dim), Linear(192,192)+bias, mirrored projector.
    emb = params["w_enc"].shape[1]
    B, C, H, W = x_i.shape
    ph, pw = patch_dim
    n_patch = ph * pw

    pool_mat = make_pool_matrix(H, W, ph, pw)                       # (n_patch+1, HW)

    # Encoder + pooling, both encoder heads fused into one matmul for x_i.
    w_cat = jnp.concatenate([params["w_enc"], params["w_enc_T"]], axis=1)  # (C, emb+192)
    pooled_i = encode_and_pool(x_i, w_cat, pool_mat)                # (B, n_patch+1, emb+192)
    pooled_j = encode_and_pool(x_j, params["w_enc"], pool_mat)      # (B, n_patch+1, emb)

    h_i_original = pooled_i[:, n_patch, :emb]                       # (B, emb), un-normalized
    h_i_t = pooled_i[:, n_patch, emb:]                              # (B, 192), un-normalized
    h_i_patch = pooled_i[:, :n_patch, :emb].reshape(B * n_patch, emb)
    h_j_global = pooled_j[:, n_patch, :]                            # (B, emb)
    h_j_patch = pooled_j[:, :n_patch, :].reshape(B * n_patch, emb)
    # NOTE: h_j_original from the reference is computed but never used/returned;
    # it is intentionally skipped (it equals h_j_global anyway).

    # Global-pool group: projector over {h_i, h_j}, 2 instances in one launch.
    x_glob = jnp.stack([h_i_original, h_j_global], axis=0)          # (2, B, emb)
    z_glob, xn_glob = pallas_projector_batched(x_glob, params["proj"], normalize)
    z_i, z_j = z_glob[0], z_glob[1]
    h_i = xn_glob[0]                                                # normalized iff normalize

    # Patch group: projector over {h_i_patch, h_j_patch}, 2 instances in one launch.
    x_patch = jnp.stack([h_i_patch, h_j_patch], axis=0)             # (2, B*n_patch, emb)
    z_patch, _ = pallas_projector_batched(x_patch, params["proj"], normalize)
    z_i_patch, z_j_patch = z_patch[0], z_patch[1]

    # t-branch: prediction head + projector2 for z_i_T and z_i_predict, one launch.
    z_i_t, z_i_predict = pallas_t_branch(h_i_t, params, normalize)

    return z_i, z_j, z_i_patch, z_j_patch, z_i_predict, z_i_t, h_i_original, h_i


# ----------------------------------------------------------------------------
# Deterministic parameter init + run
# ----------------------------------------------------------------------------
def make_params(key, in_ch, emb_dim, projection_dim, t_dim=192):
    ks = jax.random.split(key, 8)

    def w(k, shape, scale=0.1):
        return (scale * jax.random.normal(k, shape)).astype(jnp.float32)

    def proj_params(k, d_in, d_mid, d_out):
        k1, k2 = jax.random.split(k)
        return {
            "w1": w(k1, (d_in, d_mid)),
            "g1": jnp.ones((1, d_mid), jnp.float32),
            "b1": jnp.zeros((1, d_mid), jnp.float32),
            "w2": w(k2, (d_mid, d_out)),
            "g2": jnp.ones((1, d_out), jnp.float32),
            "b2": jnp.zeros((1, d_out), jnp.float32),
        }

    return {
        "w_enc": w(ks[0], (in_ch, emb_dim)),
        "w_enc_T": w(ks[1], (in_ch, t_dim)),
        "w_pred": w(ks[2], (t_dim, t_dim)),
        "b_pred": w(ks[3], (1, t_dim), scale=0.01),
        "proj": proj_params(ks[4], emb_dim, emb_dim, projection_dim),
        "proj2": proj_params(ks[5], t_dim, t_dim, projection_dim),
    }


if __name__ == "__main__":
    key = jax.random.PRNGKey(0)
    kp, ki, kj = jax.random.split(key, 3)

    B, C, H, W = 2, 4, 16, 16          # small NCHW inputs
    emb_dim, projection_dim = 32, 16   # num_mem_token / segment_size unused by stand-in

    params = make_params(kp, C, emb_dim, projection_dim)
    x_i = jax.random.normal(ki, (B, C, H, W), jnp.float32)
    x_j = jax.random.normal(kj, (B, C, H, W), jnp.float32)

    fwd = jax.jit(functools.partial(rmvit_forward, normalize=True, patch_dim=(4, 4)))
    outs = fwd(params, x_i, x_j)
    jax.block_until_ready(outs)

    z_i, z_j, z_i_patch, z_j_patch, z_i_predict, z_i_t, h_i_original, h_i = outs
    assert z_i.shape == (B, projection_dim)
    assert z_j.shape == (B, projection_dim)
    assert z_i_patch.shape == (B * 16, projection_dim)
    assert z_j_patch.shape == (B * 16, projection_dim)
    assert z_i_predict.shape == (B, projection_dim)
    assert z_i_t.shape == (B, projection_dim)
    assert h_i_original.shape == (B, emb_dim)
    assert h_i.shape == (B, emb_dim)
    assert all(bool(jnp.all(jnp.isfinite(o))) for o in outs)

    print("KERNEL_OK")
</pallas_src>

<mosaic_0001>
module attributes {stable_mosaic.version = 11 : i64} {
  func.func @_encode_pool_kernel(%arg0: i32, %arg1: memref<17x256xf32, #tpu.memory_space<vmem>>, %arg2: memref<1x256x4xf32, #tpu.memory_space<vmem>>, %arg3: memref<4x32xf32, #tpu.memory_space<vmem>>, %arg4: memref<1x17x32xf32, #tpu.memory_space<vmem>>) attributes {dimension_semantics = [#tpu.dimension_semantics<parallel>], iteration_bounds = array<i64: 2>, scalar_prefetch = 0 : i64, scratch_operands = 0 : i64, tpu.core_type = #tpu.core_type<tc>, window_params = [{pipeline_mode = #tpu.pipeline_mode<synchronous>, transform_indices = @transform_0, window_bounds = array<i64: 17, 256>}, {transform_indices = @transform_1, window_bounds = array<i64: 1, 256, 4>}, {pipeline_mode = #tpu.pipeline_mode<synchronous>, transform_indices = @transform_2, window_bounds = array<i64: 4, 32>}, {transform_indices = @transform_3, window_bounds = array<i64: 1, 17, 32>}]} {
    %c0 = arith.constant 0 : index
    %c0_0 = arith.constant 0 : index
    %c0_1 = arith.constant 0 : index
    %0 = vector.load %arg2[%c0, %c0_0, %c0_1] : memref<1x256x4xf32, #tpu.memory_space<vmem>>, vector<1x256x4xf32>
    %1 = vector.shape_cast %0 : vector<1x256x4xf32> to vector<256x4xf32>
    %c0_2 = arith.constant 0 : index
    %c0_3 = arith.constant 0 : index
    %2 = vector.load %arg3[%c0_2, %c0_3] : memref<4x32xf32, #tpu.memory_space<vmem>>, vector<4x32xf32>
    %cst = arith.constant dense<0.000000e+00> : vector<256x32xf32>
    %3 = tpu.matmul %1, %2, %cst {dimension_numbers = #tpu.dot_dimension_numbers<[1], [0], [0], [1], [0, 0, 1, 1], [], []>} : vector<256x4xf32>, vector<4x32xf32>, vector<256x32xf32> -> vector<256x32xf32>
    %c0_4 = arith.constant 0 : index
    %c0_5 = arith.constant 0 : index
    %4 = vector.load %arg1[%c0_4, %c0_5] : memref<17x256xf32, #tpu.memory_space<vmem>>, vector<17x256xf32>
    %cst_6 = arith.constant dense<0.000000e+00> : vector<17x32xf32>
    %5 = tpu.matmul %4, %3, %cst_6 {dimension_numbers = #tpu.dot_dimension_numbers<[1], [0], [0], [1], [0, 0, 1, 1], [], []>} : vector<17x256xf32>, vector<256x32xf32>, vector<17x32xf32> -> vector<17x32xf32>
    %c0_7 = arith.constant 0 : index
    %c0_8 = arith.constant 0 : index
    %c0_9 = arith.constant 0 : index
    %6 = vector.load %arg4[%c0_7, %c0_8, %c0_9] : memref<1x17x32xf32, #tpu.memory_space<vmem>>, vector<1x17x32xf32>
    %7 = vector.shape_cast %6 : vector<1x17x32xf32> to vector<17x32xf32>
    %8 = vector.shape_cast %5 : vector<17x32xf32> to vector<1x17x32xf32>
    tpu.vector_store %arg4[%c0_7, %c0_8, %c0_9], %8 {strides = array<i32>} : memref<1x17x32xf32, #tpu.memory_space<vmem>>, vector<1x17x32xf32>,
    return
  }
  func.func @transform_0(%arg0: i32) -> (i32, i32) {
    %c0_i32 = arith.constant 0 : i32
    %c0_i32_0 = arith.constant 0 : i32
    %c0_i32_1 = arith.constant 0 : i32
    return %c0_i32, %c0_i32_0 : i32, i32
  }
  func.func @transform_1(%arg0: i32) -> (i32, i32, i32) {
    %c0_i32 = arith.constant 0 : i32
    %c0_i32_0 = arith.constant 0 : i32
    %c0_i32_1 = arith.constant 0 : i32
    return %arg0, %c0_i32, %c0_i32_0 : i32, i32, i32
  }
  func.func @transform_2(%arg0: i32) -> (i32, i32) {
    %c0_i32 = arith.constant 0 : i32
    %c0_i32_0 = arith.constant 0 : i32
    %c0_i32_1 = arith.constant 0 : i32
    return %c0_i32, %c0_i32_0 : i32, i32
  }
  func.func @transform_3(%arg0: i32) -> (i32, i32, i32) {
    %c0_i32 = arith.constant 0 : i32
    %c0_i32_0 = arith.constant 0 : i32
    %c0_i32_1 = arith.constant 0 : i32
    return %arg0, %c0_i32, %c0_i32_0 : i32, i32, i32
  }
}

module attributes {stable_mosaic.version = 11 : i64} {
  func.func @_encode_pool_kernel(%arg0: i32, %arg1: memref<17x256xf32, #tpu.memory_space<vmem>>, %arg2: memref<1x256x4xf32, #tpu.memory_space<vmem>>, %arg3: memref<4x224xf32, #tpu.memory_space<vmem>>, %arg4: memref<1x17x224xf32, #tpu.memory_space<vmem>>) attributes {dimension_semantics = [#tpu.dimension_semantics<parallel>], iteration_bounds = array<i64: 2>, scalar_prefetch = 0 : i64, scratch_operands = 0 : i64, tpu.core_type = #tpu.core_type<tc>, window_params = [{pipeline_mode = #tpu.pipeline_mode<synchronous>, transform_indices = @transform_0, window_bounds = array<i64: 17, 256>}, {transform_indices = @transform_1, window_bounds = array<i64: 1, 256, 4>}, {pipeline_mode = #tpu.pipeline_mode<synchronous>, transform_indices = @transform_2, window_bounds = array<i64: 4, 224>}, {transform_indices = @transform_3, window_bounds = array<i64: 1, 17, 224>}]} {
    %c0 = arith.constant 0 : index
    %c0_0 = arith.constant 0 : index
    %c0_1 = arith.constant 0 : index
    %0 = vector.load %arg2[%c0, %c0_0, %c0_1] : memref<1x256x4xf32, #tpu.memory_space<vmem>>, vector<1x256x4xf32>
    %1 = vector.shape_cast %0 : vector<1x256x4xf32> to vector<256x4xf32>
    %c0_2 = arith.constant 0 : index
    %c0_3 = arith.constant 0 : index
    %2 = vector.load %arg3[%c0_2, %c0_3] : memref<4x224xf32, #tpu.memory_space<vmem>>, vector<4x224xf32>
    %cst = arith.constant dense<0.000000e+00> : vector<256x224xf32>
    %3 = tpu.matmul %1, %2, %cst {dimension_numbers = #tpu.dot_dimension_numbers<[1], [0], [0], [1], [0, 0, 1, 1], [], []>} : vector<256x4xf32>, vector<4x224xf32>, vector<256x224xf32> -> vector<256x224xf32>
    %c0_4 = arith.constant 0 : index
    %c0_5 = arith.constant 0 : index
    %4 = vector.load %arg1[%c0_4, %c0_5] : memref<17x256xf32, #tpu.memory_space<vmem>>, vector<17x256xf32>
    %cst_6 = arith.constant dense<0.000000e+00> : vector<17x224xf32>
    %5 = tpu.matmul %4, %3, %cst_6 {dimension_numbers = #tpu.dot_dimension_numbers<[1], [0], [0], [1], [0, 0, 1, 1], [], []>} : vector<17x256xf32>, vector<256x224xf32>, vector<17x224xf32> -> vector<17x224xf32>
    %c0_7 = arith.constant 0 : index
    %c0_8 = arith.constant 0 : index
    %c0_9 = arith.constant 0 : index
    %6 = vector.load %arg4[%c0_7, %c0_8, %c0_9] : memref<1x17x224xf32, #tpu.memory_space<vmem>>, vector<1x17x224xf32>
    %7 = vector.shape_cast %6 : vector<1x17x224xf32> to vector<17x224xf32>
    %8 = vector.shape_cast %5 : vector<17x224xf32> to vector<1x17x224xf32>
    tpu.vector_store %arg4[%c0_7, %c0_8, %c0_9], %8 {strides = array<i32>} : memref<1x17x224xf32, #tpu.memory_space<vmem>>, vector<1x17x224xf32>,
    return
  }
  func.func @transform_0(%arg0: i32) -> (i32, i32) {
    %c0_i32 = arith.constant 0 : i32
    %c0_i32_0 = arith.constant 0 : i32
    %c0_i32_1 = arith.constant 0 : i32
    return %c0_i32, %c0_i32_0 : i32, i32
  }
  func.func @transform_1(%arg0: i32) -> (i32, i32, i32) {
    %c0_i32 = arith.constant 0 : i32
    %c0_i32_0 = arith.constant 0 : i32
    %c0_i32_1 = arith.constant 0 : i32
    return %arg0, %c0_i32, %c0_i32_0 : i32, i32, i32
  }
  func.func @transform_2(%arg0: i32) -> (i32, i32) {
    %c0_i32 = arith.constant 0 : i32
    %c0_i32_0 = arith.constant 0 : i32
    %c0_i32_1 = arith.constant 0 : i32
    return %c0_i32, %c0_i32_0 : i32, i32
  }
  func.func @transform_3(%arg0: i32) -> (i32, i32, i32) {
    %c0_i32 = arith.constant 0 : i32
    %c0_i32_0 = arith.constant 0 : i32
    %c0_i32_1 = arith.constant 0 : i32
    return %arg0, %c0_i32, %c0_i32_0 : i32, i32, i32
  }
}

module attributes {stable_mosaic.version = 11 : i64} {
  func.func @_projector_kernel(%arg0: i32, %arg1: memref<1x2x32xf32, #tpu.memory_space<vmem>>, %arg2: memref<32x32xf32, #tpu.memory_space<vmem>>, %arg3: memref<1x32xf32, #tpu.memory_space<vmem>>, %arg4: memref<1x32xf32, #tpu.memory_space<vmem>>, %arg5: memref<32x16xf32, #tpu.memory_space<vmem>>, %arg6: memref<1x16xf32, #tpu.memory_space<vmem>>, %arg7: memref<1x16xf32, #tpu.memory_space<vmem>>, %arg8: memref<1x2x16xf32, #tpu.memory_space<vmem>>, %arg9: memref<1x2x32xf32, #tpu.memory_space<vmem>>) attributes {dimension_semantics = [#tpu.dimension_semantics<parallel>], iteration_bounds = array<i64: 2>, scalar_prefetch = 0 : i64, scratch_operands = 0 : i64, tpu.core_type = #tpu.core_type<tc>, window_params = [{transform_indices = @transform_0, window_bounds = array<i64: 1, 2, 32>}, {pipeline_mode = #tpu.pipeline_mode<synchronous>, transform_indices = @transform_1, window_bounds = array<i64: 32, 32>}, {pipeline_mode = #tpu.pipeline_mode<synchronous>, transform_indices = @transform_2, window_bounds = array<i64: 1, 32>}, {pipeline_mode = #tpu.pipeline_mode<synchronous>, transform_indices = @transform_3, window_bounds = array<i64: 1, 32>}, {pipeline_mode = #tpu.pipeline_mode<synchronous>, transform_indices = @transform_4, window_bounds = array<i64: 32, 16>}, {pipeline_mode = #tpu.pipeline_mode<synchronous>, transform_indices = @transform_5, window_bounds = array<i64: 1, 16>}, {pipeline_mode = #tpu.pipeline_mode<synchronous>, transform_indices = @transform_6, window_bounds = array<i64: 1, 16>}, {transform_indices = @transform_7, window_bounds = array<i64: 1, 2, 16>}, {transform_indices = @transform_8, window_bounds = array<i64: 1, 2, 32>}]} {
    %c0 = arith.constant 0 : index
    %c0_0 = arith.constant 0 : index
    %c0_1 = arith.constant 0 : index
    %0 = vector.load %arg1[%c0, %c0_0, %c0_1] : memref<1x2x32xf32, #tpu.memory_space<vmem>>, vector<1x2x32xf32>
    %1 = vector.shape_cast %0 : vector<1x2x32xf32> to vector<2x32xf32>
    %2 = arith.mulf %1, %1 : vector<2x32xf32>
    %cst = arith.constant dense<0.000000e+00> : vector<2xf32>
    %3 = vector.multi_reduction <add>, %2, %cst [1] : vector<2x32xf32> to vector<2xf32>
    %4 = vector.shape_cast %3 : vector<2xf32> to vector<2x1xf32>
    %cst_2 = arith.constant 1.000000e-24 : f32
    %5 = vector.broadcast %cst_2 : f32 to vector<2x1xf32>
    %6 = arith.maximumf %4, %5 : vector<2x1xf32>
    %7 = math.rsqrt %6 : vector<2x1xf32>
    %8 = vector.broadcast %7 : vector<2x1xf32> to vector<2x32xf32>
    %9 = arith.mulf %1, %8 : vector<2x32xf32>
    %c0_3 = arith.constant 0 : index
    %c0_4 = arith.constant 0 : index
    %c0_5 = arith.constant 0 : index
    %10 = vector.load %arg9[%c0_3, %c0_4, %c0_5] : memref<1x2x32xf32, #tpu.memory_space<vmem>>, vector<1x2x32xf32>
    %11 = vector.shape_cast %10 : vector<1x2x32xf32> to vector<2x32xf32>
    %12 = vector.shape_cast %9 : vector<2x32xf32> to vector<1x2x32xf32>
    tpu.vector_store %arg9[%c0_3, %c0_4, %c0_5], %12 {strides = array<i32>} : memref<1x2x32xf32, #tpu.memory_space<vmem>>, vector<1x2x32xf32>,
    %c0_6 = arith.constant 0 : index
    %c0_7 = arith.constant 0 : index
    %13 = vector.load %arg2[%c0_6, %c0_7] : memref<32x32xf32, #tpu.memory_space<vmem>>, vector<32x32xf32>
    %c0_8 = arith.constant 0 : index
    %c0_9 = arith.constant 0 : index
    %14 = vector.load %arg3[%c0_8, %c0_9] : memref<1x32xf32, #tpu.memory_space<vmem>>, vector<1x32xf32>
    %c0_10 = arith.constant 0 : index
    %c0_11 = arith.constant 0 : index
    %15 = vector.load %arg4[%c0_10, %c0_11] : memref<1x32xf32, #tpu.memory_space<vmem>>, vector<1x32xf32>
    %c0_12 = arith.constant 0 : index
    %c0_13 = arith.constant 0 : index
    %16 = vector.load %arg5[%c0_12, %c0_13] : memref<32x16xf32, #tpu.memory_space<vmem>>, vector<32x16xf32>
    %c0_14 = arith.constant 0 : index
    %c0_15 = arith.constant 0 : index
    %17 = vector.load %arg6[%c0_14, %c0_15] : memref<1x16xf32, #tpu.memory_space<vmem>>, vector<1x16xf32>
    %c0_16 = arith.constant 0 : index
    %c0_17 = arith.constant 0 : index
    %18 = vector.load %arg7[%c0_16, %c0_17] : memref<1x16xf32, #tpu.memory_space<vmem>>, vector<1x16xf32>
    %cst_18 = arith.constant dense<0.000000e+00> : vector<2x32xf32>
    %19 = tpu.matmul %9, %13, %cst_18 {dimension_numbers = #tpu.dot_dimension_numbers<[1], [0], [0], [1], [0, 0, 1, 1], [], []>} : vector<2x32xf32>, vector<32x32xf32>, vector<2x32xf32> -> vector<2x32xf32>
    %cst_19 = arith.constant dense<0.000000e+00> : vector<32xf32>
    %20 = vector.multi_reduction <add>, %19, %cst_19 [0] : vector<2x32xf32> to vector<32xf32>
    %21 = vector.shape_cast %20 : vector<32xf32> to vector<1x32xf32>
    %cst_20 = arith.constant 2.000000e+00 : f32
    %22 = vector.broadcast %cst_20 : f32 to vector<1x32xf32>
    %23 = arith.divf %21, %22 : vector<1x32xf32>
    %24 = vector.broadcast %23 : vector<1x32xf32> to vector<2x32xf32>
    %25 = arith.subf %19, %24 : vector<2x32xf32>
    %26 = arith.mulf %25, %25 : vector<2x32xf32>
    %cst_21 = arith.constant dense<0.000000e+00> : vector<32xf32>
    %27 = vector.multi_reduction <add>, %26, %cst_21 [0] : vector<2x32xf32> to vector<32xf32>
    %28 = vector.shape_cast %27 : vector<32xf32> to vector<1x32xf32>
    %cst_22 = arith.constant 2.000000e+00 : f32
    %29 = vector.broadcast %cst_22 : f32 to vector<1x32xf32>
    %30 = arith.divf %28, %29 : vector<1x32xf32>
    %31 = vector.broadcast %23 : vector<1x32xf32> to vector<2x32xf32>
    %32 = arith.subf %19, %31 : vector<2x32xf32>
    %cst_23 = arith.constant 9.99999974E-6 : f32
    %33 = vector.broadcast %cst_23 : f32 to vector<1x32xf32>
    %34 = arith.addf %30, %33 : vector<1x32xf32>
    %35 = math.rsqrt %34 : vector<1x32xf32>
    %36 = vector.broadcast %35 : vector<1x32xf32> to vector<2x32xf32>
    %37 = arith.mulf %32, %36 : vector<2x32xf32>
    %38 = vector.broadcast %14 : vector<1x32xf32> to vector<2x32xf32>
    %39 = arith.mulf %37, %38 : vector<2x32xf32>
    %40 = vector.broadcast %15 : vector<1x32xf32> to vector<2x32xf32>
    %41 = arith.addf %39, %40 : vector<2x32xf32>
    %cst_24 = arith.constant 0.000000e+00 : f32
    %42 = vector.broadcast %cst_24 : f32 to vector<2x32xf32>
    %43 = arith.maximumf %41, %42 : vector<2x32xf32>
    %cst_25 = arith.constant dense<0.000000e+00> : vector<2x16xf32>
    %44 = tpu.matmul %43, %16, %cst_25 {dimension_numbers = #tpu.dot_dimension_numbers<[1], [0], [0], [1], [0, 0, 1, 1], [], []>} : vector<2x32xf32>, vector<32x16xf32>, vector<2x16xf32> -> vector<2x16xf32>
    %cst_26 = arith.constant dense<0.000000e+00> : vector<16xf32>
    %45 = vector.multi_reduction <add>, %44, %cst_26 [0] : vector<2x16xf32> to vector<16xf32>
    %46 = vector.shape_cast %45 : vector<16xf32> to vector<1x16xf32>
    %cst_27 = arith.constant 2.000000e+00 : f32
    %47 = vector.broadcast %cst_27 : f32 to vector<1x16xf32>
    %48 = arith.divf %46, %47 : vector<1x16xf32>
    %49 = vector.broadcast %48 : vector<1x16xf32> to vector<2x16xf32>
    %50 = arith.subf %44, %49 : vector<2x16xf32>
    %51 = arith.mulf %50, %50 : vector<2x16xf32>
    %cst_28 = arith.constant dense<0.000000e+00> : vector<16xf32>
    %52 = vector.multi_reduction <add>, %51, %cst_28 [0] : vector<2x16xf32> to vector<16xf32>
    %53 = vector.shape_cast %52 : vector<16xf32> to vector<1x16xf32>
    %cst_29 = arith.constant 2.000000e+00 : f32
    %54 = vector.broadcast %cst_29 : f32 to vector<1x16xf32>
    %55 = arith.divf %53, %54 : vector<1x16xf32>
    %56 = vector.broadcast %48 : vector<1x16xf32> to vector<2x16xf32>
    %57 = arith.subf %44, %56 : vector<2x16xf32>
    %cst_30 = arith.constant 9.99999974E-6 : f32
    %58 = vector.broadcast %cst_30 : f32 to vector<1x16xf32>
    %59 = arith.addf %55, %58 : vector<1x16xf32>
    %60 = math.rsqrt %59 : vector<1x16xf32>
    %61 = vector.broadcast %60 : vector<1x16xf32> to vector<2x16xf32>
    %62 = arith.mulf %57, %61 : vector<2x16xf32>
    %63 = vector.broadcast %17 : vector<1x16xf32> to vector<2x16xf32>
    %64 = arith.mulf %62, %63 : vector<2x16xf32>
    %65 = vector.broadcast %18 : vector<1x16xf32> to vector<2x16xf32>
    %66 = arith.addf %64, %65 : vector<2x16xf32>
    %c0_31 = arith.constant 0 : index
    %c0_32 = arith.constant 0 : index
    %c0_33 = arith.constant 0 : index
    %67 = vector.load %arg8[%c0_31, %c0_32, %c0_33] : memref<1x2x16xf32, #tpu.memory_space<vmem>>, vector<1x2x16xf32>
    %68 = vector.shape_cast %67 : vector<1x2x16xf32> to vector<2x16xf32>
    %69 = vector.shape_cast %66 : vector<2x16xf32> to vector<1x2x16xf32>
    tpu.vector_store %arg8[%c0_31, %c0_32, %c0_33], %69 {strides = array<i32>} : memref<1x2x16xf32, #tpu.memory_space<vmem>>, vector<1x2x16xf32>,
    return
  }
  func.func @transform_0(%arg0: i32) -> (i32, i32, i32) {
    %c0_i32 = arith.constant 0 : i32
    %c0_i32_0 = arith.constant 0 : i32
    %c0_i32_1 = arith.constant 0 : i32
    return %arg0, %c0_i32, %c0_i32_0 : i32, i32, i32
  }
  func.func @transform_1(%arg0: i32) -> (i32, i32) {
    %c0_i32 = arith.constant 0 : i32
    %c0_i32_0 = arith.constant 0 : i32
    %c0_i32_1 = arith.constant 0 : i32
    return %c0_i32, %c0_i32_0 : i32, i32
  }
  func.func @transform_2(%arg0: i32) -> (i32, i32) {
    %c0_i32 = arith.constant 0 : i32
    %c0_i32_0 = arith.constant 0 : i32
    %c0_i32_1 = arith.constant 0 : i32
    return %c0_i32, %c0_i32_0 : i32, i32
  }
  func.func @transform_3(%arg0: i32) -> (i32, i32) {
    %c0_i32 = arith.constant 0 : i32
    %c0_i32_0 = arith.constant 0 : i32
    %c0_i32_1 = arith.constant 0 : i32
    return %c0_i32, %c0_i32_0 : i32, i32
  }
  func.func @transform_4(%arg0: i32) -> (i32, i32) {
    %c0_i32 = arith.constant 0 : i32
    %c0_i32_0 = arith.constant 0 : i32
    %c0_i32_1 = arith.constant 0 : i32
    return %c0_i32, %c0_i32_0 : i32, i32
  }
  func.func @transform_5(%arg0: i32) -> (i32, i32) {
    %c0_i32 = arith.constant 0 : i32
    %c0_i32_0 = arith.constant 0 : i32
    %c0_i32_1 = arith.constant 0 : i32
    return %c0_i32, %c0_i32_0 : i32, i32
  }
  func.func @transform_6(%arg0: i32) -> (i32, i32) {
    %c0_i32 = arith.constant 0 : i32
    %c0_i32_0 = arith.constant 0 : i32
    %c0_i32_1 = arith.constant 0 : i32
    return %c0_i32, %c0_i32_0 : i32, i32
  }
  func.func @transform_7(%arg0: i32) -> (i32, i32, i32) {
    %c0_i32 = arith.constant 0 : i32
    %c0_i32_0 = arith.constant 0 : i32
    %c0_i32_1 = arith.constant 0 : i32
    return %arg0, %c0_i32, %c0_i32_0 : i32, i32, i32
  }
  func.func @transform_8(%arg0: i32) -> (i32, i32, i32) {
    %c0_i32 = arith.constant 0 : i32
    %c0_i32_0 = arith.constant 0 : i32
    %c0_i32_1 = arith.constant 0 : i32
    return %arg0, %c0_i32, %c0_i32_0 : i32, i32, i32
  }
}

module attributes {stable_mosaic.version = 11 : i64} {
  func.func @_projector_kernel(%arg0: i32, %arg1: memref<1x32x32xf32, #tpu.memory_space<vmem>>, %arg2: memref<32x32xf32, #tpu.memory_space<vmem>>, %arg3: memref<1x32xf32, #tpu.memory_space<vmem>>, %arg4: memref<1x32xf32, #tpu.memory_space<vmem>>, %arg5: memref<32x16xf32, #tpu.memory_space<vmem>>, %arg6: memref<1x16xf32, #tpu.memory_space<vmem>>, %arg7: memref<1x16xf32, #tpu.memory_space<vmem>>, %arg8: memref<1x32x16xf32, #tpu.memory_space<vmem>>, %arg9: memref<1x32x32xf32, #tpu.memory_space<vmem>>) attributes {dimension_semantics = [#tpu.dimension_semantics<parallel>], iteration_bounds = array<i64: 2>, scalar_prefetch = 0 : i64, scratch_operands = 0 : i64, tpu.core_type = #tpu.core_type<tc>, window_params = [{transform_indices = @transform_0, window_bounds = array<i64: 1, 32, 32>}, {pipeline_mode = #tpu.pipeline_mode<synchronous>, transform_indices = @transform_1, window_bounds = array<i64: 32, 32>}, {pipeline_mode = #tpu.pipeline_mode<synchronous>, transform_indices = @transform_2, window_bounds = array<i64: 1, 32>}, {pipeline_mode = #tpu.pipeline_mode<synchronous>, transform_indices = @transform_3, window_bounds = array<i64: 1, 32>}, {pipeline_mode = #tpu.pipeline_mode<synchronous>, transform_indices = @transform_4, window_bounds = array<i64: 32, 16>}, {pipeline_mode = #tpu.pipeline_mode<synchronous>, transform_indices = @transform_5, window_bounds = array<i64: 1, 16>}, {pipeline_mode = #tpu.pipeline_mode<synchronous>, transform_indices = @transform_6, window_bounds = array<i64: 1, 16>}, {transform_indices = @transform_7, window_bounds = array<i64: 1, 32, 16>}, {transform_indices = @transform_8, window_bounds = array<i64: 1, 32, 32>}]} {
    %c0 = arith.constant 0 : index
    %c0_0 = arith.constant 0 : index
    %c0_1 = arith.constant 0 : index
    %0 = vector.load %arg1[%c0, %c0_0, %c0_1] : memref<1x32x32xf32, #tpu.memory_space<vmem>>, vector<1x32x32xf32>
    %1 = vector.shape_cast %0 : vector<1x32x32xf32> to vector<32x32xf32>
    %2 = arith.mulf %1, %1 : vector<32x32xf32>
    %cst = arith.constant dense<0.000000e+00> : vector<32xf32>
    %3 = vector.multi_reduction <add>, %2, %cst [1] : vector<32x32xf32> to vector<32xf32>
    %4 = vector.shape_cast %3 : vector<32xf32> to vector<32x1xf32>
    %cst_2 = arith.constant 1.000000e-24 : f32
    %5 = vector.broadcast %cst_2 : f32 to vector<32x1xf32>
    %6 = arith.maximumf %4, %5 : vector<32x1xf32>
    %7 = math.rsqrt %6 : vector<32x1xf32>
    %8 = vector.broadcast %7 : vector<32x1xf32> to vector<32x32xf32>
    %9 = arith.mulf %1, %8 : vector<32x32xf32>
    %c0_3 = arith.constant 0 : index
    %c0_4 = arith.constant 0 : index
    %c0_5 = arith.constant 0 : index
    %10 = vector.load %arg9[%c0_3, %c0_4, %c0_5] : memref<1x32x32xf32, #tpu.memory_space<vmem>>, vector<1x32x32xf32>
    %11 = vector.shape_cast %10 : vector<1x32x32xf32> to vector<32x32xf32>
    %12 = vector.shape_cast %9 : vector<32x32xf32> to vector<1x32x32xf32>
    tpu.vector_store %arg9[%c0_3, %c0_4, %c0_5], %12 {strides = array<i32>} : memref<1x32x32xf32, #tpu.memory_space<vmem>>, vector<1x32x32xf32>,
    %c0_6 = arith.constant 0 : index
    %c0_7 = arith.constant 0 : index
    %13 = vector.load %arg2[%c0_6, %c0_7] : memref<32x32xf32, #tpu.memory_space<vmem>>, vector<32x32xf32>
    %c0_8 = arith.constant 0 : index
    %c0_9 = arith.constant 0 : index
    %14 = vector.load %arg3[%c0_8, %c0_9] : memref<1x32xf32, #tpu.memory_space<vmem>>, vector<1x32xf32>
    %c0_10 = arith.constant 0 : index
    %c0_11 = arith.constant 0 : index
    %15 = vector.load %arg4[%c0_10, %c0_11] : memref<1x32xf32, #tpu.memory_space<vmem>>, vector<1x32xf32>
    %c0_12 = arith.constant 0 : index
    %c0_13 = arith.constant 0 : index
    %16 = vector.load %arg5[%c0_12, %c0_13] : memref<32x16xf32, #tpu.memory_space<vmem>>, vector<32x16xf32>
    %c0_14 = arith.constant 0 : index
    %c0_15 = arith.constant 0 : index
    %17 = vector.load %arg6[%c0_14, %c0_15] : memref<1x16xf32, #tpu.memory_space<vmem>>, vector<1x16xf32>
    %c0_16 = arith.constant 0 : index
    %c0_17 = arith.constant 0 : index
    %18 = vector.load %arg7[%c0_16, %c0_17] : memref<1x16xf32, #tpu.memory_space<vmem>>, vector<1x16xf32>
    %cst_18 = arith.constant dense<0.000000e+00> : vector<32x32xf32>
    %19 = tpu.matmul %9, %13, %cst_18 {dimension_numbers = #tpu.dot_dimension_numbers<[1], [0], [0], [1], [0, 0, 1, 1], [], []>} : vector<32x32xf32>, vector<32x32xf32>, vector<32x32xf32> -> vector<32x32xf32>
    %cst_19 = arith.constant dense<0.000000e+00> : vector<32xf32>
    %20 = vector.multi_reduction <add>, %19, %cst_19 [0] : vector<32x32xf32> to vector<32xf32>
    %21 = vector.shape_cast %20 : vector<32xf32> to vector<1x32xf32>
    %cst_20 = arith.constant 3.200000e+01 : f32
    %22 = vector.broadcast %cst_20 : f32 to vector<1x32xf32>
    %23 = arith.divf %21, %22 : vector<1x32xf32>
    %24 = vector.broadcast %23 : vector<1x32xf32> to vector<32x32xf32>
    %25 = arith.subf %19, %24 : vector<32x32xf32>
    %26 = arith.mulf %25, %25 : vector<32x32xf32>
    %cst_21 = arith.constant dense<0.000000e+00> : vector<32xf32>
    %27 = vector.multi_reduction <add>, %26, %cst_21 [0] : vector<32x32xf32> to vector<32xf32>
    %28 = vector.shape_cast %27 : vector<32xf32> to vector<1x32xf32>
    %cst_22 = arith.constant 3.200000e+01 : f32
    %29 = vector.broadcast %cst_22 : f32 to vector<1x32xf32>
    %30 = arith.divf %28, %29 : vector<1x32xf32>
    %31 = vector.broadcast %23 : vector<1x32xf32> to vector<32x32xf32>
    %32 = arith.subf %19, %31 : vector<32x32xf32>
    %cst_23 = arith.constant 9.99999974E-6 : f32
    %33 = vector.broadcast %cst_23 : f32 to vector<1x32xf32>
    %34 = arith.addf %30, %33 : vector<1x32xf32>
    %35 = math.rsqrt %34 : vector<1x32xf32>
    %36 = vector.broadcast %35 : vector<1x32xf32> to vector<32x32xf32>
    %37 = arith.mulf %32, %36 : vector<32x32xf32>
    %38 = vector.broadcast %14 : vector<1x32xf32> to vector<32x32xf32>
    %39 = arith.mulf %37, %38 : vector<32x32xf32>
    %40 = vector.broadcast %15 : vector<1x32xf32> to vector<32x32xf32>
    %41 = arith.addf %39, %40 : vector<32x32xf32>
    %cst_24 = arith.constant 0.000000e+00 : f32
    %42 = vector.broadcast %cst_24 : f32 to vector<32x32xf32>
    %43 = arith.maximumf %41, %42 : vector<32x32xf32>
    %cst_25 = arith.constant dense<0.000000e+00> : vector<32x16xf32>
    %44 = tpu.matmul %43, %16, %cst_25 {dimension_numbers = #tpu.dot_dimension_numbers<[1], [0], [0], [1], [0, 0, 1, 1], [], []>} : vector<32x32xf32>, vector<32x16xf32>, vector<32x16xf32> -> vector<32x16xf32>
    %cst_26 = arith.constant dense<0.000000e+00> : vector<16xf32>
    %45 = vector.multi_reduction <add>, %44, %cst_26 [0] : vector<32x16xf32> to vector<16xf32>
    %46 = vector.shape_cast %45 : vector<16xf32> to vector<1x16xf32>
    %cst_27 = arith.constant 3.200000e+01 : f32
    %47 = vector.broadcast %cst_27 : f32 to vector<1x16xf32>
    %48 = arith.divf %46, %47 : vector<1x16xf32>
    %49 = vector.broadcast %48 : vector<1x16xf32> to vector<32x16xf32>
    %50 = arith.subf %44, %49 : vector<32x16xf32>
    %51 = arith.mulf %50, %50 : vector<32x16xf32>
    %cst_28 = arith.constant dense<0.000000e+00> : vector<16xf32>
    %52 = vector.multi_reduction <add>, %51, %cst_28 [0] : vector<32x16xf32> to vector<16xf32>
    %53 = vector.shape_cast %52 : vector<16xf32> to vector<1x16xf32>
    %cst_29 = arith.constant 3.200000e+01 : f32
    %54 = vector.broadcast %cst_29 : f32 to vector<1x16xf32>
    %55 = arith.divf %53, %54 : vector<1x16xf32>
    %56 = vector.broadcast %48 : vector<1x16xf32> to vector<32x16xf32>
    %57 = arith.subf %44, %56 : vector<32x16xf32>
    %cst_30 = arith.constant 9.99999974E-6 : f32
    %58 = vector.broadcast %cst_30 : f32 to vector<1x16xf32>
    %59 = arith.addf %55, %58 : vector<1x16xf32>
    %60 = math.rsqrt %59 : vector<1x16xf32>
    %61 = vector.broadcast %60 : vector<1x16xf32> to vector<32x16xf32>
    %62 = arith.mulf %57, %61 : vector<32x16xf32>
    %63 = vector.broadcast %17 : vector<1x16xf32> to vector<32x16xf32>
    %64 = arith.mulf %62, %63 : vector<32x16xf32>
    %65 = vector.broadcast %18 : vector<1x16xf32> to vector<32x16xf32>
    %66 = arith.addf %64, %65 : vector<32x16xf32>
    %c0_31 = arith.constant 0 : index
    %c0_32 = arith.constant 0 : index
    %c0_33 = arith.constant 0 : index
    %67 = vector.load %arg8[%c0_31, %c0_32, %c0_33] : memref<1x32x16xf32, #tpu.memory_space<vmem>>, vector<1x32x16xf32>
    %68 = vector.shape_cast %67 : vector<1x32x16xf32> to vector<32x16xf32>
    %69 = vector.shape_cast %66 : vector<32x16xf32> to vector<1x32x16xf32>
    tpu.vector_store %arg8[%c0_31, %c0_32, %c0_33], %69 {strides = array<i32>} : memref<1x32x16xf32, #tpu.memory_space<vmem>>, vector<1x32x16xf32>,
    return
  }
  func.func @transform_0(%arg0: i32) -> (i32, i32, i32) {
    %c0_i32 = arith.constant 0 : i32
    %c0_i32_0 = arith.constant 0 : i32
    %c0_i32_1 = arith.constant 0 : i32
    return %arg0, %c0_i32, %c0_i32_0 : i32, i32, i32
  }
  func.func @transform_1(%arg0: i32) -> (i32, i32) {
    %c0_i32 = arith.constant 0 : i32
    %c0_i32_0 = arith.constant 0 : i32
    %c0_i32_1 = arith.constant 0 : i32
    return %c0_i32, %c0_i32_0 : i32, i32
  }
  func.func @transform_2(%arg0: i32) -> (i32, i32) {
    %c0_i32 = arith.constant 0 : i32
    %c0_i32_0 = arith.constant 0 : i32
    %c0_i32_1 = arith.constant 0 : i32
    return %c0_i32, %c0_i32_0 : i32, i32
  }
  func.func @transform_3(%arg0: i32) -> (i32, i32) {
    %c0_i32 = arith.constant 0 : i32
    %c0_i32_0 = arith.constant 0 : i32
    %c0_i32_1 = arith.constant 0 : i32
    return %c0_i32, %c0_i32_0 : i32, i32
  }
  func.func @transform_4(%arg0: i32) -> (i32, i32) {
    %c0_i32 = arith.constant 0 : i32
    %c0_i32_0 = arith.constant 0 : i32
    %c0_i32_1 = arith.constant 0 : i32
    return %c0_i32, %c0_i32_0 : i32, i32
  }
  func.func @transform_5(%arg0: i32) -> (i32, i32) {
    %c0_i32 = arith.constant 0 : i32
    %c0_i32_0 = arith.constant 0 : i32
    %c0_i32_1 = arith.constant 0 : i32
    return %c0_i32, %c0_i32_0 : i32, i32
  }
  func.func @transform_6(%arg0: i32) -> (i32, i32) {
    %c0_i32 = arith.constant 0 : i32
    %c0_i32_0 = arith.constant 0 : i32
    %c0_i32_1 = arith.constant 0 : i32
    return %c0_i32, %c0_i32_0 : i32, i32
  }
  func.func @transform_7(%arg0: i32) -> (i32, i32, i32) {
    %c0_i32 = arith.constant 0 : i32
    %c0_i32_0 = arith.constant 0 : i32
    %c0_i32_1 = arith.constant 0 : i32
    return %arg0, %c0_i32, %c0_i32_0 : i32, i32, i32
  }
  func.func @transform_8(%arg0: i32) -> (i32, i32, i32) {
    %c0_i32 = arith.constant 0 : i32
    %c0_i32_0 = arith.constant 0 : i32
    %c0_i32_1 = arith.constant 0 : i32
    return %arg0, %c0_i32, %c0_i32_0 : i32, i32, i32
  }
}

module attributes {stable_mosaic.version = 11 : i64} {
  func.func @_t_branch_kernel(%arg0: memref<2x192xf32, #tpu.memory_space<vmem>>, %arg1: memref<192x192xf32, #tpu.memory_space<vmem>>, %arg2: memref<1x192xf32, #tpu.memory_space<vmem>>, %arg3: memref<192x192xf32, #tpu.memory_space<vmem>>, %arg4: memref<1x192xf32, #tpu.memory_space<vmem>>, %arg5: memref<1x192xf32, #tpu.memory_space<vmem>>, %arg6: memref<192x16xf32, #tpu.memory_space<vmem>>, %arg7: memref<1x16xf32, #tpu.memory_space<vmem>>, %arg8: memref<1x16xf32, #tpu.memory_space<vmem>>, %arg9: memref<2x16xf32, #tpu.memory_space<vmem>>, %arg10: memref<2x16xf32, #tpu.memory_space<vmem>>) attributes {dimension_semantics = [], scalar_prefetch = 0 : i64, scratch_operands = 0 : i64, tpu.core_type = #tpu.core_type<tc>} {
    %c0 = arith.constant 0 : index
    %c0_0 = arith.constant 0 : index
    %0 = vector.load %arg0[%c0, %c0_0] : memref<2x192xf32, #tpu.memory_space<vmem>>, vector<2x192xf32>
    %c0_1 = arith.constant 0 : index
    %c0_2 = arith.constant 0 : index
    %1 = vector.load %arg1[%c0_1, %c0_2] : memref<192x192xf32, #tpu.memory_space<vmem>>, vector<192x192xf32>
    %cst = arith.constant dense<0.000000e+00> : vector<2x192xf32>
    %2 = tpu.matmul %0, %1, %cst {dimension_numbers = #tpu.dot_dimension_numbers<[1], [0], [0], [1], [0, 0, 1, 1], [], []>} : vector<2x192xf32>, vector<192x192xf32>, vector<2x192xf32> -> vector<2x192xf32>
    %c0_3 = arith.constant 0 : index
    %c0_4 = arith.constant 0 : index
    %3 = vector.load %arg2[%c0_3, %c0_4] : memref<1x192xf32, #tpu.memory_space<vmem>>, vector<1x192xf32>
    %4 = vector.broadcast %3 : vector<1x192xf32> to vector<2x192xf32>
    %5 = arith.addf %2, %4 : vector<2x192xf32>
    %6 = arith.mulf %0, %0 : vector<2x192xf32>
    %cst_5 = arith.constant dense<0.000000e+00> : vector<2xf32>
    %7 = vector.multi_reduction <add>, %6, %cst_5 [1] : vector<2x192xf32> to vector<2xf32>
    %8 = vector.shape_cast %7 : vector<2xf32> to vector<2x1xf32>
    %cst_6 = arith.constant 1.000000e-24 : f32
    %9 = vector.broadcast %cst_6 : f32 to vector<2x1xf32>
    %10 = arith.maximumf %8, %9 : vector<2x1xf32>
    %11 = math.rsqrt %10 : vector<2x1xf32>
    %12 = vector.broadcast %11 : vector<2x1xf32> to vector<2x192xf32>
    %13 = arith.mulf %0, %12 : vector<2x192xf32>
    %c0_7 = arith.constant 0 : index
    %c0_8 = arith.constant 0 : index
    %14 = vector.load %arg3[%c0_7, %c0_8] : memref<192x192xf32, #tpu.memory_space<vmem>>, vector<192x192xf32>
    %c0_9 = arith.constant 0 : index
    %c0_10 = arith.constant 0 : index
    %15 = vector.load %arg4[%c0_9, %c0_10] : memref<1x192xf32, #tpu.memory_space<vmem>>, vector<1x192xf32>
    %c0_11 = arith.constant 0 : index
    %c0_12 = arith.constant 0 : index
    %16 = vector.load %arg5[%c0_11, %c0_12] : memref<1x192xf32, #tpu.memory_space<vmem>>, vector<1x192xf32>
    %c0_13 = arith.constant 0 : index
    %c0_14 = arith.constant 0 : index
    %17 = vector.load %arg6[%c0_13, %c0_14] : memref<192x16xf32, #tpu.memory_space<vmem>>, vector<192x16xf32>
    %c0_15 = arith.constant 0 : index
    %c0_16 = arith.constant 0 : index
    %18 = vector.load %arg7[%c0_15, %c0_16] : memref<1x16xf32, #tpu.memory_space<vmem>>, vector<1x16xf32>
    %c0_17 = arith.constant 0 : index
    %c0_18 = arith.constant 0 : index
    %19 = vector.load %arg8[%c0_17, %c0_18] : memref<1x16xf32, #tpu.memory_space<vmem>>, vector<1x16xf32>
    %cst_19 = arith.constant dense<0.000000e+00> : vector<2x192xf32>
    %20 = tpu.matmul %13, %14, %cst_19 {dimension_numbers = #tpu.dot_dimension_numbers<[1], [0], [0], [1], [0, 0, 1, 1], [], []>} : vector<2x192xf32>, vector<192x192xf32>, vector<2x192xf32> -> vector<2x192xf32>
    %cst_20 = arith.constant dense<0.000000e+00> : vector<192xf32>
    %21 = vector.multi_reduction <add>, %20, %cst_20 [0] : vector<2x192xf32> to vector<192xf32>
    %22 = vector.shape_cast %21 : vector<192xf32> to vector<1x192xf32>
    %cst_21 = arith.constant 2.000000e+00 : f32
    %23 = vector.broadcast %cst_21 : f32 to vector<1x192xf32>
    %24 = arith.divf %22, %23 : vector<1x192xf32>
    %25 = vector.broadcast %24 : vector<1x192xf32> to vector<2x192xf32>
    %26 = arith.subf %20, %25 : vector<2x192xf32>
    %27 = arith.mulf %26, %26 : vector<2x192xf32>
    %cst_22 = arith.constant dense<0.000000e+00> : vector<192xf32>
    %28 = vector.multi_reduction <add>, %27, %cst_22 [0] : vector<2x192xf32> to vector<192xf32>
    %29 = vector.shape_cast %28 : vector<192xf32> to vector<1x192xf32>
    %cst_23 = arith.constant 2.000000e+00 : f32
    %30 = vector.broadcast %cst_23 : f32 to vector<1x192xf32>
    %31 = arith.divf %29, %30 : vector<1x192xf32>
    %32 = vector.broadcast %24 : vector<1x192xf32> to vector<2x192xf32>
    %33 = arith.subf %20, %32 : vector<2x192xf32>
    %cst_24 = arith.constant 9.99999974E-6 : f32
    %34 = vector.broadcast %cst_24 : f32 to vector<1x192xf32>
    %35 = arith.addf %31, %34 : vector<1x192xf32>
    %36 = math.rsqrt %35 : vector<1x192xf32>
    %37 = vector.broadcast %36 : vector<1x192xf32> to vector<2x192xf32>
    %38 = arith.mulf %33, %37 : vector<2x192xf32>
    %39 = vector.broadcast %15 : vector<1x192xf32> to vector<2x192xf32>
    %40 = arith.mulf %38, %39 : vector<2x192xf32>
    %41 = vector.broadcast %16 : vector<1x192xf32> to vector<2x192xf32>
    %42 = arith.addf %40, %41 : vector<2x192xf32>
    %cst_25 = arith.constant 0.000000e+00 : f32
    %43 = vector.broadcast %cst_25 : f32 to vector<2x192xf32>
    %44 = arith.maximumf %42, %43 : vector<2x192xf32>
    %cst_26 = arith.constant dense<0.000000e+00> : vector<2x16xf32>
    %45 = tpu.matmul %44, %17, %cst_26 {dimension_numbers = #tpu.dot_dimension_numbers<[1], [0], [0], [1], [0, 0, 1, 1], [], []>} : vector<2x192xf32>, vector<192x16xf32>, vector<2x16xf32> -> vector<2x16xf32>
    %cst_27 = arith.constant dense<0.000000e+00> : vector<16xf32>
    %46 = vector.multi_reduction <add>, %45, %cst_27 [0] : vector<2x16xf32> to vector<16xf32>
    %47 = vector.shape_cast %46 : vector<16xf32> to vector<1x16xf32>
    %cst_28 = arith.constant 2.000000e+00 : f32
    %48 = vector.broadcast %cst_28 : f32 to vector<1x16xf32>
    %49 = arith.divf %47, %48 : vector<1x16xf32>
    %50 = vector.broadcast %49 : vector<1x16xf32> to vector<2x16xf32>
    %51 = arith.subf %45, %50 : vector<2x16xf32>
    %52 = arith.mulf %51, %51 : vector<2x16xf32>
    %cst_29 = arith.constant dense<0.000000e+00> : vector<16xf32>
    %53 = vector.multi_reduction <add>, %52, %cst_29 [0] : vector<2x16xf32> to vector<16xf32>
    %54 = vector.shape_cast %53 : vector<16xf32> to vector<1x16xf32>
    %cst_30 = arith.constant 2.000000e+00 : f32
    %55 = vector.broadcast %cst_30 : f32 to vector<1x16xf32>
    %56 = arith.divf %54, %55 : vector<1x16xf32>
    %57 = vector.broadcast %49 : vector<1x16xf32> to vector<2x16xf32>
    %58 = arith.subf %45, %57 : vector<2x16xf32>
    %cst_31 = arith.constant 9.99999974E-6 : f32
    %59 = vector.broadcast %cst_31 : f32 to vector<1x16xf32>
    %60 = arith.addf %56, %59 : vector<1x16xf32>
    %61 = math.rsqrt %60 : vector<1x16xf32>
    %62 = vector.broadcast %61 : vector<1x16xf32> to vector<2x16xf32>
    %63 = arith.mulf %58, %62 : vector<2x16xf32>
    %64 = vector.broadcast %18 : vector<1x16xf32> to vector<2x16xf32>
    %65 = arith.mulf %63, %64 : vector<2x16xf32>
    %66 = vector.broadcast %19 : vector<1x16xf32> to vector<2x16xf32>
    %67 = arith.addf %65, %66 : vector<2x16xf32>
    %c0_32 = arith.constant 0 : index
    %c0_33 = arith.constant 0 : index
    %68 = vector.load %arg9[%c0_32, %c0_33] : memref<2x16xf32, #tpu.memory_space<vmem>>, vector<2x16xf32>
    tpu.vector_store %arg9[%c0_32, %c0_33], %67 {strides = array<i32>} : memref<2x16xf32, #tpu.memory_space<vmem>>, vector<2x16xf32>,
    %c0_34 = arith.constant 0 : index
    %c0_35 = arith.constant 0 : index
    %69 = vector.load %arg3[%c0_34, %c0_35] : memref<192x192xf32, #tpu.memory_space<vmem>>, vector<192x192xf32>
    %c0_36 = arith.constant 0 : index
    %c0_37 = arith.constant 0 : index
    %70 = vector.load %arg4[%c0_36, %c0_37] : memref<1x192xf32, #tpu.memory_space<vmem>>, vector<1x192xf32>
    %c0_38 = arith.constant 0 : index
    %c0_39 = arith.constant 0 : index
    %71 = vector.load %arg5[%c0_38, %c0_39] : memref<1x192xf32, #tpu.memory_space<vmem>>, vector<1x192xf32>
    %c0_40 = arith.constant 0 : index
    %c0_41 = arith.constant 0 : index
    %72 = vector.load %arg6[%c0_40, %c0_41] : memref<192x16xf32, #tpu.memory_space<vmem>>, vector<192x16xf32>
    %c0_42 = arith.constant 0 : index
    %c0_43 = arith.constant 0 : index
    %73 = vector.load %arg7[%c0_42, %c0_43] : memref<1x16xf32, #tpu.memory_space<vmem>>, vector<1x16xf32>
    %c0_44 = arith.constant 0 : index
    %c0_45 = arith.constant 0 : index
    %74 = vector.load %arg8[%c0_44, %c0_45] : memref<1x16xf32, #tpu.memory_space<vmem>>, vector<1x16xf32>
    %cst_46 = arith.constant dense<0.000000e+00> : vector<2x192xf32>
    %75 = tpu.matmul %5, %69, %cst_46 {dimension_numbers = #tpu.dot_dimension_numbers<[1], [0], [0], [1], [0, 0, 1, 1], [], []>} : vector<2x192xf32>, vector<192x192xf32>, vector<2x192xf32> -> vector<2x192xf32>
    %cst_47 = arith.constant dense<0.000000e+00> : vector<192xf32>
    %76 = vector.multi_reduction <add>, %75, %cst_47 [0] : vector<2x192xf32> to vector<192xf32>
    %77 = vector.shape_cast %76 : vector<192xf32> to vector<1x192xf32>
    %cst_48 = arith.constant 2.000000e+00 : f32
    %78 = vector.broadcast %cst_48 : f32 to vector<1x192xf32>
    %79 = arith.divf %77, %78 : vector<1x192xf32>
    %80 = vector.broadcast %79 : vector<1x192xf32> to vector<2x192xf32>
    %81 = arith.subf %75, %80 : vector<2x192xf32>
    %82 = arith.mulf %81, %81 : vector<2x192xf32>
    %cst_49 = arith.constant dense<0.000000e+00> : vector<192xf32>
    %83 = vector.multi_reduction <add>, %82, %cst_49 [0] : vector<2x192xf32> to vector<192xf32>
    %84 = vector.shape_cast %83 : vector<192xf32> to vector<1x192xf32>
    %cst_50 = arith.constant 2.000000e+00 : f32
    %85 = vector.broadcast %cst_50 : f32 to vector<1x192xf32>
    %86 = arith.divf %84, %85 : vector<1x192xf32>
    %87 = vector.broadcast %79 : vector<1x192xf32> to vector<2x192xf32>
    %88 = arith.subf %75, %87 : vector<2x192xf32>
    %cst_51 = arith.constant 9.99999974E-6 : f32
    %89 = vector.broadcast %cst_51 : f32 to vector<1x192xf32>
    %90 = arith.addf %86, %89 : vector<1x192xf32>
    %91 = math.rsqrt %90 : vector<1x192xf32>
    %92 = vector.broadcast %91 : vector<1x192xf32> to vector<2x192xf32>
    %93 = arith.mulf %88, %92 : vector<2x192xf32>
    %94 = vector.broadcast %70 : vector<1x192xf32> to vector<2x192xf32>
    %95 = arith.mulf %93, %94 : vector<2x192xf32>
    %96 = vector.broadcast %71 : vector<1x192xf32> to vector<2x192xf32>
    %97 = arith.addf %95, %96 : vector<2x192xf32>
    %cst_52 = arith.constant 0.000000e+00 : f32
    %98 = vector.broadcast %cst_52 : f32 to vector<2x192xf32>
    %99 = arith.maximumf %97, %98 : vector<2x192xf32>
    %cst_53 = arith.constant dense<0.000000e+00> : vector<2x16xf32>
    %100 = tpu.matmul %99, %72, %cst_53 {dimension_numbers = #tpu.dot_dimension_numbers<[1], [0], [0], [1], [0, 0, 1, 1], [], []>} : vector<2x192xf32>, vector<192x16xf32>, vector<2x16xf32> -> vector<2x16xf32>
    %cst_54 = arith.constant dense<0.000000e+00> : vector<16xf32>
    %101 = vector.multi_reduction <add>, %100, %cst_54 [0] : vector<2x16xf32> to vector<16xf32>
    %102 = vector.shape_cast %101 : vector<16xf32> to vector<1x16xf32>
    %cst_55 = arith.constant 2.000000e+00 : f32
    %103 = vector.broadcast %cst_55 : f32 to vector<1x16xf32>
    %104 = arith.divf %102, %103 : vector<1x16xf32>
    %105 = vector.broadcast %104 : vector<1x16xf32> to vector<2x16xf32>
    %106 = arith.subf %100, %105 : vector<2x16xf32>
    %107 = arith.mulf %106, %106 : vector<2x16xf32>
    %cst_56 = arith.constant dense<0.000000e+00> : vector<16xf32>
    %108 = vector.multi_reduction <add>, %107, %cst_56 [0] : vector<2x16xf32> to vector<16xf32>
    %109 = vector.shape_cast %108 : vector<16xf32> to vector<1x16xf32>
    %cst_57 = arith.constant 2.000000e+00 : f32
    %110 = vector.broadcast %cst_57 : f32 to vector<1x16xf32>
    %111 = arith.divf %109, %110 : vector<1x16xf32>
    %112 = vector.broadcast %104 : vector<1x16xf32> to vector<2x16xf32>
    %113 = arith.subf %100, %112 : vector<2x16xf32>
    %cst_58 = arith.constant 9.99999974E-6 : f32
    %114 = vector.broadcast %cst_58 : f32 to vector<1x16xf32>
    %115 = arith.addf %111, %114 : vector<1x16xf32>
    %116 = math.rsqrt %115 : vector<1x16xf32>
    %117 = vector.broadcast %116 : vector<1x16xf32> to vector<2x16xf32>
    %118 = arith.mulf %113, %117 : vector<2x16xf32>
    %119 = vector.broadcast %73 : vector<1x16xf32> to vector<2x16xf32>
    %120 = arith.mulf %118, %119 : vector<2x16xf32>
    %121 = vector.broadcast %74 : vector<1x16xf32> to vector<2x16xf32>
    %122 = arith.addf %120, %121 : vector<2x16xf32>
    %c0_59 = arith.constant 0 : index
    %c0_60 = arith.constant 0 : index
    %123 = vector.load %arg10[%c0_59, %c0_60] : memref<2x16xf32, #tpu.memory_space<vmem>>, vector<2x16xf32>
    tpu.vector_store %arg10[%c0_59, %c0_60], %122 {strides = array<i32>} : memref<2x16xf32, #tpu.memory_space<vmem>>, vector<2x16xf32>,
    return
  }
}

</mosaic_0001>

<bundles_post_ra>
// kernel: rmvit_forward.6
= control target key start
LH: loop header
LB: loop body
LE: loop exit
PB: predicated region body
PF: predicated region fallthrough
CT: control target
= control target key end

     0   :  { %s913_s12 = smov 0   ;;  %s1021_s0 = inlined_call_operand.vmem [shape: f32[17,256], index: 0, kind: input, shape index: {}]   ;;  %s1022_s1 = inlined_call_operand.vmem [shape: f32[2,256,4], index: 1, kind: input, shape index: {}]   ;;  %s1023_s2 = inlined_call_operand.vmem [shape: f32[4,32], index: 2, kind: input, shape index: {}]   ;;  %s1024_s3 = inlined_call_operand.vmem [shape: f32[2,17,32], index: 3, kind: output, shape index: {}]  }
   0x1 LB: > { %s676_s13 = sadd.s32 4294967295, %s891_s12   ;;  %p680_p0 = scmp.ge.s32.totalorder %s891_s12, 1  ;;  %s891_s12 = sphi %s913_s12, %s13_s12  }
   0x2   : > { %p137_p1 = scmp.lt.s32.totalorder %s891_s12, 3 }
   0x4   : > { %p138_p2 = pnand %p680_p0, %p137_p1 }
   0x5   : > { %v203_v0 = vld [vmem:[%s1023_s2] sm:$0xf] (!%p138_p2)  ;;  %vm301_vm0 = vcmask (!%p138_p2), 1043456   ;;  %p161_p3 = scmp.lt.s32.totalorder (!%p138_p2), %s676_s13, 1  ;;  %vm204_vm1 = vcmask (!%p138_p2), 31744   ;;  %v531_v33 = vld [vmem:[%s1021_s0 + $0x8] sm:$0xff] (!%p138_p2) }
   0x6   : > { %141 = sbr.rel (%p138_p2) target bundleno = 521 (0x209), region = 32  ;;  %794 = vmatprep.subr.msk.mxu0 (!%p138_p2), %vm301_vm0, %v203_v0  ;;  %600 = vmatprep.mubr.f32.mxu1 (!%p138_p2), %v531_v33  ;;  %vm616_vm2 = vcmask (!%p138_p2), 261120   ;;  %vm619_vm3 = vcmask (!%p138_p2), 253952  }
   0x7   : > { %795 = vmatpush3.msk.msra.mxu0 (!%p138_p2), %vm301_vm0, %v203_v0 }
   0xd   : > { %s1026_s13 = smov (!%p161_p3, %s676_s13), 1 }
   0xe   : > { %s719_s16 = sshll.u32 %s1026_s13, 8  ;;  %s876_s5 = smul.u32 24, %s1026_s13 }
   0xf   : > { %s930_s19 = scalar_lea.vmem %s1022_s1, %s719_s16 }
  0x10   : > { %v171_v1 = vld [vmem:[%s930_s19] sm:$0xff]  ;;  %v172_v2 = vld [vmem:[%s930_s19 + $0x8] sm:$0xff]  ;;  %v173_v3 = vld [vmem:[%s930_s19 + $0x10] sm:$0xff]  ;;  %s170_s8 = scalar_lea.vmem %s1024_s3, %s876_s5 }
  0x11   : > { %796 = vmatprep.mubr.msk.f32.mxu0 %vm204_vm1, %v171_v1  ;;  %v174_v4 = vld [vmem:[%s930_s19 + $0x18] sm:$0xff]  ;;  %v175_v5 = vld [vmem:[%s930_s19 + $0x20] sm:$0xff]  ;;  %v176_v6 = vld [vmem:[%s930_s19 + $0x28] sm:$0xff] }
  0x12   : > { %797 = vmatmul.mubr.msk.f32.vlgmr.msra.gmra.mrb[0].mxu0 %vm204_vm1, %v172_v2  ;;  %v177_v7 = vld [vmem:[%s930_s19 + $0x30] sm:$0xff]  ;;  %v178_v8 = vld [vmem:[%s930_s19 + $0x38] sm:$0xff]  ;;  %v179_v9 = vld [vmem:[%s930_s19 + $0x40] sm:$0xff] }
  0x13   : > { %799 = vmatprep.mubr.msk.f32.mxu0 %vm204_vm1, %v173_v3  ;;  %v180_v10 = vld [vmem:[%s930_s19 + $0x48] sm:$0xff]  ;;  %v181_v11 = vld [vmem:[%s930_s19 + $0x50] sm:$0xff]  ;;  %v182_v12 = vld [vmem:[%s930_s19 + $0x58] sm:$0xff] }
  0x14   : > { %v183_v13 = vld [vmem:[%s930_s19 + $0x60] sm:$0xff]  ;;  %v184_v14 = vld [vmem:[%s930_s19 + $0x68] sm:$0xff]  ;;  %v185_v15 = vld [vmem:[%s930_s19 + $0x70] sm:$0xff] }
  0x15   : > { %v186_v16 = vld [vmem:[%s930_s19 + $0x78] sm:$0xff]  ;;  %v187_v17 = vld [vmem:[%s930_s19 + $0x80] sm:$0xff]  ;;  %v188_v18 = vld [vmem:[%s930_s19 + $0x88] sm:$0xff] }
  0x16   : > { %800 = vmatmul.mubr.msk.f32.gmra.mrb[2].mxu0 %vm204_vm1, %v174_v4  ;;  %v189_v19 = vld [vmem:[%s930_s19 + $0x90] sm:$0xff]  ;;  %v190_v20 = vld [vmem:[%s930_s19 + $0x98] sm:$0xff]  ;;  %v191_v21 = vld [vmem:[%s930_s19 + $0xa0] sm:$0xff] }
  0x17   : > { %802 = vmatprep.mubr.msk.f32.mxu0 %vm204_vm1, %v175_v5  ;;  %v192_v22 = vld [vmem:[%s930_s19 + $0xa8] sm:$0xff]  ;;  %v193_v23 = vld [vmem:[%s930_s19 + $0xb0] sm:$0xff]  ;;  %v194_v24 = vld [vmem:[%s930_s19 + $0xb8] sm:$0xff] }
  0x18   : > { %v195_v25 = vld [vmem:[%s930_s19 + $0xc0] sm:$0xff]  ;;  %v196_v26 = vld [vmem:[%s930_s19 + $0xc8] sm:$0xff]  ;;  %v197_v27 = vld [vmem:[%s930_s19 + $0xd0] sm:$0xff] }
  0x19   : > { %v198_v28 = vld [vmem:[%s930_s19 + $0xd8] sm:$0xff]  ;;  %v199_v29 = vld [vmem:[%s930_s19 + $0xe0] sm:$0xff]  ;;  %v200_v30 = vld [vmem:[%s930_s19 + $0xe8] sm:$0xff] }
  0x1a   : > { %803 = vmatmul.mubr.msk.f32.gmra.mrb[4].mxu0 %vm204_vm1, %v176_v6  ;;  %v201_v31 = vld [vmem:[%s930_s19 + $0xf0] sm:$0xff]  ;;  %v202_v32 = vld [vmem:[%s930_s19 + $0xf8] sm:$0xff] }
  0x1b   : > { %805 = vmatprep.mubr.msk.f32.mxu0 %vm204_vm1, %v177_v7 }
  0x1e   : > { %806 = vmatmul.mubr.msk.f32.gmra.mrb[6].mxu0 %vm204_vm1, %v178_v8 }
  0x1f   : > { %808 = vmatprep.mubr.msk.f32.mxu0 %vm204_vm1, %v179_v9 }
  0x22   : > { %809 = vmatmul.mubr.msk.f32.gmra.mrb[8].mxu0 %vm204_vm1, %v180_v10 }
  0x23   : > { %811 = vmatprep.mubr.msk.f32.mxu0 %vm204_vm1, %v181_v11 }
  0x26   : > { %812 = vmatmul.mubr.msk.f32.gmra.mrb[10].mxu0 %vm204_vm1, %v182_v12 }
  0x27   : > { %814 = vmatprep.mubr.msk.f32.mxu0 %vm204_vm1, %v183_v13 }
  0x2a   : > { %815 = vmatmul.mubr.msk.f32.gmra.mrb[12].mxu0 %vm204_vm1, %v184_v14 }
  0x2b   : > { %817 = vmatprep.mubr.msk.f32.mxu0 %vm204_vm1, %v185_v15 }
  0x2e   : > { %818 = vmatmul.mubr.msk.f32.gmra.mrb[14].mxu0 %vm204_vm1, %v186_v16 }
  0x2f   : > { %820 = vmatprep.mubr.msk.f32.mxu0 %vm204_vm1, %v187_v17 }
  0x32   : > { %821 = vmatmul.mubr.msk.f32.gmra.mrb[16].mxu0 %vm204_vm1, %v188_v18  ;;  %v530_v18 = vld [vmem:[%s1021_s0] sm:$0xff] }
  0x33   : > { %823 = vmatprep.mubr.msk.f32.mxu0 %vm204_vm1, %v189_v19  ;;  %v533_v19 = vld [vmem:[%s1021_s0 + $0x18] sm:$0xff] }
  0x36   : > { %824 = vmatmul.mubr.msk.f32.gmra.mrb[18].mxu0 %vm204_vm1, %v190_v20  ;;  %v532_v20 = vld [vmem:[%s1021_s0 + $0x10] sm:$0xff] }
  0x37   : > { %826 = vmatprep.mubr.msk.f32.mxu0 %vm204_vm1, %v191_v21  ;;  %v535_v21 = vld [vmem:[%s1021_s0 + $0x28] sm:$0x1] }
  0x3a   : > { %827 = vmatmul.mubr.msk.f32.gmra.mrb[20].mxu0 %vm204_vm1, %v192_v22  ;;  %v534_v22 = vld [vmem:[%s1021_s0 + $0x20] sm:$0x1] }
  0x3b   : > { %829 = vmatprep.mubr.msk.f32.mxu0 %vm204_vm1, %v193_v23 }
  0x3e   : > { %830 = vmatmul.mubr.msk.f32.gmra.mrb[22].mxu0 %vm204_vm1, %v194_v24 }
  0x3f   : > { %832 = vmatprep.mubr.msk.f32.mxu0 %vm204_vm1, %v195_v25 }
  0x42   : > { %833 = vmatmul.mubr.msk.f32.gmra.mrb[24].mxu0 %vm204_vm1, %v196_v26 }
  0x43   : > { %835 = vmatprep.mubr.msk.f32.mxu0 %vm204_vm1, %v197_v27 }
  0x46   : > { %836 = vmatmul.mubr.msk.f32.gmra.mrb[26].mxu0 %vm204_vm1, %v198_v28 }
  0x47   : > { %838 = vmatprep.mubr.msk.f32.mxu0 %vm204_vm1, %v199_v29 }
  0x4a   : > { %839 = vmatmul.mubr.msk.f32.gmra.mrb[28].mxu0 %vm204_vm1, %v200_v30 }
  0x4b   : > { %841 = vmatprep.mubr.msk.f32.mxu0 %vm204_vm1, %v201_v31 }
  0x4e   : > { %842 = vmatmul.mubr.msk.f32.gmra.mrb[30].mxu0 %vm204_vm1, %v202_v32 }
  0xe5   : > { %v798_v34 = vpop.f32.mrb[0].mxu0 }
  0xe6   : > { %v371_v35 = vpop.f32.mrb[1].mxu0 }
  0xe7   : > { %v846_v36 = vpack.c.bf16 %v798_v34, %v371_v35 }
  0xe9   : > { %v801_v37 = vpop.f32.mrb[2].mxu0 }
  0xea   : > { %v381_v38 = vpop.f32.mrb[3].mxu0 }
  0xeb   : > { %v850_v39 = vpack.c.bf16 %v801_v37, %v381_v38 }
  0xed   : > { %v804_v40 = vpop.f32.mrb[4].mxu0 }
  0xee   : > { %v391_v41 = vpop.f32.mrb[5].mxu0 }
  0xef   : > { %v854_v42 = vpack.c.bf16 %v804_v40, %v391_v41 }
  0xf1   : > { %v807_v43 = vpop.f32.mrb[6].mxu0 }
  0xf2   : > { %v401_v44 = vpop.f32.mrb[7].mxu0 }
  0xf3   : > { %v858_v45 = vpack.c.bf16 %v807_v43, %v401_v44 }
  0xf5   : > { %v810_v46 = vpop.f32.mrb[8].mxu0 }
  0xf6   : > { %v411_v47 = vpop.f32.mrb[9].mxu0 }
  0xf7   : > { %v862_v48 = vpack.c.bf16 %v810_v46, %v411_v47 }
  0xf9   : > { %v813_v49 = vpop.f32.mrb[10].mxu0 }
  0xfa   : > { %v421_v50 = vpop.f32.mrb[11].mxu0 }
  0xfb   : > { %v866_v51 = vpack.c.bf16 %v813_v49, %v421_v50 }
  0xfd   : > { %v816_v52 = vpop.f32.mrb[12].mxu0 }
  0xfe   : > { %v431_v53 = vpop.f32.mrb[13].mxu0 }
  0xff   : > { %v870_v54 = vpack.c.bf16 %v816_v52, %v431_v53 }
 0x101   : > { %v819_v55 = vpop.f32.mrb[14].mxu0 }
 0x102   : > { %v441_v56 = vpop.f32.mrb[15].mxu0 }
 0x103   : > { %v874_v57 = vpack.c.bf16 %v819_v55, %v441_v56 }
 0x105   : > { %v822_v58 = vpop.f32.mrb[16].mxu0 }
 0x106   : > { %v451_v59 = vpop.f32.mrb[17].mxu0 }
 0x107   : > { %v844_v60 = vpack.c.bf16 %v822_v58, %v451_v59 }
 0x109   : > { %v825_v61 = vpop.f32.mrb[18].mxu0  ;;  %845 = vmatprep.subr.bf16.mxu1 %v844_v60 }
 0x10a   : > { %v461_v62 = vpop.f32.mrb[19].mxu0  ;;  %847 = vmatpush3.bf16.msra.mxu1 %v846_v36 }
 0x10b   : > { %v848_v63 = vpack.c.bf16 %v825_v61, %v461_v62 }
 0x10d   : > { %v828_v0 = vpop.f32.mrb[20].mxu0  ;;  %849 = vmatprep.subr.bf16.mxu1 %v848_v63 }
 0x10e   : > { %v471_v1 = vpop.f32.mrb[21].mxu0  ;;  %851 = vmatpush3.bf16.msra.mxu1 %v850_v39 }
 0x10f   : > { %v852_v2 = vpack.c.bf16 %v828_v0, %v471_v1 }
 0x111   : > { %v831_v3 = vpop.f32.mrb[22].mxu0  ;;  %853 = vmatprep.subr.bf16.mxu1 %v852_v2 }
 0x112   : > { %v481_v4 = vpop.f32.mrb[23].mxu0  ;;  %855 = vmatpush3.bf16.msra.mxu1 %v854_v42 }
 0x113   : > { %v856_v5 = vpack.c.bf16 %v831_v3, %v481_v4 }
 0x115   : > { %v834_v6 = vpop.f32.mrb[24].mxu0  ;;  %857 = vmatprep.subr.bf16.mxu1 %v856_v5 }
 0x116   : > { %v491_v7 = vpop.f32.mrb[25].mxu0  ;;  %859 = vmatpush3.bf16.msra.mxu1 %v858_v45 }
 0x117   : > { %v860_v8 = vpack.c.bf16 %v834_v6, %v491_v7 }
 0x119   : > { %v837_v9 = vpop.f32.mrb[26].mxu0  ;;  %861 = vmatprep.subr.bf16.mxu1 %v860_v8 }
 0x11a   : > { %v501_v10 = vpop.f32.mrb[27].mxu0  ;;  %863 = vmatpush3.bf16.msra.mxu1 %v862_v48 }
 0x11b   : > { %v864_v11 = vpack.c.bf16 %v837_v9, %v501_v10 }
 0x11d   : > { %v840_v12 = vpop.f32.mrb[28].mxu0  ;;  %865 = vmatprep.subr.bf16.mxu1 %v864_v11 }
 0x11e   : > { %v511_v13 = vpop.f32.mrb[29].mxu0  ;;  %867 = vmatpush3.bf16.msra.mxu1 %v866_v51 }
 0x11f   : > { %v868_v14 = vpack.c.bf16 %v840_v12, %v511_v13 }
 0x121   : > { %v843_v15 = vpop.f32.mrb[30].mxu0  ;;  %869 = vmatprep.subr.bf16.mxu1 %v868_v14 }
 0x122   : > { %v521_v16 = vpop.f32.mrb[31].mxu0  ;;  %871 = vmatpush3.bf16.msra.mxu1 %v870_v54 }
 0x123   : > { %v872_v17 = vpack.c.bf16 %v843_v15, %v521_v16 }
 0x125   : > { %873 = vmatprep.subr.bf16.mxu1 %v872_v17 }
 0x126   : > { %875 = vmatpush3.bf16.msra.mxu1 %v874_v57 }
 0x129   : > { %601 = vmatmul.mubr.f32.vlgmr.msra.gmra.mrb[0].mxu1 %v530_v18 }
 0x12a   : > { %605 = vmatprep.mubr.f32.mxu1 %v533_v19 }
 0x12d   : > { %606 = vmatmul.mubr.f32.gmra.mrb[2].mxu1 %v532_v20 }
 0x12e   : > { %610 = vmatprep.mubr.f32.mxu1 %v535_v21 }
 0x131   : > { %611 = vmatmul.mubr.f32.gmra.mrb[4].mxu1 %v534_v22 }
 0x1fc   : > { %v785_v23 = vpop.f32.mrb[0].mxu1 }
 0x1fd   : > { %v786_v24 = vpop.f32.mrb[1].mxu1 }
 0x1fe   : > { %v787_v25 = vadd.f32 %v786_v24, %v785_v23 }
 0x200   : > { %617 = vst.msk [vmem:[%s170_s8] sm:$0xff] %vm616_vm2, %v787_v25  ;;  %v788_v26 = vpop.f32.mrb[2].mxu1 }
 0x201   : > { %v789_v27 = vpop.f32.mrb[3].mxu1 }
 0x202   : > { %v790_v28 = vadd.f32 %v789_v27, %v788_v26 }
 0x204   : > { %618 = vst.msk [vmem:[%s170_s8 + $0x8] sm:$0xff] %vm616_vm2, %v790_v28  ;;  %v791_v29 = vpop.f32.mrb[4].mxu1 }
 0x205   : > { %v792_v30 = vpop.f32.mrb[5].mxu1 }
 0x206   : > { %v793_v31 = vadd.f32 %v792_v30, %v791_v29 }
 0x208   : > { %620 = vst.msk [vmem:[%s170_s8 + $0x10] sm:$0x1] %vm619_vm3, %v793_v31 }
 0x209 PF: > { %s13_s12 = sadd.s32 1, %s891_s12  }
 0x20a   : > { %p10_p4 = scmp.ge.s32.totalorder %s13_s12, 4  }
 0x20c   :  { %12 = sbr.rel (!%p10_p4) target bundleno = 1 (0x1), region = 62 }

// kernel: rmvit_forward.5
= control target key start
LH: loop header
LB: loop body
LE: loop exit
PB: predicated region body
PF: predicated region fallthrough
CT: control target
= control target key end

     0   :  { %s866_s12 = smov 0   ;;  %s1006_s0 = inlined_call_operand.vmem [shape: f32[17,256], index: 0, kind: input, shape index: {}]   ;;  %s1007_s1 = inlined_call_operand.vmem [shape: f32[2,256,4], index: 1, kind: input, shape index: {}]   ;;  %s1008_s2 = inlined_call_operand.vmem [shape: f32[4,224], index: 2, kind: input, shape index: {}]   ;;  %s1009_s3 = inlined_call_operand.vmem [shape: f32[2,17,224], index: 3, kind: output, shape index: {}]  }
   0x1 LB: > { %s717_s13 = sadd.s32 4294967295, %s843_s12   ;;  %p721_p0 = scmp.ge.s32.totalorder %s843_s12, 1  ;;  %s843_s12 = sphi %s866_s12, %s13_s12  }
   0x2   : > { %p137_p1 = scmp.lt.s32.totalorder %s843_s12, 3 }
   0x4   : > { %p138_p2 = pnand %p721_p0, %p137_p1 }
   0x5   : > { %v203_v0 = vld [vmem:[%s1008_s2] sm:$0xff] (!%p138_p2)  ;;  %vm303_vm0 = vcmask (!%p138_p2), 1043456   ;;  %p161_p3 = scmp.lt.s32.totalorder (!%p138_p2), %s717_s13, 1  ;;  %v845_v2 = vmov (!%p138_p2), 0.0   ;;  %vm206_vm1 = vcmask (!%p138_p2), 31744   ;;  %v566_v37 = vld [vmem:[%s1006_s0 + $0x8] sm:$0xff] (!%p138_p2) }
   0x6   : > { %141 = sbr.rel (%p138_p2) target bundleno = 582 (0x246), region = 32  ;;  %v205_v1 = vcombine.high (!%p138_p2), %v203_v0, %v203_v0  ;;  %372 = vmatprep.mubr.f32.mxu0 (!%p138_p2), %v845_v2  ;;  %635 = vmatprep.mubr.f32.mxu1 (!%p138_p2), %v566_v37  ;;  %vm655_vm2 = vcmask (!%p138_p2), 785408   ;;  %vm660_vm3 = vcmask (!%p138_p2), 778240  }
   0x8   : > { %725 = vmatprep.subr.msk.mxu0 (!%p138_p2), %vm303_vm0, %v205_v1 }
   0x9   : > { %726 = vmatpush1.msk.msra.mxu0 (!%p138_p2), %vm303_vm0, %v203_v0 }
   0xd   : > { %s1011_s13 = smov (!%p161_p3, %s717_s13), 1 }
   0xe   : > { %s761_s16 = sshll.u32 %s1011_s13, 8  ;;  %s826_s5 = smul.u32 48, %s1011_s13 }
   0xf   : > { %s884_s19 = scalar_lea.vmem %s1007_s1, %s761_s16 }
  0x10   : > { %v171_v3 = vld [vmem:[%s884_s19] sm:$0xff]  ;;  %v172_v4 = vld [vmem:[%s884_s19 + $0x8] sm:$0xff]  ;;  %v173_v5 = vld [vmem:[%s884_s19 + $0x10] sm:$0xff]  ;;  %s170_s8 = scalar_lea.vmem %s1009_s3, %s826_s5 }
  0x11   : > { %727 = vmatmul.mubr.msk.f32.vlgmr.msra.gmra.mrb[0].mxu0 %vm206_vm1, %v171_v3  ;;  %v174_v6 = vld [vmem:[%s884_s19 + $0x18] sm:$0xff]  ;;  %v175_v7 = vld [vmem:[%s884_s19 + $0x20] sm:$0xff]  ;;  %v176_v8 = vld [vmem:[%s884_s19 + $0x28] sm:$0xff] }
  0x12   : > { %378 = vmatprep.mubr.f32.mxu0 %v845_v2  ;;  %v177_v9 = vld [vmem:[%s884_s19 + $0x30] sm:$0xff]  ;;  %v178_v10 = vld [vmem:[%s884_s19 + $0x38] sm:$0xff]  ;;  %v179_v11 = vld [vmem:[%s884_s19 + $0x40] sm:$0xff] }
  0x13   : > { %v180_v12 = vld [vmem:[%s884_s19 + $0x48] sm:$0xff]  ;;  %v181_v13 = vld [vmem:[%s884_s19 + $0x50] sm:$0xff]  ;;  %v182_v14 = vld [vmem:[%s884_s19 + $0x58] sm:$0xff] }
  0x14   : > { %v183_v15 = vld [vmem:[%s884_s19 + $0x60] sm:$0xff]  ;;  %v184_v16 = vld [vmem:[%s884_s19 + $0x68] sm:$0xff]  ;;  %v185_v17 = vld [vmem:[%s884_s19 + $0x70] sm:$0xff] }
  0x15   : > { %728 = vmatmul.mubr.msk.f32.gmra.mrb[2].mxu0 %vm206_vm1, %v172_v4  ;;  %v186_v18 = vld [vmem:[%s884_s19 + $0x78] sm:$0xff]  ;;  %v187_v19 = vld [vmem:[%s884_s19 + $0x80] sm:$0xff]  ;;  %v188_v20 = vld [vmem:[%s884_s19 + $0x88] sm:$0xff] }
  0x16   : > { %384 = vmatprep.mubr.f32.mxu0 %v845_v2  ;;  %v189_v21 = vld [vmem:[%s884_s19 + $0x90] sm:$0xff]  ;;  %v190_v22 = vld [vmem:[%s884_s19 + $0x98] sm:$0xff]  ;;  %v191_v23 = vld [vmem:[%s884_s19 + $0xa0] sm:$0xff] }
  0x17   : > { %v192_v24 = vld [vmem:[%s884_s19 + $0xa8] sm:$0xff]  ;;  %v193_v25 = vld [vmem:[%s884_s19 + $0xb0] sm:$0xff]  ;;  %v194_v26 = vld [vmem:[%s884_s19 + $0xb8] sm:$0xff] }
  0x18   : > { %v195_v27 = vld [vmem:[%s884_s19 + $0xc0] sm:$0xff]  ;;  %v196_v28 = vld [vmem:[%s884_s19 + $0xc8] sm:$0xff]  ;;  %v197_v29 = vld [vmem:[%s884_s19 + $0xd0] sm:$0xff] }
  0x19   : > { %729 = vmatmul.mubr.msk.f32.gmra.mrb[4].mxu0 %vm206_vm1, %v173_v5  ;;  %v198_v30 = vld [vmem:[%s884_s19 + $0xd8] sm:$0xff]  ;;  %v199_v31 = vld [vmem:[%s884_s19 + $0xe0] sm:$0xff]  ;;  %v200_v32 = vld [vmem:[%s884_s19 + $0xe8] sm:$0xff] }
  0x1a   : > { %390 = vmatprep.mubr.f32.mxu0 %v845_v2  ;;  %v201_v33 = vld [vmem:[%s884_s19 + $0xf0] sm:$0xff]  ;;  %v202_v34 = vld [vmem:[%s884_s19 + $0xf8] sm:$0xff] }
  0x1d   : > { %730 = vmatmul.mubr.msk.f32.gmra.mrb[6].mxu0 %vm206_vm1, %v174_v6 }
  0x1e   : > { %396 = vmatprep.mubr.f32.mxu0 %v845_v2 }
  0x21   : > { %731 = vmatmul.mubr.msk.f32.gmra.mrb[8].mxu0 %vm206_vm1, %v175_v7 }
  0x22   : > { %402 = vmatprep.mubr.f32.mxu0 %v845_v2 }
  0x25   : > { %732 = vmatmul.mubr.msk.f32.gmra.mrb[10].mxu0 %vm206_vm1, %v176_v8 }
  0x26   : > { %408 = vmatprep.mubr.f32.mxu0 %v845_v2 }
  0x29   : > { %733 = vmatmul.mubr.msk.f32.gmra.mrb[12].mxu0 %vm206_vm1, %v177_v9 }
  0x2a   : > { %414 = vmatprep.mubr.f32.mxu0 %v845_v2 }
  0x2d   : > { %734 = vmatmul.mubr.msk.f32.gmra.mrb[14].mxu0 %vm206_vm1, %v178_v10 }
  0x2e   : > { %420 = vmatprep.mubr.f32.mxu0 %v845_v2 }
  0x31   : > { %735 = vmatmul.mubr.msk.f32.gmra.mrb[16].mxu0 %vm206_vm1, %v179_v11 }
  0x32   : > { %426 = vmatprep.mubr.f32.mxu0 %v845_v2 }
  0x35   : > { %736 = vmatmul.mubr.msk.f32.gmra.mrb[18].mxu0 %vm206_vm1, %v180_v12 }
  0x36   : > { %432 = vmatprep.mubr.f32.mxu0 %v845_v2 }
  0x39   : > { %737 = vmatmul.mubr.msk.f32.gmra.mrb[20].mxu0 %vm206_vm1, %v181_v13 }
  0x3a   : > { %438 = vmatprep.mubr.f32.mxu0 %v845_v2 }
  0x3d   : > { %738 = vmatmul.mubr.msk.f32.gmra.mrb[22].mxu0 %vm206_vm1, %v182_v14 }
  0x3e   : > { %444 = vmatprep.mubr.f32.mxu0 %v845_v2 }
  0x41   : > { %739 = vmatmul.mubr.msk.f32.gmra.mrb[24].mxu0 %vm206_vm1, %v183_v15 }
  0x42   : > { %450 = vmatprep.mubr.f32.mxu0 %v845_v2 }
  0x45   : > { %740 = vmatmul.mubr.msk.f32.gmra.mrb[26].mxu0 %vm206_vm1, %v184_v16 }
  0x46   : > { %456 = vmatprep.mubr.f32.mxu0 %v845_v2 }
  0x49   : > { %741 = vmatmul.mubr.msk.f32.gmra.mrb[28].mxu0 %vm206_vm1, %v185_v17 }
  0x4a   : > { %462 = vmatprep.mubr.f32.mxu0 %v845_v2 }
  0x4d   : > { %742 = vmatmul.mubr.msk.f32.gmra.mrb[30].mxu0 %vm206_vm1, %v186_v18 }
  0x4e   : > { %468 = vmatprep.mubr.f32.mxu0 %v845_v2 }
  0x51   : > { %743 = vmatmul.mubr.msk.f32.gmra.mrb[32].mxu0 %vm206_vm1, %v187_v19 }
  0x52   : > { %474 = vmatprep.mubr.f32.mxu0 %v845_v2 }
  0x55   : > { %744 = vmatmul.mubr.msk.f32.gmra.mrb[34].mxu0 %vm206_vm1, %v188_v20 }
  0x56   : > { %480 = vmatprep.mubr.f32.mxu0 %v845_v2 }
  0x59   : > { %745 = vmatmul.mubr.msk.f32.gmra.mrb[36].mxu0 %vm206_vm1, %v189_v21 }
  0x5a   : > { %486 = vmatprep.mubr.f32.mxu0 %v845_v2 }
  0x5d   : > { %746 = vmatmul.mubr.msk.f32.gmra.mrb[38].mxu0 %vm206_vm1, %v190_v22 }
  0x5e   : > { %492 = vmatprep.mubr.f32.mxu0 %v845_v2 }
  0x61   : > { %747 = vmatmul.mubr.msk.f32.gmra.mrb[40].mxu0 %vm206_vm1, %v191_v23 }
  0x62   : > { %498 = vmatprep.mubr.f32.mxu0 %v845_v2 }
  0x65   : > { %748 = vmatmul.mubr.msk.f32.gmra.mrb[42].mxu0 %vm206_vm1, %v192_v24 }
  0x66   : > { %504 = vmatprep.mubr.f32.mxu0 %v845_v2 }
  0x69   : > { %749 = vmatmul.mubr.msk.f32.gmra.mrb[44].mxu0 %vm206_vm1, %v193_v25 }
  0x6a   : > { %510 = vmatprep.mubr.f32.mxu0 %v845_v2 }
  0x6d   : > { %750 = vmatmul.mubr.msk.f32.gmra.mrb[46].mxu0 %vm206_vm1, %v194_v26 }
  0x6e   : > { %516 = vmatprep.mubr.f32.mxu0 %v845_v2 }
  0x71   : > { %751 = vmatmul.mubr.msk.f32.gmra.mrb[48].mxu0 %vm206_vm1, %v195_v27 }
  0x72   : > { %522 = vmatprep.mubr.f32.mxu0 %v845_v2 }
  0x75   : > { %752 = vmatmul.mubr.msk.f32.gmra.mrb[50].mxu0 %vm206_vm1, %v196_v28 }
  0x76   : > { %528 = vmatprep.mubr.f32.mxu0 %v845_v2 }
  0x79   : > { %753 = vmatmul.mubr.msk.f32.gmra.mrb[52].mxu0 %vm206_vm1, %v197_v29 }
  0x7a   : > { %534 = vmatprep.mubr.f32.mxu0 %v845_v2 }
  0x7d   : > { %754 = vmatmul.mubr.msk.f32.gmra.mrb[54].mxu0 %vm206_vm1, %v198_v30 }
  0x7e   : > { %540 = vmatprep.mubr.f32.mxu0 %v845_v2 }
  0x81   : > { %755 = vmatmul.mubr.msk.f32.gmra.mrb[56].mxu0 %vm206_vm1, %v199_v31 }
  0x82   : > { %546 = vmatprep.mubr.f32.mxu0 %v845_v2 }
  0x85   : > { %756 = vmatmul.mubr.msk.f32.gmra.mrb[58].mxu0 %vm206_vm1, %v200_v32 }
  0x86   : > { %552 = vmatprep.mubr.f32.mxu0 %v845_v2 }
  0x89   : > { %757 = vmatmul.mubr.msk.f32.gmra.mrb[60].mxu0 %vm206_vm1, %v201_v33 }
  0x8a   : > { %558 = vmatprep.mubr.f32.mxu0 %v845_v2 }
  0x8d   : > { %758 = vmatmul.mubr.msk.f32.gmra.mrb[62].mxu0 %vm206_vm1, %v202_v34 }
  0xe4   : > { %v374_v35 = vpop.f32.mrb[0].mxu0 }
  0xe5   : > { %v376_v36 = vpop.f32.mrb[1].mxu0 }
  0xe8   : > { %v380_v38 = vpop.f32.mrb[2].mxu0 }
  0xe9   : > { %v764_v39 = vpack.c.bf16 %v380_v38, %v374_v35  ;;  %v382_v40 = vpop.f32.mrb[3].mxu0 }
  0xea   : > { %v762_v41 = vpack.c.bf16 %v382_v40, %v376_v36 }
  0xec   : > { %v386_v42 = vpop.f32.mrb[4].mxu0  ;;  %763 = vmatprep.subr.bf16.mxu1 %v762_v41 }
  0xed   : > { %v388_v43 = vpop.f32.mrb[5].mxu0  ;;  %765 = vmatpush1.bf16.msra.mxu1 %v764_v39 }
  0xf0   : > { %v392_v44 = vpop.f32.mrb[6].mxu0 }
  0xf1   : > { %v768_v45 = vpack.c.bf16 %v392_v44, %v386_v42  ;;  %v394_v46 = vpop.f32.mrb[7].mxu0 }
  0xf2   : > { %v766_v47 = vpack.c.bf16 %v394_v46, %v388_v43 }
  0xf4   : > { %v398_v48 = vpop.f32.mrb[8].mxu0  ;;  %767 = vmatprep.subr.bf16.mxu1 %v766_v47 }
  0xf5   : > { %v400_v49 = vpop.f32.mrb[9].mxu0  ;;  %769 = vmatpush1.bf16.msra.mxu1 %v768_v45 }
  0xf8   : > { %v404_v50 = vpop.f32.mrb[10].mxu0 }
  0xf9   : > { %v772_v51 = vpack.c.bf16 %v404_v50, %v398_v48  ;;  %v406_v52 = vpop.f32.mrb[11].mxu0 }
  0xfa   : > { %v770_v53 = vpack.c.bf16 %v406_v52, %v400_v49 }
  0xfc   : > { %v410_v54 = vpop.f32.mrb[12].mxu0  ;;  %771 = vmatprep.subr.bf16.mxu1 %v770_v53 }
  0xfd   : > { %v412_v55 = vpop.f32.mrb[13].mxu0  ;;  %773 = vmatpush1.bf16.msra.mxu1 %v772_v51 }
 0x100   : > { %v416_v56 = vpop.f32.mrb[14].mxu0 }
 0x101   : > { %v776_v57 = vpack.c.bf16 %v416_v56, %v410_v54  ;;  %v418_v58 = vpop.f32.mrb[15].mxu0 }
 0x102   : > { %v774_v59 = vpack.c.bf16 %v418_v58, %v412_v55 }
 0x104   : > { %v422_v60 = vpop.f32.mrb[16].mxu0  ;;  %775 = vmatprep.subr.bf16.mxu1 %v774_v59 }
 0x105   : > { %v424_v61 = vpop.f32.mrb[17].mxu0  ;;  %777 = vmatpush1.bf16.msra.mxu1 %v776_v57 }
 0x108   : > { %v428_v62 = vpop.f32.mrb[18].mxu0 }
 0x109   : > { %v780_v63 = vpack.c.bf16 %v428_v62, %v422_v60  ;;  %v430_v0 = vpop.f32.mrb[19].mxu0 }
 0x10a   : > { %v778_v1 = vpack.c.bf16 %v430_v0, %v424_v61 }
 0x10c   : > { %v434_v2 = vpop.f32.mrb[20].mxu0  ;;  %779 = vmatprep.subr.bf16.mxu1 %v778_v1 }
 0x10d   : > { %v436_v3 = vpop.f32.mrb[21].mxu0  ;;  %781 = vmatpush1.bf16.msra.mxu1 %v780_v63 }
 0x110   : > { %v440_v4 = vpop.f32.mrb[22].mxu0 }
 0x111   : > { %v784_v5 = vpack.c.bf16 %v440_v4, %v434_v2  ;;  %v442_v6 = vpop.f32.mrb[23].mxu0  ;;  %v565_v4 = vld [vmem:[%s1006_s0] sm:$0xff] }
 0x112   : > { %v782_v7 = vpack.c.bf16 %v442_v6, %v436_v3  ;;  %v567_v6 = vld [vmem:[%s1006_s0 + $0x10] sm:$0xff] }
 0x114   : > { %v446_v8 = vpop.f32.mrb[24].mxu0  ;;  %783 = vmatprep.subr.bf16.mxu1 %v782_v7  ;;  %v570_v7 = vld [vmem:[%s1006_s0 + $0x28] sm:$0x1] }
 0x115   : > { %v448_v9 = vpop.f32.mrb[25].mxu0  ;;  %785 = vmatpush1.bf16.msra.mxu1 %v784_v5  ;;  %v568_v5 = vld [vmem:[%s1006_s0 + $0x18] sm:$0xff] }
 0x118   : > { %v452_v10 = vpop.f32.mrb[26].mxu0 }
 0x119   : > { %v788_v11 = vpack.c.bf16 %v452_v10, %v446_v8  ;;  %v454_v12 = vpop.f32.mrb[27].mxu0  ;;  %v569_v8 = vld [vmem:[%s1006_s0 + $0x20] sm:$0x1] }
 0x11a   : > { %v786_v13 = vpack.c.bf16 %v454_v12, %v448_v9 }
 0x11c   : > { %v458_v14 = vpop.f32.mrb[28].mxu0  ;;  %787 = vmatprep.subr.bf16.mxu1 %v786_v13 }
 0x11d   : > { %v460_v15 = vpop.f32.mrb[29].mxu0  ;;  %789 = vmatpush1.bf16.msra.mxu1 %v788_v11 }
 0x120   : > { %v464_v16 = vpop.f32.mrb[30].mxu0 }
 0x121   : > { %v792_v17 = vpack.c.bf16 %v464_v16, %v458_v14  ;;  %v466_v18 = vpop.f32.mrb[31].mxu0 }
 0x122   : > { %v790_v19 = vpack.c.bf16 %v466_v18, %v460_v15 }
 0x124   : > { %v470_v20 = vpop.f32.mrb[32].mxu0  ;;  %791 = vmatprep.subr.bf16.mxu1 %v790_v19 }
 0x125   : > { %v472_v21 = vpop.f32.mrb[33].mxu0  ;;  %793 = vmatpush1.bf16.msra.mxu1 %v792_v17 }
 0x128   : > { %v476_v22 = vpop.f32.mrb[34].mxu0 }
 0x129   : > { %v796_v23 = vpack.c.bf16 %v476_v22, %v470_v20  ;;  %v478_v24 = vpop.f32.mrb[35].mxu0 }
 0x12a   : > { %v794_v25 = vpack.c.bf16 %v478_v24, %v472_v21 }
 0x12c   : > { %v482_v26 = vpop.f32.mrb[36].mxu0  ;;  %795 = vmatprep.subr.bf16.mxu1 %v794_v25 }
 0x12d   : > { %v484_v27 = vpop.f32.mrb[37].mxu0  ;;  %797 = vmatpush1.bf16.msra.mxu1 %v796_v23 }
 0x130   : > { %v488_v28 = vpop.f32.mrb[38].mxu0 }
 0x131   : > { %v800_v29 = vpack.c.bf16 %v488_v28, %v482_v26  ;;  %v490_v30 = vpop.f32.mrb[39].mxu0 }
 0x132   : > { %v798_v31 = vpack.c.bf16 %v490_v30, %v484_v27 }
 0x134   : > { %v494_v32 = vpop.f32.mrb[40].mxu0  ;;  %799 = vmatprep.subr.bf16.mxu1 %v798_v31 }
 0x135   : > { %v496_v33 = vpop.f32.mrb[41].mxu0  ;;  %801 = vmatpush1.bf16.msra.mxu1 %v800_v29 }
 0x138   : > { %v500_v34 = vpop.f32.mrb[42].mxu0 }
 0x139   : > { %v804_v35 = vpack.c.bf16 %v500_v34, %v494_v32  ;;  %v502_v36 = vpop.f32.mrb[43].mxu0 }
 0x13a   : > { %v802_v37 = vpack.c.bf16 %v502_v36, %v496_v33 }
 0x13c   : > { %v506_v38 = vpop.f32.mrb[44].mxu0  ;;  %803 = vmatprep.subr.bf16.mxu1 %v802_v37 }
 0x13d   : > { %v508_v39 = vpop.f32.mrb[45].mxu0  ;;  %805 = vmatpush1.bf16.msra.mxu1 %v804_v35 }
 0x140   : > { %v512_v40 = vpop.f32.mrb[46].mxu0 }
 0x141   : > { %v808_v41 = vpack.c.bf16 %v512_v40, %v506_v38  ;;  %v514_v42 = vpop.f32.mrb[47].mxu0 }
 0x142   : > { %v806_v43 = vpack.c.bf16 %v514_v42, %v508_v39 }
 0x144   : > { %v518_v44 = vpop.f32.mrb[48].mxu0  ;;  %807 = vmatprep.subr.bf16.mxu1 %v806_v43 }
 0x145   : > { %v520_v45 = vpop.f32.mrb[49].mxu0  ;;  %809 = vmatpush1.bf16.msra.mxu1 %v808_v41 }
 0x148   : > { %v524_v46 = vpop.f32.mrb[50].mxu0 }
 0x149   : > { %v812_v47 = vpack.c.bf16 %v524_v46, %v518_v44  ;;  %v526_v48 = vpop.f32.mrb[51].mxu0 }
 0x14a   : > { %v810_v49 = vpack.c.bf16 %v526_v48, %v520_v45 }
 0x14c   : > { %v530_v50 = vpop.f32.mrb[52].mxu0  ;;  %811 = vmatprep.subr.bf16.mxu1 %v810_v49 }
 0x14d   : > { %v532_v51 = vpop.f32.mrb[53].mxu0  ;;  %813 = vmatpush1.bf16.msra.mxu1 %v812_v47 }
 0x150   : > { %v536_v52 = vpop.f32.mrb[54].mxu0 }
 0x151   : > { %v816_v53 = vpack.c.bf16 %v536_v52, %v530_v50  ;;  %v538_v54 = vpop.f32.mrb[55].mxu0 }
 0x152   : > { %v814_v55 = vpack.c.bf16 %v538_v54, %v532_v51 }
 0x154   : > { %v542_v56 = vpop.f32.mrb[56].mxu0  ;;  %815 = vmatprep.subr.bf16.mxu1 %v814_v55 }
 0x155   : > { %v544_v57 = vpop.f32.mrb[57].mxu0  ;;  %817 = vmatpush1.bf16.msra.mxu1 %v816_v53 }
 0x158   : > { %v548_v58 = vpop.f32.mrb[58].mxu0 }
 0x159   : > { %v820_v59 = vpack.c.bf16 %v548_v58, %v542_v56  ;;  %v550_v60 = vpop.f32.mrb[59].mxu0 }
 0x15a   : > { %v818_v61 = vpack.c.bf16 %v550_v60, %v544_v57 }
 0x15c   : > { %v554_v62 = vpop.f32.mrb[60].mxu0  ;;  %819 = vmatprep.subr.bf16.mxu1 %v818_v61 }
 0x15d   : > { %v556_v63 = vpop.f32.mrb[61].mxu0  ;;  %821 = vmatpush1.bf16.msra.mxu1 %v820_v59 }
 0x160   : > { %v560_v0 = vpop.f32.mrb[62].mxu0 }
 0x161   : > { %v824_v1 = vpack.c.bf16 %v560_v0, %v554_v62  ;;  %v562_v2 = vpop.f32.mrb[63].mxu0 }
 0x162   : > { %v822_v3 = vpack.c.bf16 %v562_v2, %v556_v63 }
 0x164   : > { %823 = vmatprep.subr.bf16.mxu1 %v822_v3 }
 0x165   : > { %825 = vmatpush1.bf16.msra.mxu1 %v824_v1 }
 0x168   : > { %636 = vmatmul.mubr.f32.vlgmr.msra.gmra.mrb[0].mxu1 %v565_v4 }
 0x169   : > { %641 = vmatprep.mubr.f32.mxu1 %v568_v5 }
 0x16c   : > { %642 = vmatmul.mubr.f32.gmra.mrb[2].mxu1 %v567_v6 }
 0x16d   : > { %647 = vmatprep.mubr.f32.mxu1 %v570_v7 }
 0x170   : > { %648 = vmatmul.mubr.f32.gmra.mrb[4].mxu1 %v569_v8 }
 0x23b   : > { %v637_v9 = vpop.f32.mrb[0].mxu1 }
 0x23c   : > { %654 = vst [vmem:[%s170_s8] sm:$0xff] %v637_v9  ;;  %v639_v10 = vpop.f32.mrb[1].mxu1 }
 0x23d   : > { %656 = vst.msk [vmem:[%s170_s8 + $0x8] sm:$0xff] %vm655_vm2, %v639_v10 }
 0x23f   : > { %v643_v11 = vpop.f32.mrb[2].mxu1 }
 0x240   : > { %657 = vst [vmem:[%s170_s8 + $0x10] sm:$0xff] %v643_v11  ;;  %v645_v12 = vpop.f32.mrb[3].mxu1 }
 0x241   : > { %658 = vst.msk [vmem:[%s170_s8 + $0x18] sm:$0xff] %vm655_vm2, %v645_v12 }
 0x243   : > { %v649_v13 = vpop.f32.mrb[4].mxu1 }
 0x244   : > { %659 = vst [vmem:[%s170_s8 + $0x20] sm:$0x1] %v649_v13  ;;  %v651_v14 = vpop.f32.mrb[5].mxu1 }
 0x245   : > { %661 = vst.msk [vmem:[%s170_s8 + $0x28] sm:$0x1] %vm660_vm3, %v651_v14 }
 0x246 PF: > { %s13_s12 = sadd.s32 1, %s843_s12  }
 0x247   : > { %p10_p4 = scmp.ge.s32.totalorder %s13_s12, 4  }
 0x249   :  { %12 = sbr.rel (!%p10_p4) target bundleno = 1 (0x1), region = 62 }

// kernel: rmvit_forward.7
= control target key start
LH: loop header
LB: loop body
LE: loop exit
PB: predicated region body
PF: predicated region fallthrough
CT: control target
= control target key end

     0   :  { %s772_s27 = smov 0   ;;  %s842_s0 = inlined_call_operand.vmem [shape: f32[2,2,32], index: 0, kind: input, shape index: {}]   ;;  %s843_s1 = inlined_call_operand.vmem [shape: f32[32,32], index: 1, kind: input, shape index: {}]   ;;  %s844_s2 = inlined_call_operand.vmem [shape: f32[1,32], index: 2, kind: input, shape index: {}]   ;;  %s845_s3 = inlined_call_operand.vmem [shape: f32[1,32], index: 3, kind: input, shape index: {}]   ;;  %s846_s4 = inlined_call_operand.vmem [shape: f32[32,16], index: 4, kind: input, shape index: {}]   ;;  %s847_s5 = inlined_call_operand.vmem [shape: f32[1,16], index: 5, kind: input, shape index: {}]   ;;  %s848_s6 = inlined_call_operand.vmem [shape: f32[1,16], index: 6, kind: input, shape index: {}]   ;;  %s849_s7 = inlined_call_operand.vmem [shape: f32[2,2,16], index: 7, kind: output, shape index: {0}]   ;;  %s850_s8 = inlined_call_operand.vmem [shape: f32[2,2,32], index: 8, kind: output, shape index: {1}]  }
   0x1 LB: > { %s639_s28 = sadd.s32 4294967295, %s722_s27   ;;  %p643_p0 = scmp.ge.s32.totalorder %s722_s27, 1  ;;  %s722_s27 = sphi %s772_s27, %s19_s27  }
   0x2   : > { %p264_p1 = scmp.lt.s32.totalorder %s722_s27, 3 }
   0x4   : > { %p265_p2 = pnand %p643_p0, %p264_p1 }
   0x5   : > { %p300_p3 = scmp.lt.s32.totalorder (!%p265_p2), %s639_s28, 1  ;;  %vm314_vm0 = vcmask (!%p265_p2), 254976   ;;  %v322_v3 = vld [vmem:[%s843_s1] sm:$0xff] (!%p265_p2)  ;;  %v323_v4 = vld [vmem:[%s843_s1 + $0x8] sm:$0xff] (!%p265_p2)  ;;  %v324_v5 = vld [vmem:[%s843_s1 + $0x10] sm:$0xff] (!%p265_p2)  ;;  %v724_v6 = vmov (!%p265_p2), 0.0|0.0  }
   0x6   : > { %268 = sbr.rel (%p265_p2) target bundleno = 710 (0x2c6), region = 48  ;;  %687 = vmatprep.subr.bf16.mxu0 (!%p265_p2), %v724_v6  ;;  %v688_v7 = vpack.c.bf16 (!%p265_p2), %v323_v4, %v322_v3  ;;  %v325_v8 = vld [vmem:[%s843_s1 + $0x18] sm:$0xff] (!%p265_p2)  ;;  %vm725_vm1 = vmmov (!%p265_p2), 0   ;;  %v726_v9 = vmov (!%p265_p2), 0.0   ;;  %693 = vmatprep.subr.bf16.mxu1 (!%p265_p2), %v724_v6  ;;  %vm334_vm2 = vcmask (!%p265_p2), 261120   ;;  %v328_v15 = vld [vmem:[%s846_s4] sm:$0xff] (!%p265_p2) }
   0x7   : > { %673 = vmatprep.mubr.msk.f32.mxu0 (!%p265_p2), %vm725_vm1, %v726_v9  ;;  %684 = vmatprep.mubr.msk.f32.mxu1 (!%p265_p2), %vm725_vm1, %v726_v9  ;;  %v691_v10 = vpack.c.bf16 (!%p265_p2), %v325_v8, %v324_v5  ;;  %v329_v16 = vld [vmem:[%s846_s4 + $0x8] sm:$0xff] (!%p265_p2)  ;;  %v330_v18 = vld [vmem:[%s846_s4 + $0x10] sm:$0xff] (!%p265_p2)  ;;  %v331_v19 = vld [vmem:[%s846_s4 + $0x18] sm:$0xff] (!%p265_p2)  ;;  %vm518_vm3 = vcmask (!%p265_p2), 123904  }
   0x8   : > { %689 = vmatpush3.bf16.msra.mxu0 (!%p265_p2), %v688_v7  ;;  %v694_v17 = vpack.c.bf16 (!%p265_p2), %v329_v16, %v328_v15  ;;  %v697_v20 = vpack.c.bf16 (!%p265_p2), %v331_v19, %v330_v18  ;;  %v648_v43 = vld [vmem:[%s844_s2] ss:$0 sm:$0xff] (!%p265_p2) }
   0x9   : > { %690 = vmatprep.subr.bf16.mxu0 (!%p265_p2), %v724_v6  ;;  %v649_v45 = vld [vmem:[%s845_s3] ss:$0 sm:$0xff] (!%p265_p2) }
   0xa   : > { %695 = vmatpush3.bf16.msra.mxu1 (!%p265_p2), %v694_v17  ;;  %v651_v7 = vld [vmem:[%s847_s5] ss:$0 sm:$0xff] (!%p265_p2) }
   0xb   : > { %696 = vmatprep.subr.bf16.mxu1 (!%p265_p2), %v724_v6  ;;  %v652_v9 = vld [vmem:[%s848_s6] ss:$0 sm:$0xff] (!%p265_p2) }
   0xc   : > { %692 = vmatpush3.bf16.msra.mxu0 (!%p265_p2), %v691_v10 }
   0xd   : > { %s852_s28 = smov (!%p300_p3, %s639_s28), 1 }
   0xe   : > { %s780_s29 = sshll.u32 %s852_s28, 1  ;;  %698 = vmatpush3.bf16.msra.mxu1 %v697_v20 }
   0xf   : > { %s303_s10 = scalar_lea.vmem %s842_s0, %s780_s29  ;;  %s311_s21 = scalar_lea.vmem %s850_s8, %s780_s29 }
  0x10   : > { %v312_v0 = vld [vmem:[%s303_s10] sm:$0x3]  ;;  %s307_s20 = scalar_lea.vmem %s849_s7, %s780_s29 }
  0x11   : > { %v313_v1 = vmul.f32 %v312_v0, %v312_v0 }
  0x13   : > { %v315_v2 = vsel %vm314_vm0, %v313_v1, 0.0 }
  0x14   : > { %316 = vadd.xlane.f32.xlu0 %v315_v2 }
  0xa1   : > { %v317_v11 = vpop.xlane.xlu0 %316 }
  0xa2   : > { %v318_v12 = vmax.f32 %v317_v11, 1e-24 }
  0xa4   : > { %710 = vrsqrt.f32 %v318_v12 }
  0xae   : > { %v711_v13 = vpop.eup %710 }
  0xaf   : > { %v320_v14 = vmul.f32 %v711_v13, %v312_v0 }
  0xb1   : > { %321 = vst.msk [vmem:[%s311_s21] sm:$0x3] %vm314_vm0, %v320_v14  ;;  %674 = vmatmul.mubr.msk.f32.vlgmr.msra.gmra.mrb[0].mxu0 %vm334_vm2, %v320_v14 }
 0x184   : > { %v404_v21 = vpop.f32.mrb[0].mxu0 }
 0x185   : > { %v408_v22 = vsel %vm314_vm0, %v404_v21, 0.0  ;;  %v675_v23 = vpop.f32.mrb[1].mxu0 }
 0x186   : > { %v409_v24 = vrot.slane %v408_v22, 4 }
 0x188   : > { %v410_v25 = vadd.f32 %v409_v24, %v408_v22 }
 0x18a   : > { %v411_v26 = vrot.slane %v410_v25, 2 }
 0x18c   : > { %v412_v27 = vadd.f32 %v411_v26, %v410_v25 }
 0x18e   : > { %v413_v28 = vrot.slane %v412_v27, 1 }
 0x190   : > { %v414_v29 = vadd.f32 %v413_v28, %v412_v27 }
 0x192   : > { %v416_v30 = vmul.f32 0.5, %v414_v29 }
 0x194   : > { %v417_v31 = vsub.f32 %v404_v21, %v416_v30 }
 0x196   : > { %v418_v32 = vmul.f32 %v417_v31, %v417_v31 }
 0x198   : > { %v419_v33 = vsel %vm314_vm0, %v418_v32, 0.0 }
 0x199   : > { %v420_v34 = vrot.slane %v419_v33, 4 }
 0x19b   : > { %v421_v35 = vadd.f32 %v420_v34, %v419_v33 }
 0x19d   : > { %v422_v36 = vrot.slane %v421_v35, 2 }
 0x19f   : > { %v423_v37 = vadd.f32 %v422_v36, %v421_v35 }
 0x1a1   : > { %v424_v38 = vrot.slane %v423_v37, 1 }
 0x1a3   : > { %v425_v39 = vadd.f32 %v424_v38, %v423_v37 }
 0x1a5   : > { %v426_v40 = vmul.f32 0.5, %v425_v39 }
 0x1a7   : > { %v427_v41 = vadd.f32 1e-05, %v426_v40 }
 0x1a9   : > { %712 = vrsqrt.f32 %v427_v41 }
 0x1b3   : > { %v713_v42 = vpop.eup %712 }
 0x1b4   : > { %v429_v44 = vmul.f32 %v713_v42, %v417_v31 }
 0x1b6   : > { %v436_v46 = vmul.f32 %v648_v43, %v429_v44 }
 0x1b8   : > { %v443_v47 = vadd.f32 %v649_v45, %v436_v46 }
 0x1ba   : > { %v444_v48 = vmax.f32 %v443_v47, 0.0 }
 0x1bc   : > { %685 = vmatmul.mubr.msk.f32.vlgmr.msra.gmra.mrb[0].mxu1 %vm334_vm2, %v444_v48 }
 0x28f   : > { %v514_v49 = vpop.f32.mrb[0].mxu1 }
 0x290   : > { %v519_v50 = vsel %vm518_vm3, %v514_v49, 0.0  ;;  %v686_v51 = vpop.f32.mrb[1].mxu1 }
 0x291   : > { %v520_v52 = vrot.slane %v519_v50, 4 }
 0x293   : > { %v521_v53 = vadd.f32 %v520_v52, %v519_v50 }
 0x295   : > { %v522_v54 = vrot.slane %v521_v53, 2 }
 0x297   : > { %v523_v55 = vadd.f32 %v522_v54, %v521_v53 }
 0x299   : > { %v524_v56 = vrot.slane %v523_v55, 1 }
 0x29b   : > { %v525_v57 = vadd.f32 %v524_v56, %v523_v55 }
 0x29d   : > { %v526_v58 = vmul.f32 0.5, %v525_v57 }
 0x29f   : > { %v527_v59 = vsub.f32 %v514_v49, %v526_v58 }
 0x2a1   : > { %v528_v60 = vmul.f32 %v527_v59, %v527_v59 }
 0x2a3   : > { %v529_v61 = vsel %vm518_vm3, %v528_v60, 0.0 }
 0x2a4   : > { %v530_v62 = vrot.slane %v529_v61, 4 }
 0x2a6   : > { %v531_v63 = vadd.f32 %v530_v62, %v529_v61 }
 0x2a8   : > { %v532_v0 = vrot.slane %v531_v63, 2 }
 0x2aa   : > { %v533_v1 = vadd.f32 %v532_v0, %v531_v63 }
 0x2ac   : > { %v534_v2 = vrot.slane %v533_v1, 1 }
 0x2ae   : > { %v535_v3 = vadd.f32 %v534_v2, %v533_v1 }
 0x2b0   : > { %v536_v4 = vmul.f32 0.5, %v535_v3 }
 0x2b2   : > { %v537_v5 = vadd.f32 1e-05, %v536_v4 }
 0x2b4   : > { %714 = vrsqrt.f32 %v537_v5 }
 0x2be   : > { %v715_v6 = vpop.eup %714 }
 0x2bf   : > { %v539_v8 = vmul.f32 %v715_v6, %v527_v59 }
 0x2c1   : > { %v546_v10 = vmul.f32 %v651_v7, %v539_v8 }
 0x2c3   : > { %v553_v11 = vadd.f32 %v652_v9, %v546_v10 }
 0x2c5   : > { %554 = vst.msk [vmem:[%s307_s20] sm:$0x3] %vm518_vm3, %v553_v11 }
 0x2c6 PF: > { %s19_s27 = sadd.s32 1, %s722_s27  }
 0x2c7   : > { %p16_p4 = scmp.ge.s32.totalorder %s19_s27, 4  }
 0x2c9   :  { %18 = sbr.rel (!%p16_p4) target bundleno = 1 (0x1), region = 90 }

// kernel: rmvit_forward.8
= control target key start
LH: loop header
LB: loop body
LE: loop exit
PB: predicated region body
PF: predicated region fallthrough
CT: control target
= control target key end

     0   :  { %14 = vsyncpa [#allocation3], 0  ;;  %s1253_s0 = inlined_call_operand.vmem [shape: f32[2,32,32], index: 0, kind: input, shape index: {}]   ;;  %s1254_s1 = inlined_call_operand.vmem [shape: f32[32,32], index: 1, kind: input, shape index: {}]   ;;  %s1255_s2 = inlined_call_operand.vmem [shape: f32[1,32], index: 2, kind: input, shape index: {}]   ;;  %s1256_s3 = inlined_call_operand.vmem [shape: f32[1,32], index: 3, kind: input, shape index: {}]   ;;  %s1257_s4 = inlined_call_operand.vmem [shape: f32[32,16], index: 4, kind: input, shape index: {}]   ;;  %s1258_s5 = inlined_call_operand.vmem [shape: f32[1,16], index: 5, kind: input, shape index: {}]   ;;  %s1259_s6 = inlined_call_operand.vmem [shape: f32[1,16], index: 6, kind: input, shape index: {}]   ;;  %s1260_s7 = inlined_call_operand.vmem [shape: f32[2,32,16], index: 7, kind: output, shape index: {0}]   ;;  %s1261_s8 = inlined_call_operand.hbm [shape: f32[2,32,32], index: 8, kind: output, shape index: {1}]  }
   0x1   :  { %16 = vsyncpa [#allocation3 + $0x1], 0  ;;  %s1057_s27 = smov 0   ;;  %s1059_s28 = smov 0  }
   0x2   :  { %s1061_s29 = smov 0   ;;  %s1063_s30 = smov 0  }
   0x3 LB: > { %s1078_s9 = sadd.s32 4294967295, %s1007_s30   ;;  %s803_s10 = sadd.s32 4294967294, %s1007_s30   ;;  %s1007_s30 = sphi %s1063_s30, %s1267_s30   ;;  %s1003_s29 = sphi %s1061_s29, %s1266_s29   ;;  %s999_s28 = sphi %s1059_s28, %s1265_s28   ;;  %s995_s27 = sphi %s1057_s27, %s1264_s27  }
   0x4   : > { %s1082_s11 = sadd.s32 1, %s1007_s30   ;;  %s207_s12 = sadd.s32 1, %s1003_s29 }
   0x5   : > { %s204_s13 = ssub.s32 %s1007_s30, %s1082_s11  ;;  %p217_p0 = scmp.ne.s32.totalorder %s1003_s29, %s999_s28 }
   0x6   : > { %p205_p1 = scmp.eq.s32.totalorder %s204_s13, 0  ;;  %p218_p2 = scmp.eq.s32.totalorder %s1078_s9, 1 }
   0x7   : > { %p223_p3 = scmp.ne.s32.totalorder %s999_s28, %s995_s27  ;;  %p224_p4 = scmp.eq.s32.totalorder %s803_s10, 1 }
   0x8   : > { %s1093_s14 = scalar_select %p205_p1, %s1003_s29, %s207_s12  }
   0x9   : > { %p1095_p5 = por %p218_p2, %p217_p0  ;;  %p1099_p6 = por %p224_p4, %p223_p3 }
   0xa   : > { %p806_p7 = scmp.ge.s32.totalorder %s1007_s30, 1  ;;  %p268_p8 = scmp.lt.s32.totalorder %s1007_s30, 3 }
   0xc   : > { %p269_p9 = pnand %p806_p7, %p268_p8 }
   0xd   : > { %p307_p10 = scmp.lt.s32.totalorder (!%p269_p9), %s1078_s9, 1  ;;  %vm325_vm0 = vcmask (!%p269_p9), 261120   ;;  %v354_v12 = vld [vmem:[%s1254_s1] sm:$0xff] (!%p269_p9)  ;;  %v355_v13 = vld [vmem:[%s1254_s1 + $0x8] sm:$0xff] (!%p269_p9)  ;;  %v356_v14 = vld [vmem:[%s1254_s1 + $0x10] sm:$0xff] (!%p269_p9)  ;;  %s304_s19 = sand.u32 (!%p269_p9), 1, %s999_s28  }
   0xe   : > { %272 = sbr.rel (%p269_p9) target bundleno = 755 (0x2f3), region = 48  ;;  %v876_v15 = vpack.c.bf16 (!%p269_p9), %v355_v13, %v354_v12  ;;  %v357_v16 = vld [vmem:[%s1254_s1 + $0x18] sm:$0xff] (!%p269_p9)  ;;  %s807_s20 = sshll.u32 (!%p269_p9), %s304_s19, 5  ;;  %v360_v34 = vld [vmem:[%s1257_s4] sm:$0xff] (!%p269_p9)  ;;  %v361_v35 = vld [vmem:[%s1257_s4 + $0x8] sm:$0xff] (!%p269_p9) }
   0xf   : > { %v880_v17 = vpack.c.bf16 (!%p269_p9), %v357_v16, %v356_v14  ;;  %v884_v36 = vpack.c.bf16 (!%p269_p9), %v361_v35, %v360_v34  ;;  %v362_v37 = vld [vmem:[%s1257_s4 + $0x10] sm:$0xff] (!%p269_p9)  ;;  %v363_v38 = vld [vmem:[%s1257_s4 + $0x18] sm:$0xff] (!%p269_p9)  ;;  %s831_s26 = sshll.u32 (!%p269_p9), %s1078_s9, 9 }
  0x10   : > { %877 = vmatprep.subr.bf16.mxu0 (!%p269_p9), %v876_v15  ;;  %v888_v39 = vpack.c.bf16 (!%p269_p9), %v363_v38, %v362_v37  ;;  %s1185_s13 = scalar_lea.hbm (!%p269_p9), %s1261_s8, %s831_s26 }
  0x11   : > { %879 = vmatpush3.bf16.msra.mxu0 (!%p269_p9), %v876_v15  ;;  %885 = vmatprep.subr.bf16.mxu1 (!%p269_p9), %v884_v36 }
  0x12   : > { %881 = vmatprep.subr.bf16.mxu0 (!%p269_p9), %v880_v17  ;;  %887 = vmatpush3.bf16.msra.mxu1 (!%p269_p9), %v884_v36 }
  0x13   : > { %889 = vmatprep.subr.bf16.mxu1 (!%p269_p9), %v888_v39 }
  0x15   : > { %s1107_s17 = scalar_select %p307_p10, %s1078_s9, 1  ;;  %883 = vmatpush3.bf16.msra.mxu0 %v880_v17 }
  0x16   : > { %891 = vmatpush3.bf16.msra.mxu1 %v888_v39 }
  0x17   : > { %s829_s18 = sshll.u32 %s1107_s17, 5 }
  0x18   : > { %s311_s21 = scalar_lea.vmem %s1253_s0, %s829_s18 }
  0x19   : > { %v317_v0 = vld [vmem:[%s311_s21] sm:$0xff]  ;;  %v319_v1 = vld [vmem:[%s311_s21 + $0x10] sm:$0xff]  ;;  %v318_v2 = vld [vmem:[%s311_s21 + $0x8] sm:$0xff] }
  0x1a   : > { %v321_v3 = vmul.f32 %v317_v0, %v317_v0  ;;  %v323_v4 = vmul.f32 %v319_v1, %v319_v1  ;;  %v322_v5 = vmul.f32 %v318_v2, %v318_v2  ;;  %v320_v6 = vld [vmem:[%s311_s21 + $0x18] sm:$0xff]  ;;  %s1134_s21 = scalar_lea.vmem [#allocation2], %s807_s20  ;;  %s1189_s20 = scalar_lea.sflag [#allocation3], %s304_s19 }
  0x1b   : > { %v324_v7 = vmul.f32 %v320_v6, %v320_v6  ;;  %s716_s25 = sshll.u32 %s1134_s21, 4  ;;  %s1179_s25 = int_to_ptr.vmem [resolvable:$true] %s716_s25 }
  0x1c   : > { %v326_v8 = vsel %vm325_vm0, %v321_v3, 0.0  ;;  %v332_v9 = vsel %vm325_vm0, %v323_v4, 0.0  ;;  %v329_v10 = vsel %vm325_vm0, %v322_v5, 0.0  ;;  %s945_s22 = scalar_lea.vmem %s1179_s25, 512 }
  0x1d   : > { %327 = vadd.xlane.f32.xlu0 %v326_v8  ;;  %333 = vadd.xlane.f32.xlu1 %v332_v9  ;;  %v335_v11 = vsel %vm325_vm0, %v324_v7, 0.0  ;;  %p946_p11 = scmp.ne.s32.totalorder %s1179_s25, %s945_s22 }
  0x1f   : > { %p947_p12 = pnand %p946_p11, %p1095_p5 }
  0x21   : > { %330 = vadd.xlane.f32.xlu0 %v329_v10  ;;  %336 = vadd.xlane.f32.xlu1 %v335_v11  ;;  %p948_p13 = pneg %p947_p12 }
  0xaa   : > { %v328_v18 = vpop.xlane.xlu0 %327  ;;  %v334_v19 = vpop.xlane.xlu1 %333 }
  0xab   : > { %v338_v20 = vmax.f32 %v328_v18, 1e-24  ;;  %v340_v21 = vmax.f32 %v334_v19, 1e-24  ;;  %v816_v18 = vld [vmem:[%s1255_s2] ss:$0 sm:$0xff] }
  0xad   : > { %933 = vrsqrt.f32 %v338_v20 }
  0xae   : > { %935 = vrsqrt.f32 %v340_v21  ;;  %v331_v22 = vpop.xlane.xlu0 %330  ;;  %v337_v23 = vpop.xlane.xlu1 %336 }
  0xaf   : > { %v339_v24 = vmax.f32 %v331_v22, 1e-24  ;;  %v341_v25 = vmax.f32 %v337_v23, 1e-24  ;;  %v817_v23 = vld [vmem:[%s1256_s3] ss:$0 sm:$0xff] }
  0xb1   : > { %937 = vrsqrt.f32 %v339_v24 }
  0xb2   : > { %939 = vrsqrt.f32 %v341_v25 }
  0xb7   : > { %v934_v26 = vpop.eup %933 }
  0xb8   : > { %v936_v27 = vpop.eup %935  ;;  %v346_v28 = vmul.f32 %v934_v26, %v317_v0 }
  0xb9   : > { %v348_v29 = vmul.f32 %v936_v27, %v319_v1 }
  0xba   : > { %350 = vst.msk [vmem:[%s1134_s21] sm:$0xff] %vm325_vm0, %v346_v28  ;;  %856 = vmatprep.mubr.msk.f32.mxu0 %vm325_vm0, %v346_v28 }
  0xbb   : > { %v938_v30 = vpop.eup %937  ;;  %352 = vst.msk [vmem:[%s1134_s21 + $0x10] sm:$0xff] %vm325_vm0, %v348_v29 }
  0xbc   : > { %v940_v31 = vpop.eup %939  ;;  %v347_v32 = vmul.f32 %v938_v30, %v318_v2 }
  0xbd   : > { %v349_v33 = vmul.f32 %v940_v31, %v320_v6 }
  0xbe   : > { %351 = vst.msk [vmem:[%s1134_s21 + $0x8] sm:$0xff] %vm325_vm0, %v347_v32  ;;  %857 = vmatmul.mubr.msk.f32.vlgmr.msra.gmra.mrb[0].mxu0 %vm325_vm0, %v347_v32 }
  0xbf   : > { %859 = vmatprep.mubr.msk.f32.mxu0 %vm325_vm0, %v348_v29  ;;  %353 = vst.msk [vmem:[%s1134_s21 + $0x18] sm:$0xff] %vm325_vm0, %v349_v33  ;;  %s1009_s21 = smov [#allocation2]  }
  0xc0   : > { %s949_s23 = sshll.u32 %s1009_s21, 4  ;;  %s950_s23 = int_to_ptr.vmem [resolvable:$false] %s949_s23 }
  0xc1   : > { %s951_s24 = scalar_lea.vmem %s950_s23, 1024  ;;  %p952_p0 = scmp.lt.s32.totalorder %s1179_s25, %s950_s23 }
  0xc2   : > { %860 = vmatmul.mubr.msk.f32.gmra.mrb[2].mxu0 %vm325_vm0, %v349_v33  ;;  %p953_p1 = scmp.lt.s32.totalorder %s951_s24, %s945_s22 }
  0xc4   : > { %p954_p2 = por %p953_p1, %p952_p0 }
  0xc6   : > { %p955_p3 = pnand %p954_p2, %p948_p13 }
 0x191   : > { %v858_v40 = vpop.f32.mrb[0].mxu0 }
 0x192   : > { %v464_v41 = vsel %vm325_vm0, %v858_v40, 0.0  ;;  %v444_v42 = vpop.f32.mrb[1].mxu0 }
 0x193   : > { %v463_v43 = vsel %vm325_vm0, %v444_v42, 0.0 }
 0x194   : > { %v465_v44 = vadd.f32 %v464_v41, %v463_v43 }
 0x195   : > { %v861_v45 = vpop.f32.mrb[2].mxu0 }
 0x196   : > { %v454_v46 = vpop.f32.mrb[3].mxu0  ;;  %v468_v49 = vsel %vm325_vm0, %v861_v45, 0.0 }
 0x197   : > { %v466_v47 = vsel %vm325_vm0, %v454_v46, 0.0 }
 0x198   : > { %v467_v48 = vadd.f32 %v466_v47, %v465_v44 }
 0x19a   : > { %v469_v50 = vadd.f32 %v468_v49, %v467_v48 }
 0x19c   : > { %v470_v51 = vrot.slane %v469_v50, 4 }
 0x19e   : > { %v471_v52 = vadd.f32 %v470_v51, %v469_v50 }
 0x1a0   : > { %v472_v53 = vrot.slane %v471_v52, 2 }
 0x1a2   : > { %v473_v54 = vadd.f32 %v472_v53, %v471_v52 }
 0x1a4   : > { %v474_v55 = vrot.slane %v473_v54, 1 }
 0x1a6   : > { %v475_v56 = vadd.f32 %v474_v55, %v473_v54 }
 0x1a8   : > { %v477_v57 = vmul.f32 0.03125, %v475_v56 }
 0x1aa   : > { %v478_v58 = vsub.f32 %v444_v42, %v477_v57  ;;  %v479_v59 = vsub.f32 %v858_v40, %v477_v57  ;;  %v480_v60 = vsub.f32 %v454_v46, %v477_v57  ;;  %v481_v61 = vsub.f32 %v861_v45, %v477_v57 }
 0x1ac   : > { %v482_v62 = vmul.f32 %v478_v58, %v478_v58  ;;  %v483_v63 = vmul.f32 %v479_v59, %v479_v59  ;;  %v484_v0 = vmul.f32 %v480_v60, %v480_v60  ;;  %v485_v1 = vmul.f32 %v481_v61, %v481_v61 }
 0x1ae   : > { %v486_v2 = vsel %vm325_vm0, %v482_v62, 0.0  ;;  %v487_v3 = vsel %vm325_vm0, %v483_v63, 0.0  ;;  %v489_v5 = vsel %vm325_vm0, %v484_v0, 0.0  ;;  %v491_v7 = vsel %vm325_vm0, %v485_v1, 0.0 }
 0x1af   : > { %v488_v4 = vadd.f32 %v487_v3, %v486_v2 }
 0x1b1   : > { %v490_v6 = vadd.f32 %v489_v5, %v488_v4 }
 0x1b3   : > { %v492_v8 = vadd.f32 %v491_v7, %v490_v6 }
 0x1b5   : > { %v493_v9 = vrot.slane %v492_v8, 4 }
 0x1b7   : > { %v494_v10 = vadd.f32 %v493_v9, %v492_v8 }
 0x1b9   : > { %v495_v11 = vrot.slane %v494_v10, 2 }
 0x1bb   : > { %v496_v12 = vadd.f32 %v495_v11, %v494_v10 }
 0x1bd   : > { %v497_v13 = vrot.slane %v496_v12, 1 }
 0x1bf   : > { %v498_v14 = vadd.f32 %v497_v13, %v496_v12 }
 0x1c1   : > { %v499_v15 = vmul.f32 0.03125, %v498_v14 }
 0x1c3   : > { %v500_v16 = vadd.f32 1e-05, %v499_v15 }
 0x1c5   : > { %941 = vrsqrt.f32 %v500_v16 }
 0x1cf   : > { %v942_v17 = vpop.eup %941 }
 0x1d0   : > { %v504_v19 = vmul.f32 %v942_v17, %v480_v60  ;;  %v502_v20 = vmul.f32 %v942_v17, %v478_v58  ;;  %v503_v21 = vmul.f32 %v942_v17, %v479_v59  ;;  %v505_v22 = vmul.f32 %v942_v17, %v481_v61 }
 0x1d2   : > { %v514_v24 = vmul.f32 %v816_v18, %v504_v19  ;;  %v512_v25 = vmul.f32 %v816_v18, %v502_v20  ;;  %v513_v26 = vmul.f32 %v816_v18, %v503_v21  ;;  %v515_v27 = vmul.f32 %v816_v18, %v505_v22 }
 0x1d4   : > { %v522_v28 = vadd.f32 %v817_v23, %v512_v25  ;;  %v523_v29 = vadd.f32 %v817_v23, %v513_v26  ;;  %v524_v30 = vadd.f32 %v817_v23, %v514_v24  ;;  %v525_v33 = vadd.f32 %v817_v23, %v515_v27 }
 0x1d6   : > { %v526_v31 = vmax.f32 %v522_v28, 0.0  ;;  %v527_v32 = vmax.f32 %v523_v29, 0.0  ;;  %v528_v34 = vmax.f32 %v524_v30, 0.0  ;;  %v529_v35 = vmax.f32 %v525_v33, 0.0 }
 0x1d8   : > { %870 = vmatprep.mubr.msk.f32.mxu1 %vm325_vm0, %v526_v31 }
 0x1d9   : > { %871 = vmatmul.mubr.msk.f32.vlgmr.msra.gmra.mrb[0].mxu1 %vm325_vm0, %v527_v32 }
 0x1da   : > { %873 = vmatprep.mubr.msk.f32.mxu1 %vm325_vm0, %v528_v34 }
 0x1dd   : > { %874 = vmatmul.mubr.msk.f32.gmra.mrb[2].mxu1 %vm325_vm0, %v529_v35 }
 0x1de   : > { %958 = shalt.err (!%p955_p3)
}
 0x1df   : > { %s959_s9 = scalar_lea.hbm %s1185_s13, 512  ;;  %s963_s10 = scalar_lea.hbm %s1261_s8, 1024 }
 0x1e0   : > { %p960_p4 = scmp.ne.s32.totalorder %s1185_s13, %s959_s9  ;;  %p964_p9 = scmp.lt.u32.totalorder %s1185_s13, %s1261_s8 }
 0x1e1   : > { %p965_p10 = scmp.lt.u32.totalorder %s963_s10, %s959_s9  ;;  %p967_p12 = scmp.lt.u32.totalorder %s959_s9, %s1185_s13 }
 0x1e2   : > { %p961_p7 = pnand %p960_p4, %p1095_p5 }
 0x1e3   : > { %p966_p11 = por %p965_p10, %p964_p9 }
 0x1e4   : > { %p962_p8 = pneg %p961_p7 }
 0x1e5   : > { %p968_p13 = por %p967_p12, %p966_p11 }
 0x1e7   : > { %p969_p0 = pnand %p968_p13, %p962_p8 }
 0x1e9   : > { %972 = shalt.err (!%p969_p0)
}
 0x1ea   : > { %s1010_s22 = smov 128   ;;  %s1011_s23 = smov 8   ;;  %vm627_vm1 = vcmask 130048   ;;  %v822_v14 = vld [vmem:[%s1258_s5] ss:$0 sm:$0xff] }
 0x1eb   : > { %892 = dma.vmem_to_hbm [thread:$0]  (%p1095_p5), %s1179_s25, 512, %s1185_s13, %s1189_s20, %s1010_s22, %s1010_s22, %s1011_s23  }
 0x1ec   : > { %v823_v19 = vld [vmem:[%s1259_s6] ss:$0 sm:$0xff]  ;;  %s316_s19 = scalar_lea.vmem %s1260_s7, %s829_s18 }
 0x2ac   : > { %v872_v36 = vpop.f32.mrb[0].mxu1 }
 0x2ad   : > { %v629_v37 = vsel %vm627_vm1, %v872_v36, 0.0  ;;  %v608_v38 = vpop.f32.mrb[1].mxu1 }
 0x2ae   : > { %v628_v39 = vsel %vm627_vm1, %v608_v38, 0.0 }
 0x2af   : > { %v630_v40 = vadd.f32 %v629_v37, %v628_v39 }
 0x2b0   : > { %v875_v41 = vpop.f32.mrb[2].mxu1 }
 0x2b1   : > { %v618_v42 = vpop.f32.mrb[3].mxu1  ;;  %v633_v45 = vsel %vm627_vm1, %v875_v41, 0.0 }
 0x2b2   : > { %v631_v43 = vsel %vm627_vm1, %v618_v42, 0.0 }
 0x2b3   : > { %v632_v44 = vadd.f32 %v631_v43, %v630_v40 }
 0x2b5   : > { %v634_v46 = vadd.f32 %v633_v45, %v632_v44 }
 0x2b7   : > { %v635_v47 = vrot.slane %v634_v46, 4 }
 0x2b9   : > { %v636_v48 = vadd.f32 %v635_v47, %v634_v46 }
 0x2bb   : > { %v637_v49 = vrot.slane %v636_v48, 2 }
 0x2bd   : > { %v638_v50 = vadd.f32 %v637_v49, %v636_v48 }
 0x2bf   : > { %v639_v51 = vrot.slane %v638_v50, 1 }
 0x2c1   : > { %v640_v52 = vadd.f32 %v639_v51, %v638_v50 }
 0x2c3   : > { %v641_v53 = vmul.f32 0.03125, %v640_v52 }
 0x2c5   : > { %v642_v54 = vsub.f32 %v608_v38, %v641_v53  ;;  %v643_v55 = vsub.f32 %v872_v36, %v641_v53  ;;  %v644_v56 = vsub.f32 %v618_v42, %v641_v53  ;;  %v645_v57 = vsub.f32 %v875_v41, %v641_v53 }
 0x2c7   : > { %v646_v58 = vmul.f32 %v642_v54, %v642_v54  ;;  %v647_v59 = vmul.f32 %v643_v55, %v643_v55  ;;  %v648_v60 = vmul.f32 %v644_v56, %v644_v56  ;;  %v649_v61 = vmul.f32 %v645_v57, %v645_v57 }
 0x2c9   : > { %v650_v62 = vsel %vm627_vm1, %v646_v58, 0.0  ;;  %v651_v63 = vsel %vm627_vm1, %v647_v59, 0.0  ;;  %v653_v1 = vsel %vm627_vm1, %v648_v60, 0.0  ;;  %v655_v3 = vsel %vm627_vm1, %v649_v61, 0.0 }
 0x2ca   : > { %v652_v0 = vadd.f32 %v651_v63, %v650_v62 }
 0x2cc   : > { %v654_v2 = vadd.f32 %v653_v1, %v652_v0 }
 0x2ce   : > { %v656_v4 = vadd.f32 %v655_v3, %v654_v2 }
 0x2d0   : > { %v657_v5 = vrot.slane %v656_v4, 4 }
 0x2d2   : > { %v658_v6 = vadd.f32 %v657_v5, %v656_v4 }
 0x2d4   : > { %v659_v7 = vrot.slane %v658_v6, 2 }
 0x2d6   : > { %v660_v8 = vadd.f32 %v659_v7, %v658_v6 }
 0x2d8   : > { %v661_v9 = vrot.slane %v660_v8, 1 }
 0x2da   : > { %v662_v10 = vadd.f32 %v661_v9, %v660_v8 }
 0x2dc   : > { %v663_v11 = vmul.f32 0.03125, %v662_v10 }
 0x2de   : > { %v664_v12 = vadd.f32 1e-05, %v663_v11 }
 0x2e0   : > { %943 = vrsqrt.f32 %v664_v12 }
 0x2ea   : > { %v944_v13 = vpop.eup %943 }
 0x2eb   : > { %v666_v15 = vmul.f32 %v944_v13, %v642_v54  ;;  %v667_v16 = vmul.f32 %v944_v13, %v643_v55  ;;  %v668_v17 = vmul.f32 %v944_v13, %v644_v56  ;;  %v669_v18 = vmul.f32 %v944_v13, %v645_v57 }
 0x2ed   : > { %v676_v20 = vmul.f32 %v822_v14, %v666_v15  ;;  %v677_v21 = vmul.f32 %v822_v14, %v667_v16  ;;  %v678_v22 = vmul.f32 %v822_v14, %v668_v17  ;;  %v679_v23 = vmul.f32 %v822_v14, %v669_v18 }
 0x2ef   : > { %v686_v24 = vadd.f32 %v823_v19, %v676_v20  ;;  %v687_v25 = vadd.f32 %v823_v19, %v677_v21  ;;  %v688_v26 = vadd.f32 %v823_v19, %v678_v22  ;;  %v689_v27 = vadd.f32 %v823_v19, %v679_v23 }
 0x2f1   : > { %690 = vst.msk [vmem:[%s316_s19] sm:$0xff] %vm627_vm1, %v686_v24  ;;  %691 = vst.msk [vmem:[%s316_s19 + $0x8] sm:$0xff] %vm627_vm1, %v687_v25 }
 0x2f2   : > { %692 = vst.msk [vmem:[%s316_s19 + $0x10] sm:$0xff] %vm627_vm1, %v688_v26  ;;  %693 = vst.msk [vmem:[%s316_s19 + $0x18] sm:$0xff] %vm627_vm1, %v689_v27 }
 0x2f3 PF: > { %p898_p5 = scmp.ge.s32.totalorder %s1007_s30, 2  ;;  %s739_s17 = sand.u32 1, %s995_s27  }
 0x2f4   : > { %s740_s18 = scalar_lea.sflag [#allocation3], %s739_s17 }
 0x2f5   : > { %p895_p1 = pnand %p898_p5, %p1099_p6 }
 0x2f7   : > { %990 = dma.done.wait (!%p895_p1), %s740_s18, 512  }
 0x2f8   : > { %992 = vsyncadd (!%p895_p1), %s740_s18, 4294966784  ;;  %p19_p2 = scmp.ge.s32.totalorder %s1082_s11, 4   ;;  %s1264_s27 = smov %s999_s28 }
 0x2f9   : > { %s1265_s28 = smov %s1003_s29  ;;  %s1266_s29 = smov %s1093_s14 }
 0x2fa   : > { %s1267_s30 = smov %s1082_s11  ;;  %21 = sbr.rel (!%p19_p2) target bundleno = 3 (0x3), region = 95 }
 0x301   :  { %745 = vsyncpa [#allocation3], 1 }
 0x302   :  { %747 = vsyncpa [#allocation3 + $0x1], 1 }

// kernel: rmvit_forward.9
= control target key start
LH: loop header
LB: loop body
LE: loop exit
PB: predicated region body
PF: predicated region fallthrough
CT: control target
= control target key end

     0   :  { %16 = vsyncpa [#allocation3], 0  ;;  %v87_v3 = vlaneseq  ;;  %v1201_v8 = vmov 1983009808   ;;  %vm193_vm0 = vcmask 1041408   ;;  %vm195_vm1 = vcmask 517120   ;;  %s1862_s0 = inlined_call_operand.vmem [shape: f32[2,192], index: 0, kind: input, shape index: {}]   ;;  %s1863_s1 = inlined_call_operand.vmem [shape: f32[192,192], index: 1, kind: input, shape index: {}]   ;;  %s1864_s2 = inlined_call_operand.vmem [shape: f32[1,192], index: 2, kind: input, shape index: {}]   ;;  %s1865_s3 = inlined_call_operand.vmem [shape: f32[192,192], index: 3, kind: input, shape index: {}]   ;;  %s1866_s4 = inlined_call_operand.vmem [shape: f32[1,192], index: 4, kind: input, shape index: {}]   ;;  %s1867_s5 = inlined_call_operand.vmem [shape: f32[1,192], index: 5, kind: input, shape index: {}]   ;;  %s1868_s6 = inlined_call_operand.vmem [shape: f32[192,16], index: 6, kind: input, shape index: {}]   ;;  %s1869_s7 = inlined_call_operand.vmem [shape: f32[1,16], index: 7, kind: input, shape index: {}]   ;;  %s1870_s8 = inlined_call_operand.vmem [shape: f32[1,16], index: 8, kind: input, shape index: {}]   ;;  %s1871_s9 = inlined_call_operand.hbm [shape: f32[2,16], index: 9, kind: output, shape index: {0}]   ;;  %s1872_s10 = inlined_call_operand.hbm [shape: f32[2,16], index: 10, kind: output, shape index: {1}]  }
   0x1   :  { %v38_v0 = vld [vmem:[%s1863_s1 + $0x8] sm:$0xff]  ;;  %v40_v1 = vld [vmem:[%s1863_s1 + $0x18] sm:$0xff]  ;;  %v37_v2 = vld [vmem:[%s1863_s1] sm:$0xff]  ;;  %v99_v9 = vunpack.c.l.s4 %v1201_v8  ;;  %vm107_vm2 = vcmask 523264  }
   0x2   :  { %v918_v4 = vpack.c.bf16 %v40_v1, %v38_v0  ;;  %v39_v5 = vld [vmem:[%s1863_s1 + $0x10] sm:$0xff]  ;;  %v42_v6 = vld [vmem:[%s1863_s1 + $0x28] sm:$0xff]  ;;  %v44_v7 = vld [vmem:[%s1863_s1 + $0x38] sm:$0xff]  ;;  %v1288_v15 = vshrl.u32 %v87_v3, 7 }
   0x3   :  { %v920_v10 = vpack.c.bf16 %v39_v5, %v37_v2  ;;  %v922_v11 = vpack.c.bf16 %v44_v7, %v42_v6  ;;  %v41_v12 = vld [vmem:[%s1863_s1 + $0x20] sm:$0xff]  ;;  %v43_v13 = vld [vmem:[%s1863_s1 + $0x30] sm:$0xff]  ;;  %v46_v14 = vld [vmem:[%s1863_s1 + $0x48] sm:$0xff]  ;;  %v100_v17 = vunpack.c.0.s8 %v99_v9 }
   0x4   :  { %919 = vmatprep.subr.bf16.mxu0 %v918_v4  ;;  %v48_v16 = vld [vmem:[%s1863_s1 + $0x58] sm:$0xff]  ;;  %v924_v18 = vpack.c.bf16 %v43_v13, %v41_v12  ;;  %v1296_v19 = vld [vmem:[%s1862_s0] sm:$0xf]  ;;  %v47_v22 = vld [vmem:[%s1863_s1 + $0x50] sm:$0xff] }
   0x5   :  { %921 = vmatpush1.bf16.msra.mxu0 %v920_v10  ;;  %v926_v20 = vpack.c.bf16 %v48_v16, %v46_v14  ;;  %v45_v21 = vld [vmem:[%s1863_s1 + $0x40] sm:$0xff]  ;;  %v1305_v23 = vsub.s32 %v100_v17, %v1288_v15  ;;  %v181_v24 = vmul.f32 %v1296_v19, %v1296_v19  ;;  %v50_v25 = vld [vmem:[%s1863_s1 + $0x68] sm:$0xff]  ;;  %v52_v26 = vld [vmem:[%s1863_s1 + $0x78] sm:$0xff] }
   0x6   :  { %923 = vmatprep.subr.bf16.mxu0 %v922_v11  ;;  %v928_v29 = vpack.c.bf16 %v47_v22, %v45_v21  ;;  %v930_v32 = vpack.c.bf16 %v52_v26, %v50_v25  ;;  %v49_v33 = vld [vmem:[%s1863_s1 + $0x60] sm:$0xff]  ;;  %v51_v34 = vld [vmem:[%s1863_s1 + $0x70] sm:$0xff]  ;;  %v54_v35 = vld [vmem:[%s1863_s1 + $0x88] sm:$0xff] }
   0x7   :  { %v189_v27 = vrot.slane %v181_v24, %v1305_v23  ;;  %v1318_v28 = vrot.slane %v1296_v19, %v1305_v23  ;;  %v56_v36 = vld [vmem:[%s1863_s1 + $0x98] sm:$0xff]  ;;  %v932_v40 = vpack.c.bf16 %v51_v34, %v49_v33  ;;  %v53_v42 = vld [vmem:[%s1863_s1 + $0x80] sm:$0xff]  ;;  %v55_v43 = vld [vmem:[%s1863_s1 + $0x90] sm:$0xff] }
   0x8   :  { %v934_v41 = vpack.c.bf16 %v56_v36, %v54_v35  ;;  %v58_v44 = vld [vmem:[%s1863_s1 + $0xa8] sm:$0xff]  ;;  %v60_v45 = vld [vmem:[%s1863_s1 + $0xb8] sm:$0xff]  ;;  %v57_v46 = vld [vmem:[%s1863_s1 + $0xa0] sm:$0xff]  ;;  %v936_v48 = vpack.c.bf16 %v55_v43, %v53_v42 }
   0x9   :  { %925 = vmatpush1.bf16.msra.mxu0 %v924_v18  ;;  %v190_v30 = vcombine.high %v189_v27, %v189_v27  ;;  %v194_v31 = vsel %vm193_vm0, %v189_v27, 0.0  ;;  %v105_v37 = vcombine.high %v1318_v28, %v1318_v28  ;;  %v59_v47 = vld [vmem:[%s1863_s1 + $0xb0] sm:$0xff]  ;;  %v62_v49 = vld [vmem:[%s1863_s1 + $0xc8] sm:$0xff]  ;;  %v64_v50 = vld [vmem:[%s1863_s1 + $0xd8] sm:$0xff]  ;;  %v938_v53 = vpack.c.bf16 %v60_v45, %v58_v44 }
   0xa   :  { %927 = vmatprep.subr.bf16.mxu0 %v926_v20  ;;  %v213_v51 = vld [vmem:[%s1865_s3 + $0x8] sm:$0xff]  ;;  %v215_v52 = vld [vmem:[%s1865_s3 + $0x18] sm:$0xff]  ;;  %v212_v55 = vld [vmem:[%s1865_s3] sm:$0xff]  ;;  %v940_v1 = vpack.c.bf16 %v59_v47, %v57_v46  ;;  %v942_v5 = vpack.c.bf16 %v64_v50, %v62_v49 }
   0xb   :  { %v196_v38 = vsel %vm195_vm1, %v190_v30, 0.0  ;;  %909 = vmatprep.mubr.msk.f32.mxu0 %vm107_vm2, %v105_v37  ;;  %v1367_v54 = vpack.c.bf16 %v215_v52, %v213_v51  ;;  %v214_v56 = vld [vmem:[%s1865_s3 + $0x10] sm:$0xff]  ;;  %v217_v57 = vld [vmem:[%s1865_s3 + $0x28] sm:$0xff]  ;;  %v219_v59 = vld [vmem:[%s1865_s3 + $0x38] sm:$0xff] }
   0xc   :  { %v197_v39 = vadd.f32 %v196_v38, %v194_v31  ;;  %v1378_v58 = vpack.c.bf16 %v214_v56, %v212_v55  ;;  %v216_v60 = vld [vmem:[%s1865_s3 + $0x20] sm:$0xff]  ;;  %v218_v61 = vld [vmem:[%s1865_s3 + $0x30] sm:$0xff]  ;;  %v1390_v62 = vpack.c.bf16 %v219_v59, %v217_v57  ;;  %v221_v63 = vld [vmem:[%s1865_s3 + $0x48] sm:$0xff] }
   0xd   :  { %929 = vmatpush1.bf16.msra.mxu0 %v928_v29  ;;  %967 = vmatprep.subr.bf16.mxu1 %v1367_v54  ;;  %v223_v0 = vld [vmem:[%s1865_s3 + $0x58] sm:$0xff]  ;;  %v61_v2 = vld [vmem:[%s1863_s1 + $0xc0] sm:$0xff]  ;;  %v63_v3 = vld [vmem:[%s1863_s1 + $0xd0] sm:$0xff]  ;;  %v1405_v4 = vpack.c.bf16 %v218_v61, %v216_v60 }
   0xe   :  { %931 = vmatprep.subr.bf16.mxu0 %v930_v32  ;;  %198 = vadd.xlane.f32.xlu0 %v197_v39  ;;  %v66_v6 = vld [vmem:[%s1863_s1 + $0xe8] sm:$0xff]  ;;  %v1411_v7 = vpack.c.bf16 %v223_v0, %v221_v63  ;;  %v220_v8 = vld [vmem:[%s1865_s3 + $0x40] sm:$0xff]  ;;  %v222_v9 = vld [vmem:[%s1865_s3 + $0x50] sm:$0xff]  ;;  %v944_v13 = vpack.c.bf16 %v63_v3, %v61_v2 }
   0xf   :  { %969 = vmatpush1.bf16.msra.mxu1 %v1378_v58  ;;  %v68_v10 = vld [vmem:[%s1863_s1 + $0xf8] sm:$0xff]  ;;  %v225_v11 = vld [vmem:[%s1865_s3 + $0x68] sm:$0xff]  ;;  %v65_v14 = vld [vmem:[%s1863_s1 + $0xe0] sm:$0xff]  ;;  %v1438_v18 = vpack.c.bf16 %v222_v9, %v220_v8 }
  0x10   :  { %971 = vmatprep.subr.bf16.mxu1 %v1390_v62  ;;  %v227_v12 = vld [vmem:[%s1865_s3 + $0x78] sm:$0xff]  ;;  %v67_v16 = vld [vmem:[%s1863_s1 + $0xf0] sm:$0xff]  ;;  %v70_v17 = vld [vmem:[%s1863_s1 + $0x108] sm:$0xff]  ;;  %v946_v20 = vpack.c.bf16 %v68_v10, %v66_v6 }
  0x11   :  { %933 = vmatpush1.bf16.msra.mxu0 %v932_v40  ;;  %v1441_v21 = vpack.c.bf16 %v227_v12, %v225_v11  ;;  %v224_v22 = vld [vmem:[%s1865_s3 + $0x60] sm:$0xff]  ;;  %v226_v24 = vld [vmem:[%s1865_s3 + $0x70] sm:$0xff] }
  0x12   :  { %935 = vmatprep.subr.bf16.mxu0 %v934_v41 }
  0x13   :  { %973 = vmatpush1.bf16.msra.mxu1 %v1405_v4 }
  0x14   :  { %975 = vmatprep.subr.bf16.mxu1 %v1411_v7 }
  0x15   :  { %937 = vmatpush1.bf16.msra.mxu0 %v936_v48 }
  0x16   :  { %939 = vmatprep.subr.bf16.mxu0 %v938_v53 }
  0x19   :  { %941 = vmatpush1.bf16.msra.mxu0 %v940_v1 }
  0x1a   :  { %943 = vmatprep.subr.bf16.mxu0 %v942_v5 }
  0x1b   :  { %17 = vsyncpa [#allocation5], 0  ;;  %v72_v25 = vld [vmem:[%s1863_s1 + $0x118] sm:$0xff]  ;;  %v229_v26 = vld [vmem:[%s1865_s3 + $0x88] sm:$0xff]  ;;  %v948_v29 = vpack.c.bf16 %v67_v16, %v65_v14  ;;  %977 = vmatpush1.bf16.msra.mxu1 %v1438_v18  ;;  %v1465_v32 = vpack.c.bf16 %v226_v24, %v224_v22  ;;  %vm515_vm3 = vcmask 123904   ;;  %s1204_s25 = smov [#allocation2]  }
  0x1c   :  { %v231_v27 = vld [vmem:[%s1865_s3 + $0x98] sm:$0xff]  ;;  %v69_v30 = vld [vmem:[%s1863_s1 + $0x100] sm:$0xff]  ;;  %v71_v31 = vld [vmem:[%s1863_s1 + $0x110] sm:$0xff]  ;;  %v950_v33 = vpack.c.bf16 %v72_v25, %v70_v17  ;;  %979 = vmatprep.subr.bf16.mxu1 %v1441_v21  ;;  %s887_s26 = sshll.u32 %s1204_s25, 4  ;;  %s888_s26 = int_to_ptr.vmem [resolvable:$true] %s887_s26 }
  0x1d   :  { %945 = vmatpush1.bf16.msra.mxu0 %v944_v13  ;;  %v74_v34 = vld [vmem:[%s1863_s1 + $0x128] sm:$0xff]  ;;  %v1471_v35 = vpack.c.bf16 %v231_v27, %v229_v26  ;;  %v228_v36 = vld [vmem:[%s1865_s3 + $0x80] sm:$0xff]  ;;  %v230_v37 = vld [vmem:[%s1865_s3 + $0x90] sm:$0xff]  ;;  %v952_v41 = vpack.c.bf16 %v71_v31, %v69_v30  ;;  %s1153_s27 = scalar_lea.vmem %s888_s26, 32  ;;  %p1158_p1 = scmp.lt.s32.totalorder %s888_s26, %s888_s26 }
  0x1e   :  { %947 = vmatprep.subr.bf16.mxu0 %v946_v20  ;;  %v76_v38 = vld [vmem:[%s1863_s1 + $0x138] sm:$0xff]  ;;  %v233_v39 = vld [vmem:[%s1865_s3 + $0xa8] sm:$0xff]  ;;  %v73_v42 = vld [vmem:[%s1863_s1 + $0x120] sm:$0xff]  ;;  %v1495_v44 = vpack.c.bf16 %v230_v37, %v228_v36  ;;  %p1154_p0 = scmp.ne.s32.totalorder %s888_s26, %s1153_s27  ;;  %p1159_p2 = scmp.lt.s32.totalorder %s1153_s27, %s1153_s27 }
  0x1f   :  { %v235_v40 = vld [vmem:[%s1865_s3 + $0xb8] sm:$0xff]  ;;  %v75_v43 = vld [vmem:[%s1863_s1 + $0x130] sm:$0xff]  ;;  %981 = vmatpush1.bf16.msra.mxu1 %v1465_v32  ;;  %v954_v45 = vpack.c.bf16 %v76_v38, %v74_v34  ;;  %v78_v46 = vld [vmem:[%s1863_s1 + $0x148] sm:$0xff] }
  0x20   :  { %983 = vmatprep.subr.bf16.mxu1 %v1471_v35  ;;  %v1501_v47 = vpack.c.bf16 %v235_v40, %v233_v39  ;;  %v232_v48 = vld [vmem:[%s1865_s3 + $0xa0] sm:$0xff]  ;;  %v234_v49 = vld [vmem:[%s1865_s3 + $0xb0] sm:$0xff]  ;;  %v80_v50 = vld [vmem:[%s1863_s1 + $0x158] sm:$0xff]  ;;  %v956_v53 = vpack.c.bf16 %v75_v43, %v73_v42  ;;  %p1160_p3 = por %p1159_p2, %p1158_p1 }
  0x21   :  { %949 = vmatpush1.bf16.msra.mxu0 %v948_v29  ;;  %v237_v51 = vld [vmem:[%s1865_s3 + $0xc8] sm:$0xff]  ;;  %v239_v52 = vld [vmem:[%s1865_s3 + $0xd8] sm:$0xff]  ;;  %v77_v55 = vld [vmem:[%s1863_s1 + $0x140] sm:$0xff]  ;;  %v1525_v57 = vpack.c.bf16 %v234_v49, %v232_v48  ;;  %v958_v59 = vpack.c.bf16 %v80_v50, %v78_v46 }
  0x22   :  { %951 = vmatprep.subr.bf16.mxu0 %v950_v33  ;;  %v79_v56 = vld [vmem:[%s1863_s1 + $0x150] sm:$0xff]  ;;  %v82_v60 = vld [vmem:[%s1863_s1 + $0x168] sm:$0xff]  ;;  %v1531_v61 = vpack.c.bf16 %v239_v52, %v237_v51  ;;  %v236_v63 = vld [vmem:[%s1865_s3 + $0xc0] sm:$0xff]  ;;  %v1202_v51 = vmov 269488144   ;;  %p1161_p4 = pnand %p1160_p3, %p1154_p0 }
  0x23   :  { %985 = vmatpush1.bf16.msra.mxu1 %v1495_v44  ;;  %v238_v0 = vld [vmem:[%s1865_s3 + $0xd0] sm:$0xff]  ;;  %v84_v1 = vld [vmem:[%s1863_s1 + $0x178] sm:$0xff]  ;;  %v241_v2 = vld [vmem:[%s1865_s3 + $0xe8] sm:$0xff]  ;;  %v960_v5 = vpack.c.bf16 %v79_v56, %v77_v55  ;;  %v204_v52 = vunpack.c.l.s4 %v1202_v51 }
  0x24   :  { %987 = vmatprep.subr.bf16.mxu1 %v1501_v47  ;;  %v243_v3 = vld [vmem:[%s1865_s3 + $0xf8] sm:$0xff]  ;;  %v81_v6 = vld [vmem:[%s1863_s1 + $0x160] sm:$0xff]  ;;  %v1552_v8 = vpack.c.bf16 %v238_v0, %v236_v63  ;;  %v962_v9 = vpack.c.bf16 %v84_v1, %v82_v60  ;;  %v83_v10 = vld [vmem:[%s1863_s1 + $0x170] sm:$0xff] }
  0x25   :  { %953 = vmatpush1.bf16.msra.mxu0 %v952_v41  ;;  %v1558_v11 = vpack.c.bf16 %v243_v3, %v241_v2  ;;  %v240_v12 = vld [vmem:[%s1865_s3 + $0xe0] sm:$0xff]  ;;  %v242_v13 = vld [vmem:[%s1865_s3 + $0xf0] sm:$0xff]  ;;  %v245_v14 = vld [vmem:[%s1865_s3 + $0x108] sm:$0xff]  ;;  %v964_v17 = vpack.c.bf16 %v83_v10, %v81_v6 }
  0x26   :  { %955 = vmatprep.subr.bf16.mxu0 %v954_v45  ;;  %v247_v16 = vld [vmem:[%s1865_s3 + $0x118] sm:$0xff]  ;;  %v1573_v20 = vpack.c.bf16 %v242_v13, %v240_v12  ;;  %v244_v24 = vld [vmem:[%s1865_s3 + $0x100] sm:$0xff]  ;;  %v246_v25 = vld [vmem:[%s1865_s3 + $0x110] sm:$0xff] }
  0x27   :  { %989 = vmatpush1.bf16.msra.mxu1 %v1525_v57  ;;  %v998_v22 = vpack.c.bf16 %v247_v16, %v245_v14  ;;  %v249_v26 = vld [vmem:[%s1865_s3 + $0x128] sm:$0xff]  ;;  %v251_v27 = vld [vmem:[%s1865_s3 + $0x138] sm:$0xff]  ;;  %v1000_v29 = vpack.c.bf16 %v246_v25, %v244_v24  ;;  %v248_v31 = vld [vmem:[%s1865_s3 + $0x120] sm:$0xff] }
  0x28   :  { %991 = vmatprep.subr.bf16.mxu1 %v1531_v61  ;;  %v1002_v30 = vpack.c.bf16 %v251_v27, %v249_v26  ;;  %v250_v33 = vld [vmem:[%s1865_s3 + $0x130] sm:$0xff]  ;;  %v253_v34 = vld [vmem:[%s1865_s3 + $0x148] sm:$0xff]  ;;  %v255_v36 = vld [vmem:[%s1865_s3 + $0x158] sm:$0xff] }
  0x29   :  { %957 = vmatpush1.bf16.msra.mxu0 %v956_v53  ;;  %v1004_v37 = vpack.c.bf16 %v250_v33, %v248_v31  ;;  %v1006_v38 = vpack.c.bf16 %v255_v36, %v253_v34  ;;  %v252_v39 = vld [vmem:[%s1865_s3 + $0x140] sm:$0xff]  ;;  %v254_v40 = vld [vmem:[%s1865_s3 + $0x150] sm:$0xff]  ;;  %v257_v41 = vld [vmem:[%s1865_s3 + $0x168] sm:$0xff]  ;;  %v205_v53 = vunpack.c.0.s8 %v204_v52 }
  0x2a   :  { %959 = vmatprep.subr.bf16.mxu0 %v958_v59  ;;  %v1008_v42 = vpack.c.bf16 %v254_v40, %v252_v39  ;;  %v256_v45 = vld [vmem:[%s1865_s3 + $0x160] sm:$0xff]  ;;  %v258_v46 = vld [vmem:[%s1865_s3 + $0x170] sm:$0xff]  ;;  %v267_v2 = vld [vmem:[%s1868_s6 + $0x28] sm:$0xff] }
  0x2b   :  { %993 = vmatpush1.bf16.msra.mxu1 %v1552_v8  ;;  %v1012_v48 = vpack.c.bf16 %v258_v46, %v256_v45  ;;  %v208_v55 = vsub.s32 %v205_v53, %v1288_v15  ;;  %v266_v1 = vld [vmem:[%s1868_s6 + $0x20] sm:$0xff]  ;;  %v269_v6 = vld [vmem:[%s1868_s6 + $0x38] sm:$0xff]  ;;  %v271_v10 = vld [vmem:[%s1868_s6 + $0x48] sm:$0xff] }
  0x2c   :  { %995 = vmatprep.subr.bf16.mxu1 %v1558_v11  ;;  %v1679_v3 = vpack.c.bf16 %v267_v2, %v266_v1  ;;  %v272_v12 = vld [vmem:[%s1868_s6 + $0x50] sm:$0xff]  ;;  %v273_v13 = vld [vmem:[%s1868_s6 + $0x58] sm:$0xff]  ;;  %v274_v16 = vld [vmem:[%s1868_s6 + $0x60] sm:$0xff] }
  0x2d   :  { %961 = vmatpush1.bf16.msra.mxu0 %v960_v5  ;;  %v268_v5 = vld [vmem:[%s1868_s6 + $0x30] sm:$0xff]  ;;  %v1709_v14 = vpack.c.bf16 %v273_v13, %v272_v12  ;;  %v277_v24 = vld [vmem:[%s1868_s6 + $0x78] sm:$0xff]  ;;  %v278_v26 = vld [vmem:[%s1868_s6 + $0x80] sm:$0xff] }
  0x2e   :  { %963 = vmatprep.subr.bf16.mxu0 %v962_v9  ;;  %v270_v9 = vld [vmem:[%s1868_s6 + $0x40] sm:$0xff]  ;;  %v279_v27 = vld [vmem:[%s1868_s6 + $0x88] sm:$0xff]  ;;  %v281_v31 = vld [vmem:[%s1868_s6 + $0x98] sm:$0xff] }
  0x2f   :  { %997 = vmatpush1.bf16.msra.mxu1 %v1573_v20  ;;  %v282_v34 = vld [vmem:[%s1868_s6 + $0xa0] sm:$0xff]  ;;  %v283_v36 = vld [vmem:[%s1868_s6 + $0xa8] sm:$0xff]  ;;  %v285_v39 = vld [vmem:[%s1868_s6 + $0xb8] sm:$0xff] }
  0x30   :  { %999 = vmatprep.subr.bf16.mxu1 %v998_v22 }
  0x31   :  { %965 = vmatpush1.bf16.msra.mxu0 %v964_v17  ;;  %v275_v17 = vld [vmem:[%s1868_s6 + $0x68] sm:$0xff] }
  0x33   :  { %1001 = vmatpush1.bf16.msra.mxu1 %v1000_v29 }
  0x34   :  { %175 = vmatmul.mubr.f32.vlgmr.msra.gmra.mrb[0].mxu0 %v1318_v28  ;;  %1003 = vmatprep.subr.bf16.mxu1 %v1002_v30  ;;  %v259_v28 = vld [vmem:[%s1865_s3 + $0x178] sm:$0xff] }
  0x35   :  { %v1010_v43 = vpack.c.bf16 %v259_v28, %v257_v41 }
  0x37   :  { %1005 = vmatpush1.bf16.msra.mxu1 %v1004_v37 }
  0x38   :  { %1007 = vmatprep.subr.bf16.mxu1 %v1006_v38 }
  0x3b   :  { %1009 = vmatpush1.bf16.msra.mxu1 %v1008_v42 }
  0x3c   :  { %1011 = vmatprep.subr.bf16.mxu1 %v1010_v43 }
  0x3f   :  { %1013 = vmatpush1.bf16.msra.mxu1 %v1012_v48 }
  0x40   :  { %1051 = vmatprep.subr.bf16.mxu1 %v1367_v54  ;;  %v1647_v54 = vsub.s32 0, %v1288_v15 }
  0x9b   :  { %v199_v49 = vpop.xlane.xlu0 %198 }
  0x9c   :  { %v200_v50 = vmax.f32 %v199_v49, 1e-24 }
  0x9e   :  { %1139 = vrsqrt.f32 %v200_v50 }
  0xa8   :  { %v1140_v56 = vpop.eup %1139 }
  0xa9   :  { %v209_v59 = vrot.slane %v1140_v56, %v208_v55 }
  0xab   :  { %v211_v60 = vmul.f32 %v209_v59, %v1296_v19  ;;  %v1641_v19 = vsub.s32 1, %v1288_v15  ;;  %v263_v15 = vld [vmem:[%s1868_s6 + $0x8] sm:$0xff] }
  0xad   :  { %v295_v63 = vrot.slane %v211_v60, %v1305_v23  ;;  %v85_v23 = vld [vmem:[%s1864_s2] sm:$0x3] }
  0xaf   :  { %v296_v0 = vcombine.high %v295_v63, %v295_v63 }
  0xb1   :  { %910 = vmatprep.mubr.msk.f32.mxu1 %vm107_vm2, %v296_v0 }
  0xb2   :  { %365 = vmatmul.mubr.f32.vlgmr.msra.gmra.mrb[0].mxu1 %v295_v63 }
  0xb3   :  { %1053 = vmatpush1.bf16.msra.mxu1 %v1378_v58  ;;  %v94_v58 = vrot.slane %v85_v23, %v1641_v19 }
  0xb4   :  { %1055 = vmatprep.subr.bf16.mxu1 %v1390_v62  ;;  %v90_v62 = vrot.slane %v85_v23, %v1647_v54 }
  0xb7   :  { %1057 = vmatpush1.bf16.msra.mxu1 %v1405_v4 }
  0xb8   :  { %1059 = vmatprep.subr.bf16.mxu1 %v1411_v7 }
  0xbb   :  { %1061 = vmatpush1.bf16.msra.mxu1 %v1438_v18 }
  0xbc   :  { %1063 = vmatprep.subr.bf16.mxu1 %v1441_v21 }
  0xbf   :  { %1065 = vmatpush1.bf16.msra.mxu1 %v1465_v32  ;;  %v262_v32 = vld [vmem:[%s1868_s6] sm:$0xff] }
  0xc0   :  { %1067 = vmatprep.subr.bf16.mxu1 %v1471_v35  ;;  %v1658_v35 = vpack.c.bf16 %v263_v15, %v262_v32 }
  0xc3   :  { %1069 = vmatpush1.bf16.msra.mxu1 %v1495_v44  ;;  %v1203_v44 = vmov 0.0|0.0  }
  0xc4   :  { %1071 = vmatprep.subr.bf16.mxu1 %v1501_v47  ;;  %1014 = vmatprep.subr.bf16.mxu0 %v1203_v44  ;;  %v264_v47 = vld [vmem:[%s1868_s6 + $0x10] sm:$0xff] }
  0xc5   :  { %1016 = vmatpush1.bf16.msra.mxu0 %v1658_v35 }
  0xc6   :  { %1017 = vmatprep.subr.bf16.mxu0 %v1203_v44 }
  0xc7   :  { %1073 = vmatpush1.bf16.msra.mxu1 %v1525_v57  ;;  %v265_v57 = vld [vmem:[%s1868_s6 + $0x18] sm:$0xff] }
  0xc8   :  { %1075 = vmatprep.subr.bf16.mxu1 %v1531_v61  ;;  %v1669_v61 = vpack.c.bf16 %v265_v57, %v264_v47 }
  0xca   :  { %1019 = vmatpush1.bf16.msra.mxu0 %v1669_v61 }
  0xcb   :  { %1077 = vmatpush1.bf16.msra.mxu1 %v1552_v8  ;;  %1020 = vmatprep.subr.bf16.mxu0 %v1203_v44  ;;  %v1689_v8 = vpack.c.bf16 %v269_v6, %v268_v5 }
  0xcc   :  { %1079 = vmatprep.subr.bf16.mxu1 %v1558_v11  ;;  %v1699_v11 = vpack.c.bf16 %v271_v10, %v270_v9 }
  0xce   :  { %1022 = vmatpush1.bf16.msra.mxu0 %v1679_v3 }
  0xcf   :  { %1081 = vmatpush1.bf16.msra.mxu1 %v1573_v20  ;;  %1023 = vmatprep.subr.bf16.mxu0 %v1203_v44  ;;  %v1719_v20 = vpack.c.bf16 %v275_v17, %v274_v16 }
  0xd0   :  { %1083 = vmatprep.subr.bf16.mxu1 %v998_v22  ;;  %v276_v22 = vld [vmem:[%s1868_s6 + $0x70] sm:$0xff] }
  0xd1   :  { %v1729_v25 = vpack.c.bf16 %v277_v24, %v276_v22  ;;  %v260_v24 = vld [vmem:[%s1866_s4] sm:$0x3] }
  0xd2   :  { %1025 = vmatpush1.bf16.msra.mxu0 %v1689_v8 }
  0xd3   :  { %1085 = vmatpush1.bf16.msra.mxu1 %v1000_v29  ;;  %1026 = vmatprep.subr.bf16.mxu0 %v1203_v44  ;;  %v1739_v29 = vpack.c.bf16 %v279_v27, %v278_v26  ;;  %v261_v26 = vld [vmem:[%s1867_s5] sm:$0x3]  ;;  %v418_v27 = vrot.slane %v260_v24, %v1647_v54 }
  0xd4   :  { %1087 = vmatprep.subr.bf16.mxu1 %v1002_v30  ;;  %v280_v30 = vld [vmem:[%s1868_s6 + $0x90] sm:$0xff] }
  0xd5   :  { %v1749_v33 = vpack.c.bf16 %v281_v31, %v280_v30  ;;  %v422_v31 = vrot.slane %v260_v24, %v1641_v19 }
  0xd6   :  { %1028 = vmatpush1.bf16.msra.mxu0 %v1699_v11 }
  0xd7   :  { %1089 = vmatpush1.bf16.msra.mxu1 %v1004_v37  ;;  %1029 = vmatprep.subr.bf16.mxu0 %v1203_v44  ;;  %v1759_v37 = vpack.c.bf16 %v283_v36, %v282_v34 }
  0xd8   :  { %1091 = vmatprep.subr.bf16.mxu1 %v1006_v38  ;;  %v284_v38 = vld [vmem:[%s1868_s6 + $0xb0] sm:$0xff] }
  0xd9   :  { %v1769_v40 = vpack.c.bf16 %v285_v39, %v284_v38  ;;  %v431_v38 = vrot.slane %v261_v26, %v1647_v54 }
  0xda   :  { %1031 = vmatpush1.bf16.msra.mxu0 %v1709_v14 }
  0xdb   :  { %1093 = vmatpush1.bf16.msra.mxu1 %v1008_v42  ;;  %1032 = vmatprep.subr.bf16.mxu0 %v1203_v44 }
  0xdc   :  { %1095 = vmatprep.subr.bf16.mxu1 %v1010_v43 }
  0xde   :  { %1034 = vmatpush1.bf16.msra.mxu0 %v1719_v20 }
  0xdf   :  { %1097 = vmatpush1.bf16.msra.mxu1 %v1012_v48  ;;  %1035 = vmatprep.subr.bf16.mxu0 %v1203_v44 }
  0xe2   :  { %1037 = vmatpush1.bf16.msra.mxu0 %v1729_v25 }
  0xe3   :  { %1038 = vmatprep.subr.bf16.mxu0 %v1203_v44 }
  0xe6   :  { %1040 = vmatpush1.bf16.msra.mxu0 %v1739_v29 }
  0xe7   :  { %1041 = vmatprep.subr.bf16.mxu0 %v1203_v44 }
  0xea   :  { %1043 = vmatpush1.bf16.msra.mxu0 %v1749_v33 }
  0xeb   :  { %1044 = vmatprep.subr.bf16.mxu0 %v1203_v44 }
  0xee   :  { %1046 = vmatpush1.bf16.msra.mxu0 %v1759_v37 }
  0xef   :  { %1047 = vmatprep.subr.bf16.mxu0 %v1203_v44 }
  0xf2   :  { %1049 = vmatpush1.bf16.msra.mxu0 %v1769_v40 }
  0xf3   :  { %1098 = vmatprep.subr.bf16.mxu0 %v1203_v44 }
 0x107   :  { %v176_v4 = vpop.f32.mrb[0].mxu0 }
 0x108   :  { %v178_v7 = vpop.f32.mrb[1].mxu0  ;;  %v177_v21 = vadd.f32 %v176_v4, %v90_v62 }
 0x109   :  { %v179_v18 = vadd.f32 %v178_v7, %v94_v58 }
 0x10b   :  { %914 = vmatprep.mubr.msk.f32.mxu1 %vm107_vm2, %v179_v18 }
 0x10c   :  { %696 = vmatmul.mubr.f32.vlgmr.msra.gmra.mrb[2].mxu1 %v177_v21 }
 0x185   :  { %v366_v41 = vpop.f32.mrb[0].mxu1 }
 0x186   :  { %v371_v28 = vsel %vm193_vm0, %v366_v41, 0.0  ;;  %v368_v42 = vpop.f32.mrb[1].mxu1 }
 0x187   :  { %v372_v43 = vrot.slane %v371_v28, 4  ;;  %v378_v45 = vsel %vm195_vm1, %v368_v42, 0.0 }
 0x188   :  { %v379_v46 = vrot.slane %v378_v45, 4 }
 0x189   :  { %v373_v48 = vadd.f32 %v372_v43, %v371_v28 }
 0x18a   :  { %v380_v49 = vadd.f32 %v379_v46, %v378_v45 }
 0x18b   :  { %v374_v50 = vrot.slane %v373_v48, 2 }
 0x18c   :  { %v381_v51 = vrot.slane %v380_v49, 2 }
 0x18d   :  { %v375_v52 = vadd.f32 %v374_v50, %v373_v48 }
 0x18e   :  { %v382_v53 = vadd.f32 %v381_v51, %v380_v49 }
 0x18f   :  { %v376_v55 = vrot.slane %v375_v52, 1 }
 0x190   :  { %v383_v56 = vrot.slane %v382_v53, 1 }
 0x191   :  { %v377_v59 = vadd.f32 %v376_v55, %v375_v52 }
 0x192   :  { %v384_v60 = vadd.f32 %v383_v56, %v382_v53 }
 0x193   :  { %v386_v63 = vmul.f32 0.5, %v377_v59 }
 0x194   :  { %v387_v0 = vmul.f32 0.5, %v384_v60 }
 0x195   :  { %v388_v23 = vsub.f32 %v366_v41, %v386_v63  ;;  %v435_v41 = vrot.slane %v261_v26, %v1641_v19 }
 0x196   :  { %v389_v58 = vsub.f32 %v368_v42, %v387_v0 }
 0x197   :  { %v390_v62 = vmul.f32 %v388_v23, %v388_v23 }
 0x198   :  { %v391_v4 = vmul.f32 %v389_v58, %v389_v58 }
 0x199   :  { %v392_v7 = vsel %vm193_vm0, %v390_v62, 0.0 }
 0x19a   :  { %v393_v18 = vrot.slane %v392_v7, 4  ;;  %v399_v21 = vsel %vm195_vm1, %v391_v4, 0.0 }
 0x19b   :  { %v400_v32 = vrot.slane %v399_v21, 4 }
 0x19c   :  { %v394_v15 = vadd.f32 %v393_v18, %v392_v7 }
 0x19d   :  { %v401_v47 = vadd.f32 %v400_v32, %v399_v21 }
 0x19e   :  { %v395_v57 = vrot.slane %v394_v15, 2 }
 0x19f   :  { %v402_v1 = vrot.slane %v401_v47, 2 }
 0x1a0   :  { %v396_v2 = vadd.f32 %v395_v57, %v394_v15 }
 0x1a1   :  { %v403_v5 = vadd.f32 %v402_v1, %v401_v47 }
 0x1a2   :  { %v397_v6 = vrot.slane %v396_v2, 1 }
 0x1a3   :  { %v404_v9 = vrot.slane %v403_v5, 1 }
 0x1a4   :  { %v398_v10 = vadd.f32 %v397_v6, %v396_v2 }
 0x1a5   :  { %v405_v12 = vadd.f32 %v404_v9, %v403_v5 }
 0x1a6   :  { %v406_v13 = vmul.f32 0.5, %v398_v10  ;;  %v600_v10 = vld [vmem:[%s1866_s4] sm:$0x3] }
 0x1a7   :  { %v407_v16 = vmul.f32 0.5, %v405_v12  ;;  %v601_v12 = vld [vmem:[%s1867_s5] sm:$0x3] }
 0x1a8   :  { %v408_v17 = vadd.f32 1e-05, %v406_v13  ;;  %v748_v13 = vrot.slane %v600_v10, %v1647_v54  ;;  %v761_v26 = vrot.slane %v601_v12, %v1647_v54 }
 0x1a9   :  { %v409_v22 = vadd.f32 1e-05, %v407_v16 }
 0x1aa   :  { %1141 = vrsqrt.f32 %v408_v17  ;;  %v752_v17 = vrot.slane %v600_v10, %v1641_v19 }
 0x1ab   :  { %1143 = vrsqrt.f32 %v409_v22 }
 0x1b4   :  { %v1142_v30 = vpop.eup %1141 }
 0x1b5   :  { %v1144_v34 = vpop.eup %1143  ;;  %v412_v36 = vmul.f32 %v1142_v30, %v388_v23  ;;  %v765_v30 = vrot.slane %v601_v12, %v1641_v19 }
 0x1b6   :  { %v413_v39 = vmul.f32 %v1144_v34, %v389_v58 }
 0x1b7   :  { %v425_v28 = vmul.f32 %v418_v27, %v412_v36 }
 0x1b8   :  { %v426_v42 = vmul.f32 %v422_v31, %v413_v39 }
 0x1b9   :  { %v438_v43 = vadd.f32 %v431_v38, %v425_v28 }
 0x1ba   :  { %v439_v45 = vadd.f32 %v435_v41, %v426_v42 }
 0x1bb   :  { %v440_v48 = vmax.f32 %v438_v43, 0.0 }
 0x1bc   :  { %v441_v46 = vmax.f32 %v439_v45, 0.0 }
 0x1be   :  { %911 = vmatprep.mubr.msk.f32.mxu0 %vm107_vm2, %v441_v46 }
 0x1bf   :  { %510 = vmatmul.mubr.f32.vlgmr.msra.gmra.mrb[2].mxu0 %v440_v48 }
 0x1c0   :  { %1100 = vmatpush1.bf16.msra.mxu0 %v1658_v35 }
 0x1c1   :  { %1101 = vmatprep.subr.bf16.mxu0 %v1203_v44 }
 0x1c4   :  { %1103 = vmatpush1.bf16.msra.mxu0 %v1669_v61 }
 0x1c5   :  { %1104 = vmatprep.subr.bf16.mxu0 %v1203_v44 }
 0x1c8   :  { %1106 = vmatpush1.bf16.msra.mxu0 %v1679_v3 }
 0x1c9   :  { %1107 = vmatprep.subr.bf16.mxu0 %v1203_v44 }
 0x1cc   :  { %1109 = vmatpush1.bf16.msra.mxu0 %v1689_v8 }
 0x1cd   :  { %1110 = vmatprep.subr.bf16.mxu0 %v1203_v44 }
 0x1d0   :  { %1112 = vmatpush1.bf16.msra.mxu0 %v1699_v11 }
 0x1d1   :  { %1113 = vmatprep.subr.bf16.mxu0 %v1203_v44 }
 0x1d4   :  { %1115 = vmatpush1.bf16.msra.mxu0 %v1709_v14 }
 0x1d5   :  { %1116 = vmatprep.subr.bf16.mxu0 %v1203_v44 }
 0x1d8   :  { %1118 = vmatpush1.bf16.msra.mxu0 %v1719_v20 }
 0x1d9   :  { %1119 = vmatprep.subr.bf16.mxu0 %v1203_v44 }
 0x1dc   :  { %1121 = vmatpush1.bf16.msra.mxu0 %v1729_v25 }
 0x1dd   :  { %1122 = vmatprep.subr.bf16.mxu0 %v1203_v44 }
 0x1df   :  { %v697_v35 = vpop.f32.mrb[2].mxu1 }
 0x1e0   :  { %v702_v61 = vsel %vm193_vm0, %v697_v35, 0.0  ;;  %v699_v3 = vpop.f32.mrb[3].mxu1  ;;  %1124 = vmatpush1.bf16.msra.mxu0 %v1739_v29 }
 0x1e1   :  { %v703_v8 = vrot.slane %v702_v61, 4  ;;  %v709_v11 = vsel %vm195_vm1, %v699_v3, 0.0  ;;  %1125 = vmatprep.subr.bf16.mxu0 %v1203_v44 }
 0x1e2   :  { %v710_v14 = vrot.slane %v709_v11, 4 }
 0x1e3   :  { %v704_v49 = vadd.f32 %v703_v8, %v702_v61 }
 0x1e4   :  { %v711_v20 = vadd.f32 %v710_v14, %v709_v11  ;;  %1127 = vmatpush1.bf16.msra.mxu0 %v1749_v33 }
 0x1e5   :  { %v705_v50 = vrot.slane %v704_v49, 2  ;;  %1128 = vmatprep.subr.bf16.mxu0 %v1203_v44 }
 0x1e6   :  { %v712_v25 = vrot.slane %v711_v20, 2 }
 0x1e7   :  { %v706_v51 = vadd.f32 %v705_v50, %v704_v49 }
 0x1e8   :  { %v713_v52 = vadd.f32 %v712_v25, %v711_v20  ;;  %1130 = vmatpush1.bf16.msra.mxu0 %v1759_v37 }
 0x1e9   :  { %v707_v53 = vrot.slane %v706_v51, 1  ;;  %1131 = vmatprep.subr.bf16.mxu0 %v1203_v44 }
 0x1ea   :  { %v714_v55 = vrot.slane %v713_v52, 1 }
 0x1eb   :  { %v708_v29 = vadd.f32 %v707_v53, %v706_v51 }
 0x1ec   :  { %v715_v56 = vadd.f32 %v714_v55, %v713_v52  ;;  %1133 = vmatpush1.bf16.msra.mxu0 %v1769_v40 }
 0x1ed   :  { %v716_v59 = vmul.f32 0.5, %v708_v29  ;;  %v912_v29 = vld [vmem:[%s1869_s7] ss:$0 sm:$0xff] }
 0x1ee   :  { %v717_v60 = vmul.f32 0.5, %v715_v56 }
 0x1ef   :  { %v718_v63 = vsub.f32 %v697_v35, %v716_v59  ;;  %v913_v59 = vld [vmem:[%s1870_s8] ss:$0 sm:$0xff] }
 0x1f0   :  { %v719_v0 = vsub.f32 %v699_v3, %v717_v60 }
 0x1f1   :  { %v720_v33 = vmul.f32 %v718_v63, %v718_v63 }
 0x1f2   :  { %v721_v23 = vmul.f32 %v719_v0, %v719_v0 }
 0x1f3   :  { %v722_v58 = vsel %vm193_vm0, %v720_v33, 0.0 }
 0x1f4   :  { %v723_v62 = vrot.slane %v722_v58, 4  ;;  %v729_v4 = vsel %vm195_vm1, %v721_v23, 0.0 }
 0x1f5   :  { %v730_v7 = vrot.slane %v729_v4, 4 }
 0x1f6   :  { %v724_v37 = vadd.f32 %v723_v62, %v722_v58 }
 0x1f7   :  { %v731_v18 = vadd.f32 %v730_v7, %v729_v4 }
 0x1f8   :  { %v725_v21 = vrot.slane %v724_v37, 2 }
 0x1f9   :  { %v732_v44 = vrot.slane %v731_v18, 2 }
 0x1fa   :  { %v726_v32 = vadd.f32 %v725_v21, %v724_v37 }
 0x1fb   :  { %v733_v15 = vadd.f32 %v732_v44, %v731_v18 }
 0x1fc   :  { %v727_v47 = vrot.slane %v726_v32, 1 }
 0x1fd   :  { %v734_v57 = vrot.slane %v733_v15, 1 }
 0x1fe   :  { %v728_v40 = vadd.f32 %v727_v47, %v726_v32 }
 0x1ff   :  { %v735_v1 = vadd.f32 %v734_v57, %v733_v15 }
 0x200   :  { %v736_v2 = vmul.f32 0.5, %v728_v40 }
 0x201   :  { %v737_v5 = vmul.f32 0.5, %v735_v1 }
 0x202   :  { %v738_v6 = vadd.f32 1e-05, %v736_v2 }
 0x203   :  { %v739_v9 = vadd.f32 1e-05, %v737_v5 }
 0x204   :  { %1145 = vrsqrt.f32 %v738_v6 }
 0x205   :  { %1147 = vrsqrt.f32 %v739_v9 }
 0x20e   :  { %v1146_v16 = vpop.eup %1145 }
 0x20f   :  { %v1148_v22 = vpop.eup %1147  ;;  %v742_v24 = vmul.f32 %v1146_v16, %v718_v63 }
 0x210   :  { %v743_v27 = vmul.f32 %v1148_v22, %v719_v0 }
 0x211   :  { %v755_v31 = vmul.f32 %v748_v13, %v742_v24 }
 0x212   :  { %v756_v34 = vmul.f32 %v752_v17, %v743_v27 }
 0x213   :  { %v768_v36 = vadd.f32 %v761_v26, %v755_v31 }
 0x214   :  { %v769_v38 = vadd.f32 %v765_v30, %v756_v34 }
 0x215   :  { %v770_v41 = vmax.f32 %v768_v36, 0.0 }
 0x216   :  { %v771_v39 = vmax.f32 %v769_v38, 0.0 }
 0x218   :  { %915 = vmatprep.mubr.msk.f32.mxu0 %vm107_vm2, %v771_v39 }
 0x219   :  { %840 = vmatmul.mubr.f32.vlgmr.msra.gmra.mrb[4].mxu0 %v770_v41 }
 0x292   :  { %v511_v28 = vpop.f32.mrb[2].mxu0 }
 0x293   :  { %v516_v42 = vsel %vm515_vm3, %v511_v28, 0.0  ;;  %v513_v43 = vpop.f32.mrb[3].mxu0 }
 0x294   :  { %v517_v45 = vrot.slane %v516_v42, 4 }
 0x296   :  { %v518_v46 = vadd.f32 %v517_v45, %v516_v42 }
 0x298   :  { %v519_v54 = vrot.slane %v518_v46, 2 }
 0x29a   :  { %v520_v48 = vadd.f32 %v519_v54, %v518_v46 }
 0x29c   :  { %v521_v35 = vrot.slane %v520_v48, 1 }
 0x29e   :  { %v522_v19 = vadd.f32 %v521_v35, %v520_v48 }
 0x2a0   :  { %v523_v61 = vmul.f32 0.5, %v522_v19 }
 0x2a2   :  { %v524_v3 = vsub.f32 %v511_v28, %v523_v61 }
 0x2a4   :  { %v525_v8 = vmul.f32 %v524_v3, %v524_v3 }
 0x2a6   :  { %v526_v11 = vsel %vm515_vm3, %v525_v8, 0.0 }
 0x2a7   :  { %v527_v14 = vrot.slane %v526_v11, 4 }
 0x2a9   :  { %v528_v49 = vadd.f32 %v527_v14, %v526_v11 }
 0x2ab   :  { %v529_v20 = vrot.slane %v528_v49, 2 }
 0x2ad   :  { %v530_v50 = vadd.f32 %v529_v20, %v528_v49 }
 0x2af   :  { %v531_v25 = vrot.slane %v530_v50, 1 }
 0x2b1   :  { %v532_v51 = vadd.f32 %v531_v25, %v530_v50 }
 0x2b3   :  { %v533_v52 = vmul.f32 0.5, %v532_v51 }
 0x2b5   :  { %v534_v53 = vadd.f32 1e-05, %v533_v52 }
 0x2b7   :  { %1149 = vrsqrt.f32 %v534_v53 }
 0x2c1   :  { %v1150_v55 = vpop.eup %1149 }
 0x2c2   :  { %v536_v56 = vmul.f32 %v1150_v55, %v524_v3 }
 0x2c4   :  { %v543_v60 = vmul.f32 %v912_v29, %v536_v56 }
 0x2c6   :  { %v550_v63 = vadd.f32 %v913_v59, %v543_v60 }
 0x2c8   :  { %551 = vst.msk [vmem:[#allocation2] sm:$0x3] %vm515_vm3, %v550_v63 }
 0x2c9   :  { %1164 = shalt.err (!%p1161_p4)
}
 0x2ca   :  { %s1165_s29 = scalar_lea.hbm %s1871_s9, 32 }
 0x2cb   :  { %p1166_p5 = scmp.ne.s32.totalorder %s1871_s9, %s1165_s29  ;;  %p1169_p6 = scmp.lt.u32.totalorder %s1165_s29, %s1871_s9 }
 0x2cd   :  { %p1171_p7 = pnand %p1169_p6, %p1166_p5 }
 0x2cf   :  { %1174 = shalt.err (!%p1171_p7)
}
 0x2d0   :  { %890 = dma.vmem_to_hbm [thread:$0]  %s888_s26, 32, %s1871_s9, [#allocation3]  }
 0x2d1   :  { %s1205_s9 = smov [#allocation4]  }
 0x2d2   :  { %s897_s14 = sshll.u32 %s1205_s9, 4  ;;  %s898_s14 = int_to_ptr.vmem [resolvable:$true] %s897_s14 }
 0x2d3   :  { %s1175_s15 = scalar_lea.vmem %s898_s14, 32  ;;  %p1180_p9 = scmp.lt.s32.totalorder %s898_s14, %s898_s14 }
 0x2d4   :  { %p1176_p8 = scmp.ne.s32.totalorder %s898_s14, %s1175_s15  ;;  %p1181_p10 = scmp.lt.s32.totalorder %s1175_s15, %s1175_s15 }
 0x2d6   :  { %p1182_p11 = por %p1181_p10, %p1180_p9 }
 0x2d8   :  { %p1183_p12 = pnand %p1182_p11, %p1176_p8 }
 0x2ec   :  { %v841_v0 = vpop.f32.mrb[4].mxu0 }
 0x2ed   :  { %v845_v33 = vsel %vm515_vm3, %v841_v0, 0.0  ;;  %v843_v23 = vpop.f32.mrb[5].mxu0 }
 0x2ee   :  { %v846_v58 = vrot.slane %v845_v33, 4 }
 0x2f0   :  { %v847_v62 = vadd.f32 %v846_v58, %v845_v33 }
 0x2f2   :  { %v848_v4 = vrot.slane %v847_v62, 2 }
 0x2f4   :  { %v849_v7 = vadd.f32 %v848_v4, %v847_v62 }
 0x2f6   :  { %v850_v37 = vrot.slane %v849_v7, 1 }
 0x2f8   :  { %v851_v18 = vadd.f32 %v850_v37, %v849_v7 }
 0x2fa   :  { %v852_v21 = vmul.f32 0.5, %v851_v18 }
 0x2fc   :  { %v853_v44 = vsub.f32 %v841_v0, %v852_v21 }
 0x2fe   :  { %v854_v32 = vmul.f32 %v853_v44, %v853_v44 }
 0x300   :  { %v855_v15 = vsel %vm515_vm3, %v854_v32, 0.0 }
 0x301   :  { %v856_v47 = vrot.slane %v855_v15, 4 }
 0x303   :  { %v857_v57 = vadd.f32 %v856_v47, %v855_v15 }
 0x305   :  { %v858_v40 = vrot.slane %v857_v57, 2 }
 0x307   :  { %v859_v1 = vadd.f32 %v858_v40, %v857_v57 }
 0x309   :  { %v860_v2 = vrot.slane %v859_v1, 1 }
 0x30b   :  { %v861_v5 = vadd.f32 %v860_v2, %v859_v1 }
 0x30d   :  { %v862_v6 = vmul.f32 0.5, %v861_v5 }
 0x30f   :  { %v863_v9 = vadd.f32 1e-05, %v862_v6 }
 0x311   :  { %1151 = vrsqrt.f32 %v863_v9 }
 0x31b   :  { %v1152_v10 = vpop.eup %1151 }
 0x31c   :  { %v865_v12 = vmul.f32 %v1152_v10, %v853_v44 }
 0x31e   :  { %v872_v13 = vmul.f32 %v912_v29, %v865_v12 }
 0x320   :  { %v879_v16 = vadd.f32 %v913_v59, %v872_v13 }
 0x322   :  { %880 = vst.msk [vmem:[#allocation4] sm:$0x3] %vm515_vm3, %v879_v16 }
 0x323   :  { %1186 = shalt.err (!%p1183_p12)
}
 0x324   :  { %s1187_s17 = scalar_lea.hbm %s1872_s10, 32 }
 0x325   :  { %p1188_p13 = scmp.ne.s32.totalorder %s1872_s10, %s1187_s17  ;;  %p1191_p0 = scmp.lt.u32.totalorder %s1187_s17, %s1872_s10 }
 0x327   :  { %p1193_p1 = pnand %p1191_p0, %p1188_p13 }
 0x329   :  { %1196 = shalt.err (!%p1193_p1)
}
 0x32a   :  { %900 = dma.vmem_to_hbm [thread:$0]  %s898_s14, 32, %s1872_s10, [#allocation5]  }
 0x32b   :  { %1197 = dma.done.wait [#allocation3], 32  }
 0x32c   :  { %1198 = vsyncadd [#allocation3], 4294967264 }
 0x32d   :  { %1199 = dma.done.wait [#allocation5], 32  }
 0x32e   :  { %1200 = vsyncadd [#allocation5], 4294967264 }
 0x32f   :  { %907 = vsyncpa [#allocation3], 1 }
 0x330   :  { %908 = vsyncpa [#allocation5], 1 }

</bundles_post_ra>
